<compile_context>
chip_gen: v7x
topology: tpu7x:2x2x1
jax: 0.10.0
libtpu: 0.0.40
codegen_flags: <defaults>
</compile_context>

<pallas_src>
from functools import partial
from math import exp

import numpy as np

import jax
import jax.numpy as jnp
from jax.experimental import pallas as pl
from jax.experimental.pallas import tpu as pltpu

WINDOW_SIZE = 11
SIGMA = 1.5
C1 = 0.01 ** 2
C2 = 0.03 ** 2


def _gaussian_1d(window_size: int, sigma: float) -> np.ndarray:
    g = np.array(
        [exp(-((x - window_size // 2) ** 2) / float(2 * sigma ** 2)) for x in range(window_size)],
        dtype=np.float64,
    )
    return (g / g.sum()).astype(np.float32)


def _gaussian_window_2d(window_size: int, sigma: float) -> np.ndarray:
    g = _gaussian_1d(window_size, sigma)
    return np.outer(g, g).astype(np.float32)


def _band_conv_matrix_t(n: int, g: np.ndarray) -> np.ndarray:
    """A (n,n) with A[p,i] = g[p-i+r]: x @ A == 1-D zero-padded 'same' conv of x (last axis)."""
    k = g.shape[0]
    r = k // 2
    m = np.zeros((n, n), dtype=np.float32)
    for i in range(n):
        for t in range(k):
            p = i + t - r
            if 0 <= p < n:
                m[p, i] = g[t]
    return m


def _ssim_kernel(awt_ref, img1_ref, img2_ref, out_ref, pad_ref, *,
                 taps, pad_lo, precision):
    # awt_ref:  (W, W)        banded W-conv matrix (right-multiply), constant
    # img*_ref: (CB, H, W)    unpadded input planes
    # out_ref:  (CB, H, W)    SSIM map planes
    # pad_ref:  (5*CB, H+2*pad_lo, W) f32 scratch slab for the five conv inputs
    cb, h, w = img1_ref.shape
    k = len(taps)
    r = k // 2

    x1 = img1_ref[...].astype(jnp.float32)
    x2 = img2_ref[...].astype(jnp.float32)

    # ---- stage the five conv inputs (whole block) into one zero-padded slab ----
    pad_hi = pad_ref.shape[1] - pad_lo - h
    pad_ref[:, 0:pad_lo, :] = jnp.zeros((5 * cb, pad_lo, w), jnp.float32)
    pad_ref[:, pad_lo + h:pad_lo + h + pad_hi, :] = jnp.zeros((5 * cb, pad_hi, w), jnp.float32)
    pad_ref[0 * cb:1 * cb, pad_lo:pad_lo + h, :] = x1
    pad_ref[1 * cb:2 * cb, pad_lo:pad_lo + h, :] = x2
    pad_ref[2 * cb:3 * cb, pad_lo:pad_lo + h, :] = x1 * x1
    pad_ref[3 * cb:4 * cb, pad_lo:pad_lo + h, :] = x2 * x2
    pad_ref[4 * cb:5 * cb, pad_lo:pad_lo + h, :] = x1 * x2

    # ---- H-conv: k sublane-shifted MACs on the VPU over the whole 5*CB slab ----
    # Zero 'same' padding comes from the zeroed halo rows above.
    pb = pad_ref[...]
    base = pad_lo - r
    th = pb[:, base:base + h, :] * taps[0]
    for t in range(1, k):
        th = th + pb[:, base + t:base + t + h, :] * taps[t]

    # ---- W-conv: one MXU matmul for the whole slab (padding baked into A_wt) ----
    tw = jnp.dot(th.reshape(5 * cb * h, w), awt_ref[...],
                 precision=precision, preferred_element_type=jnp.float32)

    ph = cb * h
    mu1 = tw[0 * ph:1 * ph]
    mu2 = tw[1 * ph:2 * ph]
    e11 = tw[2 * ph:3 * ph]
    e22 = tw[3 * ph:4 * ph]
    e12 = tw[4 * ph:5 * ph]

    mu1_sq = mu1 * mu1
    mu2_sq = mu2 * mu2
    mu12 = mu1 * mu2
    sigma1_sq = e11 - mu1_sq
    sigma2_sq = e22 - mu2_sq
    sigma12 = e12 - mu12

    num = (2.0 * mu12 + C1) * (2.0 * sigma12 + C2)
    den = (mu1_sq + mu2_sq + C1) * (sigma1_sq + sigma2_sq + C2)
    inv = pl.reciprocal(den, approx=True)     # EUP slot (free alongside VPU/MXU)
    inv = inv * (2.0 - den * inv)             # one Newton step -> ~f32 accuracy
    out_ref[...] = (num * inv).reshape(cb, h, w).astype(out_ref.dtype)


def _vmem_capacity_bytes() -> int:
    try:
        cap = int(getattr(pltpu.get_tpu_info(), "vmem_capacity_bytes", 0))
        if cap > 0:
            return cap
    except Exception:
        pass
    return 64 * 1024 * 1024  # conservative fallback: v7x per-TensorCore VMEM


def ssim_pallas(img1: jax.Array, img2: jax.Array,
                window_size: int = WINDOW_SIZE, sigma: float = SIGMA,
                precision=jax.lax.Precision.HIGHEST) -> jax.Array:
    """Full SSIM map, shape (N, C, H, W), matching the PyTorch SSIM.forward()."""
    assert img1.shape == img2.shape
    n, c, h, w = img1.shape
    p = n * c

    x1 = img1.reshape(p, h, w)
    x2 = img2.reshape(p, h, w)

    g = _gaussian_1d(window_size, sigma)
    a_wt = jnp.asarray(_band_conv_matrix_t(w, g))     # (W, W), right-multiply
    r = window_size // 2
    pad_lo = ((r + 7) // 8) * 8                       # sublane-aligned halo

    # --- generation-aware VMEM budgeting (v5e/v6e: 128 MiB, v7x: 64 MiB) ---
    vmem_cap = _vmem_capacity_bytes()
    vmem_limit = max(32 * 1024 * 1024, min(int(vmem_cap * 0.75), 100 * 1024 * 1024))
    budget = int(vmem_cap * 0.5)

    plane_bytes = h * w * 4
    # 2 inputs + 1 output block x 2 pipeline buffers + the 5-signal padded slab
    # + ~20 plane-sized f32 intermediates.
    per_plane = 34 * plane_bytes
    const_bytes = 2 * w * w * 4
    cb = max(1, min(p, (budget - const_bytes) // max(per_plane, 1)))
    if p >= 2:
        # Keep >= 2 grid steps so v7x megacore can shard the 'parallel' axis.
        cb = min(cb, p // 2)
    cb = int(max(1, cb))

    # cdiv + zero-padded tail planes instead of a divisor search.
    grid_len = int(pl.cdiv(p, cb))
    p_pad = grid_len * cb
    if p_pad != p:
        zeros = jnp.zeros((p_pad - p, h, w), img1.dtype)
        x1 = jnp.concatenate([x1, zeros], axis=0)
        x2 = jnp.concatenate([x2, zeros], axis=0)

    kernel = partial(_ssim_kernel,
                     taps=tuple(float(v) for v in g),
                     pad_lo=pad_lo,
                     precision=precision)

    out = pl.pallas_call(
        kernel,
        out_shape=jax.ShapeDtypeStruct((p_pad, h, w), img1.dtype),
        grid=(grid_len,),
        in_specs=[
            # Constant index_map -> fetched once; not re-DMA'd on later steps.
            # TODO(synk): for very large W use a banded/blocked A_wt (or a
            # single-buffered constant) so it does not double-buffer on v7x.
            pl.BlockSpec((w, w), lambda i: (0, 0)),
            pl.BlockSpec((cb, h, w), lambda i: (i, 0, 0)),
            pl.BlockSpec((cb, h, w), lambda i: (i, 0, 0)),
        ],
        out_specs=pl.BlockSpec((cb, h, w), lambda i: (i, 0, 0)),
        scratch_shapes=[pltpu.VMEM((5 * cb, h + 2 * pad_lo, w), jnp.float32)],
        compiler_params=pltpu.CompilerParams(
            dimension_semantics=("parallel",),
            vmem_limit_bytes=vmem_limit,
        ),
    )(a_wt, x1, x2)

    return out[:p].reshape(n, c, h, w)


def _ssim_ref_np(img1: np.ndarray, img2: np.ndarray, window_size: int = WINDOW_SIZE) -> np.ndarray:
    """Pure-numpy reference mirroring the PyTorch module."""
    w2d = _gaussian_window_2d(window_size, SIGMA)
    pad = window_size // 2
    _, _, h, w = img1.shape

    def conv(x):
        xp = np.pad(x, ((0, 0), (0, 0), (pad, pad), (pad, pad)))
        out = np.zeros_like(x, dtype=np.float32)
        for kh in range(window_size):
            for kw in range(window_size):
                out += w2d[kh, kw] * xp[:, :, kh:kh + h, kw:kw + w]
        return out

    mu1 = conv(img1)
    mu2 = conv(img2)
    mu1_sq = mu1 ** 2
    mu2_sq = mu2 ** 2
    mu1_mu2 = mu1 * mu2
    sigma1_sq = conv(img1 * img1) - mu1_sq
    sigma2_sq = conv(img2 * img2) - mu2_sq
    sigma12 = conv(img1 * img2) - mu1_mu2
    return (2 * mu1_mu2 + C1) * (2 * sigma12 + C2) / (
        (mu1_sq + mu2_sq + C1) * (sigma1_sq + sigma2_sq + C2))


if __name__ == "__main__":
    key = jax.random.PRNGKey(0)
    k1, k2 = jax.random.split(key)
    N, C, H, W = 2, 4, 16, 16
    img1 = jax.random.uniform(k1, (N, C, H, W), dtype=jnp.float32)
    img2 = jax.random.uniform(k2, (N, C, H, W), dtype=jnp.float32)

    out = jax.block_until_ready(ssim_pallas(img1, img2))

    ref = _ssim_ref_np(np.asarray(img1), np.asarray(img2))
    np.testing.assert_allclose(np.asarray(out), ref, rtol=2e-4, atol=1e-4)

    print("KERNEL_OK")
</pallas_src>

<mosaic_0001>
module attributes {stable_mosaic.version = 11 : i64} {
  func.func @_ssim_kernel(%arg0: i32, %arg1: memref<16x16xf32, #tpu.memory_space<vmem>>, %arg2: memref<4x16x16xf32, #tpu.memory_space<vmem>>, %arg3: memref<4x16x16xf32, #tpu.memory_space<vmem>>, %arg4: memref<4x16x16xf32, #tpu.memory_space<vmem>>, %arg5: memref<20x32x16xf32, #tpu.memory_space<vmem>>) attributes {dimension_semantics = [#tpu.dimension_semantics<parallel>], iteration_bounds = array<i64: 2>, scalar_prefetch = 0 : i64, scratch_operands = 1 : i64, tpu.core_type = #tpu.core_type<tc>, window_params = [{pipeline_mode = #tpu.pipeline_mode<synchronous>, transform_indices = @transform_0, window_bounds = array<i64: 16, 16>}, {transform_indices = @transform_1, window_bounds = array<i64: 4, 16, 16>}, {transform_indices = @transform_2, window_bounds = array<i64: 4, 16, 16>}, {transform_indices = @transform_3, window_bounds = array<i64: 4, 16, 16>}]} {
    %c0 = arith.constant 0 : index
    %c0_0 = arith.constant 0 : index
    %c0_1 = arith.constant 0 : index
    %0 = vector.load %arg2[%c0, %c0_0, %c0_1] : memref<4x16x16xf32, #tpu.memory_space<vmem>>, vector<4x16x16xf32>
    %c0_2 = arith.constant 0 : index
    %c0_3 = arith.constant 0 : index
    %c0_4 = arith.constant 0 : index
    %1 = vector.load %arg3[%c0_2, %c0_3, %c0_4] : memref<4x16x16xf32, #tpu.memory_space<vmem>>, vector<4x16x16xf32>
    %cst = arith.constant 0.000000e+00 : f32
    %2 = vector.broadcast %cst : f32 to vector<20x8x16xf32>
    %c0_5 = arith.constant 0 : index
    %c0_6 = arith.constant 0 : index
    %c0_7 = arith.constant 0 : index
    %3 = vector.load %arg5[%c0_5, %c0_6, %c0_7] : memref<20x32x16xf32, #tpu.memory_space<vmem>>, vector<20x8x16xf32>
    tpu.vector_store %arg5[%c0_5, %c0_6, %c0_7], %2 {strides = array<i32>} : memref<20x32x16xf32, #tpu.memory_space<vmem>>, vector<20x8x16xf32>,
    %cst_8 = arith.constant 0.000000e+00 : f32
    %4 = vector.broadcast %cst_8 : f32 to vector<20x8x16xf32>
    %c0_9 = arith.constant 0 : index
    %c24 = arith.constant 24 : index
    %c0_10 = arith.constant 0 : index
    %5 = vector.load %arg5[%c0_9, %c24, %c0_10] : memref<20x32x16xf32, #tpu.memory_space<vmem>>, vector<20x8x16xf32>
    tpu.vector_store %arg5[%c0_9, %c24, %c0_10], %4 {strides = array<i32>} : memref<20x32x16xf32, #tpu.memory_space<vmem>>, vector<20x8x16xf32>,
    %c0_11 = arith.constant 0 : index
    %c8 = arith.constant 8 : index
    %c0_12 = arith.constant 0 : index
    %6 = vector.load %arg5[%c0_11, %c8, %c0_12] : memref<20x32x16xf32, #tpu.memory_space<vmem>>, vector<4x16x16xf32>
    tpu.vector_store %arg5[%c0_11, %c8, %c0_12], %0 {strides = array<i32>} : memref<20x32x16xf32, #tpu.memory_space<vmem>>, vector<4x16x16xf32>,
    %c4 = arith.constant 4 : index
    %c8_13 = arith.constant 8 : index
    %c0_14 = arith.constant 0 : index
    %7 = vector.load %arg5[%c4, %c8_13, %c0_14] : memref<20x32x16xf32, #tpu.memory_space<vmem>>, vector<4x16x16xf32>
    tpu.vector_store %arg5[%c4, %c8_13, %c0_14], %1 {strides = array<i32>} : memref<20x32x16xf32, #tpu.memory_space<vmem>>, vector<4x16x16xf32>,
    %8 = arith.mulf %0, %0 : vector<4x16x16xf32>
    %c8_15 = arith.constant 8 : index
    %c8_16 = arith.constant 8 : index
    %c0_17 = arith.constant 0 : index
    %9 = vector.load %arg5[%c8_15, %c8_16, %c0_17] : memref<20x32x16xf32, #tpu.memory_space<vmem>>, vector<4x16x16xf32>
    tpu.vector_store %arg5[%c8_15, %c8_16, %c0_17], %8 {strides = array<i32>} : memref<20x32x16xf32, #tpu.memory_space<vmem>>, vector<4x16x16xf32>,
    %10 = arith.mulf %1, %1 : vector<4x16x16xf32>
    %c12 = arith.constant 12 : index
    %c8_18 = arith.constant 8 : index
    %c0_19 = arith.constant 0 : index
    %11 = vector.load %arg5[%c12, %c8_18, %c0_19] : memref<20x32x16xf32, #tpu.memory_space<vmem>>, vector<4x16x16xf32>
    tpu.vector_store %arg5[%c12, %c8_18, %c0_19], %10 {strides = array<i32>} : memref<20x32x16xf32, #tpu.memory_space<vmem>>, vector<4x16x16xf32>,
    %12 = arith.mulf %0, %1 : vector<4x16x16xf32>
    %c16 = arith.constant 16 : index
    %c8_20 = arith.constant 8 : index
    %c0_21 = arith.constant 0 : index
    %13 = vector.load %arg5[%c16, %c8_20, %c0_21] : memref<20x32x16xf32, #tpu.memory_space<vmem>>, vector<4x16x16xf32>
    tpu.vector_store %arg5[%c16, %c8_20, %c0_21], %12 {strides = array<i32>} : memref<20x32x16xf32, #tpu.memory_space<vmem>>, vector<4x16x16xf32>,
    %c0_22 = arith.constant 0 : index
    %c0_23 = arith.constant 0 : index
    %c0_24 = arith.constant 0 : index
    %14 = vector.load %arg5[%c0_22, %c0_23, %c0_24] : memref<20x32x16xf32, #tpu.memory_space<vmem>>, vector<20x32x16xf32>
    %15 = vector.extract_strided_slice %14 {offsets = [0, 3, 0], sizes = [20, 16, 16], strides = [1, 1, 1]} : vector<20x32x16xf32> to vector<20x16x16xf32>
    %cst_25 = arith.constant 0.00102838012 : f32
    %16 = vector.broadcast %cst_25 : f32 to vector<20x16x16xf32>
    %17 = arith.mulf %15, %16 : vector<20x16x16xf32>
    %18 = vector.extract_strided_slice %14 {offsets = [0, 4, 0], sizes = [20, 16, 16], strides = [1, 1, 1]} : vector<20x32x16xf32> to vector<20x16x16xf32>
    %cst_26 = arith.constant 0.00759875821 : f32
    %19 = vector.broadcast %cst_26 : f32 to vector<20x16x16xf32>
    %20 = arith.mulf %18, %19 : vector<20x16x16xf32>
    %21 = arith.addf %17, %20 : vector<20x16x16xf32>
    %22 = vector.extract_strided_slice %14 {offsets = [0, 5, 0], sizes = [20, 16, 16], strides = [1, 1, 1]} : vector<20x32x16xf32> to vector<20x16x16xf32>
    %cst_27 = arith.constant 0.0360007733 : f32
    %23 = vector.broadcast %cst_27 : f32 to vector<20x16x16xf32>
    %24 = arith.mulf %22, %23 : vector<20x16x16xf32>
    %25 = arith.addf %21, %24 : vector<20x16x16xf32>
    %26 = vector.extract_strided_slice %14 {offsets = [0, 6, 0], sizes = [20, 16, 16], strides = [1, 1, 1]} : vector<20x32x16xf32> to vector<20x16x16xf32>
    %cst_28 = arith.constant 0.109360687 : f32
    %27 = vector.broadcast %cst_28 : f32 to vector<20x16x16xf32>
    %28 = arith.mulf %26, %27 : vector<20x16x16xf32>
    %29 = arith.addf %25, %28 : vector<20x16x16xf32>
    %30 = vector.extract_strided_slice %14 {offsets = [0, 7, 0], sizes = [20, 16, 16], strides = [1, 1, 1]} : vector<20x32x16xf32> to vector<20x16x16xf32>
    %cst_29 = arith.constant 0.213005543 : f32
    %31 = vector.broadcast %cst_29 : f32 to vector<20x16x16xf32>
    %32 = arith.mulf %30, %31 : vector<20x16x16xf32>
    %33 = arith.addf %29, %32 : vector<20x16x16xf32>
    %34 = vector.extract_strided_slice %14 {offsets = [0, 8, 0], sizes = [20, 16, 16], strides = [1, 1, 1]} : vector<20x32x16xf32> to vector<20x16x16xf32>
    %cst_30 = arith.constant 0.266011715 : f32
    %35 = vector.broadcast %cst_30 : f32 to vector<20x16x16xf32>
    %36 = arith.mulf %34, %35 : vector<20x16x16xf32>
    %37 = arith.addf %33, %36 : vector<20x16x16xf32>
    %38 = vector.extract_strided_slice %14 {offsets = [0, 9, 0], sizes = [20, 16, 16], strides = [1, 1, 1]} : vector<20x32x16xf32> to vector<20x16x16xf32>
    %cst_31 = arith.constant 0.213005543 : f32
    %39 = vector.broadcast %cst_31 : f32 to vector<20x16x16xf32>
    %40 = arith.mulf %38, %39 : vector<20x16x16xf32>
    %41 = arith.addf %37, %40 : vector<20x16x16xf32>
    %42 = vector.extract_strided_slice %14 {offsets = [0, 10, 0], sizes = [20, 16, 16], strides = [1, 1, 1]} : vector<20x32x16xf32> to vector<20x16x16xf32>
    %cst_32 = arith.constant 0.109360687 : f32
    %43 = vector.broadcast %cst_32 : f32 to vector<20x16x16xf32>
    %44 = arith.mulf %42, %43 : vector<20x16x16xf32>
    %45 = arith.addf %41, %44 : vector<20x16x16xf32>
    %46 = vector.extract_strided_slice %14 {offsets = [0, 11, 0], sizes = [20, 16, 16], strides = [1, 1, 1]} : vector<20x32x16xf32> to vector<20x16x16xf32>
    %cst_33 = arith.constant 0.0360007733 : f32
    %47 = vector.broadcast %cst_33 : f32 to vector<20x16x16xf32>
    %48 = arith.mulf %46, %47 : vector<20x16x16xf32>
    %49 = arith.addf %45, %48 : vector<20x16x16xf32>
    %50 = vector.extract_strided_slice %14 {offsets = [0, 12, 0], sizes = [20, 16, 16], strides = [1, 1, 1]} : vector<20x32x16xf32> to vector<20x16x16xf32>
    %cst_34 = arith.constant 0.00759875821 : f32
    %51 = vector.broadcast %cst_34 : f32 to vector<20x16x16xf32>
    %52 = arith.mulf %50, %51 : vector<20x16x16xf32>
    %53 = arith.addf %49, %52 : vector<20x16x16xf32>
    %54 = vector.extract_strided_slice %14 {offsets = [0, 13, 0], sizes = [20, 16, 16], strides = [1, 1, 1]} : vector<20x32x16xf32> to vector<20x16x16xf32>
    %cst_35 = arith.constant 0.00102838012 : f32
    %55 = vector.broadcast %cst_35 : f32 to vector<20x16x16xf32>
    %56 = arith.mulf %54, %55 : vector<20x16x16xf32>
    %57 = arith.addf %53, %56 : vector<20x16x16xf32>
    %58 = vector.shape_cast %57 : vector<20x16x16xf32> to vector<320x16xf32>
    %c0_36 = arith.constant 0 : index
    %c0_37 = arith.constant 0 : index
    %59 = vector.load %arg1[%c0_36, %c0_37] : memref<16x16xf32, #tpu.memory_space<vmem>>, vector<16x16xf32>
    %cst_38 = arith.constant dense<0.000000e+00> : vector<320x16xf32>
    %60 = tpu.matmul %58, %59, %cst_38 {dimension_numbers = #tpu.dot_dimension_numbers<[1], [0], [0], [1], [0, 0, 1, 1], [], []>, precision = #tpu.contract_precision<fp32>} : vector<320x16xf32>, vector<16x16xf32>, vector<320x16xf32> -> vector<320x16xf32>
    %61 = vector.extract_strided_slice %60 {offsets = [0, 0], sizes = [64, 16], strides = [1, 1]} : vector<320x16xf32> to vector<64x16xf32>
    %62 = vector.extract_strided_slice %60 {offsets = [64, 0], sizes = [64, 16], strides = [1, 1]} : vector<320x16xf32> to vector<64x16xf32>
    %63 = vector.extract_strided_slice %60 {offsets = [128, 0], sizes = [64, 16], strides = [1, 1]} : vector<320x16xf32> to vector<64x16xf32>
    %64 = vector.extract_strided_slice %60 {offsets = [192, 0], sizes = [64, 16], strides = [1, 1]} : vector<320x16xf32> to vector<64x16xf32>
    %65 = vector.extract_strided_slice %60 {offsets = [256, 0], sizes = [64, 16], strides = [1, 1]} : vector<320x16xf32> to vector<64x16xf32>
    %66 = arith.mulf %61, %61 : vector<64x16xf32>
    %67 = arith.mulf %62, %62 : vector<64x16xf32>
    %68 = arith.mulf %61, %62 : vector<64x16xf32>
    %69 = arith.subf %63, %66 : vector<64x16xf32>
    %70 = arith.subf %64, %67 : vector<64x16xf32>
    %71 = arith.subf %65, %68 : vector<64x16xf32>
    %cst_39 = arith.constant 2.000000e+00 : f32
    %72 = vector.broadcast %cst_39 : f32 to vector<64x16xf32>
    %73 = arith.mulf %72, %68 : vector<64x16xf32>
    %cst_40 = arith.constant 9.99999974E-5 : f32
    %74 = vector.broadcast %cst_40 : f32 to vector<64x16xf32>
    %75 = arith.addf %73, %74 : vector<64x16xf32>
    %cst_41 = arith.constant 2.000000e+00 : f32
    %76 = vector.broadcast %cst_41 : f32 to vector<64x16xf32>
    %77 = arith.mulf %76, %71 : vector<64x16xf32>
    %cst_42 = arith.constant 8.99999984E-4 : f32
    %78 = vector.broadcast %cst_42 : f32 to vector<64x16xf32>
    %79 = arith.addf %77, %78 : vector<64x16xf32>
    %80 = arith.mulf %75, %79 : vector<64x16xf32>
    %81 = arith.addf %66, %67 : vector<64x16xf32>
    %cst_43 = arith.constant 9.99999974E-5 : f32
    %82 = vector.broadcast %cst_43 : f32 to vector<64x16xf32>
    %83 = arith.addf %81, %82 : vector<64x16xf32>
    %84 = arith.addf %69, %70 : vector<64x16xf32>
    %cst_44 = arith.constant 8.99999984E-4 : f32
    %85 = vector.broadcast %cst_44 : f32 to vector<64x16xf32>
    %86 = arith.addf %84, %85 : vector<64x16xf32>
    %87 = arith.mulf %83, %86 : vector<64x16xf32>
    %88 = tpu.reciprocal %87 {approx = true} : vector<64x16xf32> -> vector<64x16xf32>
    %89 = arith.mulf %87, %88 : vector<64x16xf32>
    %cst_45 = arith.constant 2.000000e+00 : f32
    %90 = vector.broadcast %cst_45 : f32 to vector<64x16xf32>
    %91 = arith.subf %90, %89 : vector<64x16xf32>
    %92 = arith.mulf %88, %91 : vector<64x16xf32>
    %93 = arith.mulf %80, %92 : vector<64x16xf32>
    %94 = vector.shape_cast %93 : vector<64x16xf32> to vector<4x16x16xf32>
    %c0_46 = arith.constant 0 : index
    %c0_47 = arith.constant 0 : index
    %c0_48 = arith.constant 0 : index
    %95 = vector.load %arg4[%c0_46, %c0_47, %c0_48] : memref<4x16x16xf32, #tpu.memory_space<vmem>>, vector<4x16x16xf32>
    tpu.vector_store %arg4[%c0_46, %c0_47, %c0_48], %94 {strides = array<i32>} : memref<4x16x16xf32, #tpu.memory_space<vmem>>, vector<4x16x16xf32>,
    return
  }
  func.func @transform_0(%arg0: i32) -> (i32, i32) {
    %c0_i32 = arith.constant 0 : i32
    %c0_i32_0 = arith.constant 0 : i32
    %c0_i32_1 = arith.constant 0 : i32
    return %c0_i32, %c0_i32_0 : i32, i32
  }
  func.func @transform_1(%arg0: i32) -> (i32, i32, i32) {
    %c0_i32 = arith.constant 0 : i32
    %c0_i32_0 = arith.constant 0 : i32
    %c0_i32_1 = arith.constant 0 : i32
    return %arg0, %c0_i32, %c0_i32_0 : i32, i32, i32
  }
  func.func @transform_2(%arg0: i32) -> (i32, i32, i32) {
    %c0_i32 = arith.constant 0 : i32
    %c0_i32_0 = arith.constant 0 : i32
    %c0_i32_1 = arith.constant 0 : i32
    return %arg0, %c0_i32, %c0_i32_0 : i32, i32, i32
  }
  func.func @transform_3(%arg0: i32) -> (i32, i32, i32) {
    %c0_i32 = arith.constant 0 : i32
    %c0_i32_0 = arith.constant 0 : i32
    %c0_i32_1 = arith.constant 0 : i32
    return %arg0, %c0_i32, %c0_i32_0 : i32, i32, i32
  }
}

</mosaic_0001>

<bundles_post_ra>
// kernel: tpu_custom_call.1
= control target key start
LH: loop header
LB: loop body
LE: loop exit
PB: predicated region body
PF: predicated region fallthrough
CT: control target
= control target key end

     0   :  { %8 = vsyncpa [#allocation4], 0  ;;  %s9746_s0 = inlined_call_operand.hbm [shape: f32[16,16], index: 0, kind: input, shape index: {}]   ;;  %s9747_s1 = inlined_call_operand.hbm [shape: f32[8,16,16], index: 1, kind: input, shape index: {}]   ;;  %s9748_s2 = inlined_call_operand.hbm [shape: f32[8,16,16], index: 2, kind: input, shape index: {}]   ;;  %s9749_s3 = inlined_call_operand.hbm [shape: f32[8,16,16], index: 3, kind: output, shape index: {}]  }
   0x1   :  { %9 = vsyncpa [#allocation7], 0 }
   0x2   :  { %11 = vsyncpa [#allocation7 + $0x1], 0 }
   0x3   :  { %12 = vsyncpa [#allocation5], 0 }
   0x4   :  { %14 = vsyncpa [#allocation5 + $0x1], 0  ;;  %s7053_s12 = smov 0   ;;  %s7055_s13 = smov 0  }
   0x5   :  { %s7057_s14 = smov 0   ;;  %s7059_s15 = smov 0  }
   0x6 LB: > { %s7074_s16 = sadd.s32 1, %s7022_s15   ;;  %s48_s17 = sadd.s32 1, %s7018_s14  ;;  %s7022_s15 = sphi %s7059_s15, %s9971_s15   ;;  %s7018_s14 = sphi %s7057_s14, %s9970_s14   ;;  %s7014_s13 = sphi %s7055_s13, %s9969_s13   ;;  %s7010_s12 = sphi %s7053_s12, %s9968_s12  }
   0x7   : > { %s45_s18 = ssub.s32 %s7022_s15, %s7074_s16  ;;  %p55_p0 = scmp.ne.s32.totalorder %s7018_s14, %s7014_s13 }
   0x8   : > { %p46_p1 = scmp.eq.s32.totalorder %s45_s18, 0  ;;  %p56_p2 = scmp.eq.s32.totalorder %s7022_s15, 0 }
   0x9   : > { %p6807_p5 = scmp.lt.s32.totalorder %s7022_s15, 2  ;;  %s150_s20 = sand.u32 1, %s7022_s15  }
   0xa   : > { %s7083_s19 = scalar_select %p46_p1, %s7018_s14, %s48_s17  }
   0xb   : > { %p57_p3 = por %p56_p2, %p55_p0  ;;  %s152_s21 = sand.u32 1, %s7018_s14  }
   0xc   : > { %s7092_s22 = sshll.u32 %s152_s21, 6  ;;  %s5916_s23 = sshll.u32 %s7022_s15, 10 }
   0xd   : > { %s7100_s26 = scalar_lea.hbm %s9747_s1, %s5916_s23  ;;  %s154_s27 = scalar_lea.vmem [#allocation6], %s7092_s22 }
   0xe   : > { %s162_s28 = sshll.u32 %s154_s27, 4  ;;  %p7103_p6 = pnand %p6807_p5, %p57_p3  ;;  %s7107_s28 = int_to_ptr.vmem [resolvable:$true] %s162_s28 }
   0xf   : > { %s7109_s30 = scalar_lea.sflag [#allocation7], %s150_s20  ;;  %s6864_s4 = scalar_lea.hbm %s7100_s26, 1024 }
  0x10   : > { %p6865_p7 = scmp.ne.s32.totalorder %s7100_s26, %s6864_s4  ;;  %p6866_p8 = pneg %p7103_p6 }
  0x11   : > { %s6869_s7 = scalar_lea.hbm %s9747_s1, 2048  ;;  %p6870_p11 = scmp.lt.u32.totalorder %s7100_s26, %s9747_s1 }
  0x12   : > { %p6867_p9 = pnand %p6866_p8, %p6865_p7  ;;  %p6871_p12 = scmp.lt.u32.totalorder %s6869_s7, %s6864_s4 }
  0x13   : > { %p6873_p1 = scmp.lt.u32.totalorder %s6864_s4, %s7100_s26 }
  0x14   : > { %p6868_p10 = pneg %p6867_p9  ;;  %p6872_p13 = por %p6871_p12, %p6870_p11 }
  0x16   : > { %p6874_p2 = por %p6873_p1, %p6872_p13 }
  0x18   : > { %p6875_p3 = pnand %p6874_p2, %p6868_p10 }
  0x1a   : > { %6878 = shalt.err (!%p6875_p3)
}
  0x1b   : > { %s6879_s10 = scalar_lea.vmem %s7107_s28, 1024  ;;  %s7024_s11 = smov [#allocation6]  }
  0x1c   : > { %p6880_p5 = scmp.ne.s32.totalorder %s7107_s28, %s6879_s10  ;;  %s6884_s17 = sshll.u32 %s7024_s11, 4  ;;  %s6885_s17 = int_to_ptr.vmem [resolvable:$false] %s6884_s17 }
  0x1d   : > { %s6886_s18 = scalar_lea.vmem %s6885_s17, 2048  ;;  %p6887_p4 = scmp.lt.s32.totalorder %s7107_s28, %s6885_s17 }
  0x1e   : > { %p6882_p7 = pnand %p6880_p5, %p6866_p8  ;;  %p6888_p11 = scmp.lt.s32.totalorder %s6886_s18, %s6879_s10 }
  0x20   : > { %p6883_p9 = pneg %p6882_p7  ;;  %p6889_p12 = por %p6888_p11, %p6887_p4 }
  0x22   : > { %p6890_p13 = pnand %p6889_p12, %p6883_p9 }
  0x24   : > { %6893 = shalt.err (!%p6890_p13)
}
  0x25   : > { %s7025_s20 = smov 128   ;;  %s7026_s21 = smov 8  }
  0x26   : > { %6798 = dma.hbm_to_vmem [thread:$0]  (!%p7103_p6), %s7100_s26, 1024, %s7107_s28, %s7109_s30, %s7025_s20, %s7025_s20, %s7026_s21  }
  0x27   : > { %s176_s24 = scalar_lea.vmem [#allocation8], %s7092_s22  ;;  %s7142_s27 = sadd.s32 4294967295, %s7022_s15  }
  0x28   : > { %s184_s25 = sshll.u32 %s176_s24, 4  ;;  %s5892_s4 = sadd.s32 4294967294, %s7022_s15   ;;  %s7175_s25 = int_to_ptr.vmem [resolvable:$true] %s184_s25 }
  0x29   : > { %p61_p4 = scmp.ne.s32.totalorder %s7014_s13, %s7010_s12  ;;  %p9750_p10 = scmp.eq.s32.totalorder %s7142_s27, 0 }
  0x2a   : > { %p111_p1 = scmp.eq.s32.totalorder %s7142_s27, 1  ;;  %p117_p2 = scmp.eq.s32.totalorder %s5892_s4, 1 }
  0x2b   : > { %p7151_p3 = por %p9750_p10, %p61_p4  ;;  %p5893_p5 = scmp.ge.s32.totalorder %s7022_s15, 1 }
  0x2c   : > { %p7159_p7 = por %p111_p1, %p55_p0  ;;  %p7163_p9 = por %p117_p2, %p61_p4 }
  0x2d   : > { %s9826_s5 = scalar_select %p7151_p3, 1, 0 }
  0x2e   : > { %s9827_s22 = scalar_select %p7159_p7, 1, 0 }
  0x2f   : > { %s9828_s26 = scalar_select %p7163_p9, 1, 0 }
  0x30   : > { %p124_p11 = scmp.lt.s32.totalorder %s7022_s15, 3  ;;  %s7173_s7 = scalar_lea.hbm %s9748_s2, %s5916_s23 }
  0x31   : > { %s7027_s9 = smov [#allocation3]   ;;  %s6894_s11 = scalar_lea.hbm %s7173_s7, 1024 }
  0x32   : > { %p7177_p0 = pnand %p5893_p5, %p124_p11  ;;  %s7181_s10 = sshll.u32 %s7027_s9, 4  ;;  %s137_s10 = int_to_ptr.vmem [resolvable:$true] %s7181_s10 }
  0x33   : > { %p6895_p13 = scmp.ne.s32.totalorder %s7173_s7, %s6894_s11  ;;  %s6899_s18 = scalar_lea.hbm %s9748_s2, 2048 }
  0x34   : > { %s9829_s8 = scalar_select %p7177_p0, 1, 0 }
  0x35   : > { %p6897_p4 = pnand %p6895_p13, %p6866_p8  ;;  %p6900_p2 = scmp.lt.u32.totalorder %s7173_s7, %s9748_s2 }
  0x36   : > { %p6901_p5 = scmp.lt.u32.totalorder %s6899_s18, %s6894_s11  ;;  %p6903_p10 = scmp.lt.u32.totalorder %s6894_s11, %s7173_s7 }
  0x37   : > { %p6898_p1 = pneg %p6897_p4 }
  0x38   : > { %p6902_p11 = por %p6901_p5, %p6900_p2 }
  0x3a   : > { %p6904_p9 = por %p6903_p10, %p6902_p11 }
  0x3c   : > { %p6905_p7 = pnand %p6904_p9, %p6898_p1 }
  0x3e   : > { %6908 = shalt.err (!%p6905_p7)
}
  0x3f   : > { %s6909_s28 = scalar_lea.vmem %s7175_s25, 1024  ;;  %s7028_s6 = smov [#allocation8]  }
  0x40   : > { %p6910_p13 = scmp.ne.s32.totalorder %s7175_s25, %s6909_s28  ;;  %s6914_s9 = sshll.u32 %s7028_s6, 4  ;;  %s6915_s9 = int_to_ptr.vmem [resolvable:$false] %s6914_s9 }
  0x41   : > { %s6916_s23 = scalar_lea.vmem %s6915_s9, 2048  ;;  %p6917_p3 = scmp.lt.s32.totalorder %s7175_s25, %s6915_s9 }
  0x42   : > { %p6912_p4 = pnand %p6910_p13, %p6866_p8  ;;  %p6918_p2 = scmp.lt.s32.totalorder %s6916_s23, %s6909_s28 }
  0x44   : > { %p6913_p12 = pneg %p6912_p4  ;;  %p6919_p5 = por %p6918_p2, %p6917_p3 }
  0x46   : > { %p6920_p10 = pnand %p6919_p5, %p6913_p12 }
  0x48   : > { %6923 = shalt.err (!%p6920_p10)
}
  0x49   : > { %6801 = dma.hbm_to_vmem [thread:$0]  (!%p7103_p6), %s7173_s7, 1024, %s7175_s25, %s7109_s30, %s7025_s20, %s7025_s20, %s7026_s21  }
  0x4a   : > { %p9830_p8 = scmp.eq.s32.totalorder %s7142_s27, 0  ;;  %p9831_p7 = pneg %p7177_p0 }
  0x4b   : > { %s6924_s18 = scalar_lea.hbm %s9746_s0, 256 }
  0x4c   : > { %p7218_p9 = pnand %p9831_p7, %p9830_p8  ;;  %p6925_p3 = scmp.ne.s32.totalorder %s9746_s0, %s6924_s18 }
  0x4d   : > { %p6931_p11 = scmp.lt.u32.totalorder %s6924_s18, %s9746_s0 }
  0x4e   : > { %p6926_p12 = pneg %p7218_p9 }
  0x50   : > { %p6927_p6 = pnand %p6926_p12, %p6925_p3 }
  0x52   : > { %p6928_p1 = pneg %p6927_p6 }
  0x54   : > { %p6933_p13 = pnand %p6931_p11, %p6928_p1 }
  0x56   : > { %6936 = shalt.err (!%p6933_p13)
}
  0x57   : > { %s6937_s7 = scalar_lea.vmem %s137_s10, 256  ;;  %p6945_p10 = scmp.lt.s32.totalorder %s137_s10, %s137_s10 }
  0x58   : > { %p6938_p4 = scmp.ne.s32.totalorder %s137_s10, %s6937_s7  ;;  %p6946_p8 = scmp.lt.s32.totalorder %s6937_s7, %s6937_s7 }
  0x5a   : > { %p6940_p2 = pnand %p6938_p4, %p6926_p12  ;;  %p6947_p7 = por %p6946_p8, %p6945_p10 }
  0x5c   : > { %p6941_p5 = pneg %p6940_p2 }
  0x5e   : > { %p6948_p0 = pnand %p6947_p7, %p6941_p5 }
  0x60   : > { %6951 = shalt.err (!%p6948_p0)
}
  0x61   : > { %6794 = dma.hbm_to_vmem [thread:$0]  (!%p7218_p9), %s9746_s0, 256, %s137_s10, [#allocation4], %s7025_s20, %s7025_s20, %s7026_s21  }
  0x62   : > { %p9833_p3 = scmp.ne.s32.totalorder %s9829_s8, 0 }
  0x64   : > { %196 = sbr.rel (%p9833_p3) target bundleno = 1116 (0x45c), region = 32 }
  0x6b   : > { %p9834_p12 = scmp.eq.s32.totalorder %s7142_s27, 0 }
  0x6d   : > { %6997 = dma.done.wait (%p9834_p12), [#allocation4], 256   ;;  %p9835_p6 = pmov %p9834_p12 }
  0x6e   : > { %s202_s9 = sand.u32 1, %s7142_s27   ;;  %s204_s23 = sand.u32 1, %s7014_s13  }
  0x6f   : > { %6999 = vsyncadd (%p9835_p6), [#allocation4], 4294967040  ;;  %s7251_s11 = sshll.u32 %s204_s23, 6  ;;  %s203_s20 = scalar_lea.sflag [#allocation7], %s202_s9 }
  0x70   : > { %s7254_s21 = scalar_lea.vmem [#allocation6], %s7251_s11  ;;  %p9836_p0 = scmp.ne.s32.totalorder %s9826_s5, 0 }
  0x72   : > { %7001 = dma.done.wait (%p9836_p0), %s203_s20, 2048  }
  0x73   : > { %7003 = vsyncadd (%p9836_p0), %s203_s20, 4294965248  ;;  %vm262_vm0 = vcmask 130048   ;;  %v7029_v0 = vmov 0.0   ;;  %v3378_v1 = vld [vmem:[#allocation3] sm:$0xff]  ;;  %v3379_v2 = vld [vmem:[#allocation3 + $0x8] sm:$0xff]  ;;  %s7303_s5 = scalar_lea.vmem [#allocation8], %s7251_s11 }
  0x74   : > { %263 = vst.msk [vmem:[#allocation2] sm:$0xff] %vm262_vm0, %v7029_v0  ;;  %283 = vst.msk [vmem:[#allocation2 + $0x18] sm:$0xff] %vm262_vm0, %v7029_v0  ;;  %v246_v3 = vld [vmem:[%s7254_s21] sm:$0xff]  ;;  %v3461_v4 = vand.u32 4294901760, %v3378_v1  ;;  %v3464_v5 = vand.u32 4294901760, %v3379_v2  ;;  %v247_v6 = vld [vmem:[%s7254_s21 + $0x8] sm:$0xff] }
  0x75   : > { %264 = vst.msk [vmem:[#allocation2 + $0x20] sm:$0xff] %vm262_vm0, %v7029_v0  ;;  %265 = vst.msk [vmem:[#allocation2 + $0x40] sm:$0xff] %vm262_vm0, %v7029_v0  ;;  %v7306_v7 = vld [vmem:[%s7303_s5] sm:$0xff]  ;;  %v7309_v8 = vld [vmem:[%s7303_s5 + $0x8] sm:$0xff]  ;;  %v320_v9 = vmul.f32 %v246_v3, %v246_v3  ;;  %v321_v10 = vmul.f32 %v247_v6, %v247_v6  ;;  %vm631_vm1 = vcmask 1046528   ;;  %vm972_vm2 = vcmask 1045504  }
  0x76   : > { %266 = vst.msk [vmem:[#allocation2 + $0x60] sm:$0xff] %vm262_vm0, %v7029_v0  ;;  %267 = vst.msk [vmem:[#allocation2 + $0x80] sm:$0xff] %vm262_vm0, %v7029_v0  ;;  %v354_v11 = vmul.f32 %v7306_v7, %v246_v3  ;;  %v355_v12 = vmul.f32 %v7309_v8, %v247_v6  ;;  %v7320_v15 = vld [vmem:[%s7254_s21 + $0x10] sm:$0xff]  ;;  %v7322_v16 = vpack.c.bf16 %v3464_v5, %v3461_v4  ;;  %vm1313_vm3 = vcmask 1044480   ;;  %v7356_v31 = vld [vmem:[%s7254_s21 + $0x18] sm:$0xff]  ;;  %s9664_s8 = scalar_lea.vmem [#allocation9], %s7251_s11 }
  0x77   : > { %268 = vst.msk [vmem:[#allocation2 + $0xa0] sm:$0xff] %vm262_vm0, %v7029_v0  ;;  %269 = vst.msk [vmem:[#allocation2 + $0xc0] sm:$0xff] %vm262_vm0, %v7029_v0  ;;  %v7340_v23 = vsub.f32 %v3378_v1, %v3461_v4  ;;  %vm1654_vm4 = vcmask 1043456   ;;  %v7373_v41 = vld [vmem:[%s7254_s21 + $0x20] sm:$0xff]  ;;  %v7377_v45 = vsub.f32 %v3379_v2, %v3464_v5  ;;  %v7380_v46 = vld [vmem:[%s7254_s21 + $0x28] sm:$0xff]  ;;  %vm1955_vm5 = vcmask 1042432  }
  0x78   : > { %270 = vst.msk [vmem:[#allocation2 + $0xe0] sm:$0xff] %vm262_vm0, %v7029_v0  ;;  %271 = vst.msk [vmem:[#allocation2 + $0x100] sm:$0xff] %vm262_vm0, %v7029_v0  ;;  %6570 = vmatprep.subr.bf16.mxu0 %v7322_v16  ;;  %6558 = vmatprep.subr.bf16.mxu1 %v7322_v16  ;;  %vm2176_vm6 = vcmask 1041408   ;;  %vm2437_vm7 = vcmask 1040384   ;;  %s5920_s10 = sshll.u32 %s7142_s27, 10  ;;  %s5787_s17 = sshll.u32 %s9664_s8, 4  ;;  %s9696_s17 = int_to_ptr.vmem [resolvable:$true] %s5787_s17 }
  0x79   : > { %272 = vst.msk [vmem:[#allocation2 + $0x120] sm:$0xff] %vm262_vm0, %v7029_v0  ;;  %273 = vst.msk [vmem:[#allocation2 + $0x140] sm:$0xff] %vm262_vm0, %v7029_v0  ;;  %6572 = vmatpush3.bf16.msra.mxu0 %v7322_v16  ;;  %6560 = vmatpush3.bf16.msra.mxu1 %v7322_v16  ;;  %v3930_v35 = vand.u32 4294901760, %v7340_v23  ;;  %s9694_s24 = scalar_lea.hbm %s9749_s3, %s5920_s10  ;;  %s9704_s27 = scalar_lea.sflag [#allocation5], %s204_s23 }
  0x7a   : > { %274 = vst.msk [vmem:[#allocation2 + $0x160] sm:$0xff] %vm262_vm0, %v7029_v0  ;;  %275 = vst.msk [vmem:[#allocation2 + $0x180] sm:$0xff] %vm262_vm0, %v7029_v0  ;;  %s6952_s4 = scalar_lea.vmem %s9696_s17, 1024  ;;  %p9965_p1 = scmp.ne.s32.totalorder %s9827_s22, 0 }
  0x7b   : > { %276 = vst.msk [vmem:[#allocation2 + $0x1a0] sm:$0xff] %vm262_vm0, %v7029_v0  ;;  %277 = vst.msk [vmem:[#allocation2 + $0x1c0] sm:$0xff] %vm262_vm0, %v7029_v0  ;;  %v371_v13 = vld [vmem:[#allocation2] sm:$0xff]  ;;  %v374_v14 = vld [vmem:[#allocation2 + $0x18] sm:$0xff]  ;;  %v7391_v50 = vsub.f32 %v7340_v23, %v3930_v35  ;;  %p6953_p9 = scmp.ne.s32.totalorder %s9696_s17, %s6952_s4  ;;  %s7030_s30 = smov [#allocation9]  }
  0x7c   : > { %278 = vst.msk [vmem:[#allocation2 + $0x1e0] sm:$0xff] %vm262_vm0, %v7029_v0  ;;  %279 = vst.msk [vmem:[#allocation2 + $0x200] sm:$0xff] %vm262_vm0, %v7029_v0  ;;  %v7324_v17 = vmul.f32 0.0010283801, %v371_v13  ;;  %v511_v18 = vmul.f32 0.007598758, %v371_v13 }
  0x7d   : > { %280 = vst.msk [vmem:[#allocation2 + $0x220] sm:$0xff] %vm262_vm0, %v7029_v0  ;;  %281 = vst.msk [vmem:[#allocation2 + $0x240] sm:$0xff] %vm262_vm0, %v7029_v0  ;;  %v7326_v19 = vmul.f32 0.036000773, %v371_v13  ;;  %v7331_v20 = vmul.f32 0.10936069, %v371_v13  ;;  %p6954_p11 = pnand %p6953_p9, %p9965_p1 }
  0x7e   : > { %282 = vst.msk [vmem:[#allocation2 + $0x260] sm:$0xff] %vm262_vm0, %v7029_v0  ;;  %284 = vst.msk [vmem:[#allocation2 + $0x38] sm:$0xff] %vm262_vm0, %v7029_v0  ;;  %v7333_v21 = vmul.f32 0.21300554, %v371_v13  ;;  %v7335_v22 = vmul.f32 0.007598758, %v374_v14 }
  0x7f   : > { %285 = vst.msk [vmem:[#allocation2 + $0x58] sm:$0xff] %vm262_vm0, %v7029_v0  ;;  %286 = vst.msk [vmem:[#allocation2 + $0x78] sm:$0xff] %vm262_vm0, %v7029_v0  ;;  %v632_v24 = vrot.slane %v511_v18, 1  ;;  %v7344_v25 = vmul.f32 0.0010283801, %v374_v14  ;;  %v973_v27 = vrot.slane %v7326_v19, 2  ;;  %p6955_p13 = pneg %p6954_p11 }
  0x80   : > { %287 = vst.msk [vmem:[#allocation2 + $0x98] sm:$0xff] %vm262_vm0, %v7029_v0  ;;  %288 = vst.msk [vmem:[#allocation2 + $0xb8] sm:$0xff] %vm262_vm0, %v7029_v0  ;;  %v7346_v26 = vmul.f32 0.21300554, %v374_v14  ;;  %v1314_v28 = vrot.slane %v7331_v20, 3  ;;  %v1655_v29 = vrot.slane %v7333_v21, 4 }
  0x81   : > { %289 = vst.msk [vmem:[#allocation2 + $0xd8] sm:$0xff] %vm262_vm0, %v7029_v0  ;;  %290 = vst.msk [vmem:[#allocation2 + $0xf8] sm:$0xff] %vm262_vm0, %v7029_v0  ;;  %v7353_v30 = vmul.f32 0.10936069, %v374_v14  ;;  %v2778_v32 = vrot.slane %v7335_v22, 1  ;;  %v3001_v33 = vrot.slane %v7344_v25, 2 }
  0x82   : > { %291 = vst.msk [vmem:[#allocation2 + $0x118] sm:$0xff] %vm262_vm0, %v7029_v0  ;;  %292 = vst.msk [vmem:[#allocation2 + $0x138] sm:$0xff] %vm262_vm0, %v7029_v0  ;;  %v7360_v34 = vmul.f32 0.036000773, %v374_v14  ;;  %v7365_v36 = vld [vmem:[#allocation2 + $0x20] sm:$0xff]  ;;  %v2180_v38 = vrot.slane %v7346_v26, 6 }
  0x83   : > { %293 = vst.msk [vmem:[#allocation2 + $0x158] sm:$0xff] %vm262_vm0, %v7029_v0  ;;  %294 = vst.msk [vmem:[#allocation2 + $0x178] sm:$0xff] %vm262_vm0, %v7029_v0  ;;  %v2441_v39 = vrot.slane %v7353_v30, 7  ;;  %v7370_v40 = vmul.f32 0.0010283801, %v7365_v36  ;;  %v7440_v21 = vld [vmem:[%s7303_s5 + $0x20] sm:$0xff] }
  0x84   : > { %295 = vst.msk [vmem:[#allocation2 + $0x198] sm:$0xff] %vm262_vm0, %v7029_v0  ;;  %296 = vst.msk [vmem:[#allocation2 + $0x1b8] sm:$0xff] %vm262_vm0, %v7029_v0  ;;  %v3937_v30 = vand.u32 4294901760, %v7377_v45  ;;  %v1196_v25 = vmul.f32 0.10936069, %v7365_v36  ;;  %s6956_s25 = sshll.u32 %s7030_s30, 4  ;;  %s6957_s25 = int_to_ptr.vmem [resolvable:$false] %s6956_s25 }
  0x85   : > { %297 = vst.msk [vmem:[#allocation2 + $0x1d8] sm:$0xff] %vm262_vm0, %v7029_v0  ;;  %298 = vst.msk [vmem:[#allocation2 + $0x1f8] sm:$0xff] %vm262_vm0, %v7029_v0  ;;  %s6958_s7 = scalar_lea.vmem %s6957_s25, 2048  ;;  %p6959_p4 = scmp.lt.s32.totalorder %s9696_s17, %s6957_s25 }
  0x86   : > { %299 = vst.msk [vmem:[#allocation2 + $0x218] sm:$0xff] %vm262_vm0, %v7029_v0  ;;  %300 = vst.msk [vmem:[#allocation2 + $0x238] sm:$0xff] %vm262_vm0, %v7029_v0  ;;  %p6960_p2 = scmp.lt.s32.totalorder %s6958_s7, %s6952_s4 }
  0x87   : > { %301 = vst.msk [vmem:[#allocation2 + $0x258] sm:$0xff] %vm262_vm0, %v7029_v0  ;;  %302 = vst.msk [vmem:[#allocation2 + $0x278] sm:$0xff] %vm262_vm0, %v7029_v0 }
  0x88   : > { %303 = vst.msk [vmem:[#allocation2 + $0x8] sm:$0xff] %vm262_vm0, %v246_v3  ;;  %304 = vst.msk [vmem:[#allocation2 + $0x10] sm:$0xff] %vm262_vm0, %v247_v6  ;;  %v7411_v3 = vld [vmem:[%s7254_s21 + $0x30] sm:$0xff]  ;;  %p6961_p5 = por %p6960_p2, %p6959_p4 }
  0x89   : > { %312 = vst.msk [vmem:[#allocation2 + $0x88] sm:$0xff] %vm262_vm0, %v7306_v7  ;;  %313 = vst.msk [vmem:[#allocation2 + $0x90] sm:$0xff] %vm262_vm0, %v7309_v8 }
  0x8a   : > { %329 = vst.msk [vmem:[#allocation2 + $0x108] sm:$0xff] %vm262_vm0, %v320_v9  ;;  %305 = vst.msk [vmem:[#allocation2 + $0x28] sm:$0xff] %vm262_vm0, %v7320_v15  ;;  %p6962_p10 = pnand %p6961_p5, %p6955_p13 }
  0x8b   : > { %330 = vst.msk [vmem:[#allocation2 + $0x110] sm:$0xff] %vm262_vm0, %v321_v10  ;;  %363 = vst.msk [vmem:[#allocation2 + $0x208] sm:$0xff] %vm262_vm0, %v354_v11  ;;  %v7418_v10 = vld [vmem:[%s7254_s21 + $0x38] sm:$0xff] }
  0x8c   : > { %364 = vst.msk [vmem:[#allocation2 + $0x210] sm:$0xff] %vm262_vm0, %v355_v12  ;;  %306 = vst.msk [vmem:[#allocation2 + $0x30] sm:$0xff] %vm262_vm0, %v7356_v31 }
  0x8d   : > { %307 = vst.msk [vmem:[#allocation2 + $0x48] sm:$0xff] %vm262_vm0, %v7373_v41  ;;  %308 = vst.msk [vmem:[#allocation2 + $0x50] sm:$0xff] %vm262_vm0, %v7380_v46 }
  0x8e   : > { %309 = vst.msk [vmem:[#allocation2 + $0x68] sm:$0xff] %vm262_vm0, %v7411_v3  ;;  %310 = vst.msk [vmem:[#allocation2 + $0x70] sm:$0xff] %vm262_vm0, %v7418_v10 }
  0x8f   : > { %v372_v37 = vld [vmem:[#allocation2 + $0x8] sm:$0xff]  ;;  %v373_v42 = vld [vmem:[#allocation2 + $0x10] sm:$0xff]  ;;  %316 = vst.msk [vmem:[#allocation2 + $0xc8] sm:$0xff] %vm262_vm0, %v7440_v21 }
  0x90   : > { %v7375_v43 = vmul.f32 0.0010283801, %v372_v37  ;;  %v512_v44 = vmul.f32 0.007598758, %v372_v37  ;;  %v7384_v47 = vmul.f32 0.0010283801, %v373_v42 }
  0x91   : > { %v513_v48 = vmul.f32 0.007598758, %v373_v42  ;;  %v7386_v49 = vmul.f32 0.036000773, %v372_v37  ;;  %v7395_v52 = vmul.f32 0.036000773, %v373_v42 }
  0x92   : > { %v633_v51 = vrot.slane %v512_v44, 1  ;;  %v7397_v53 = vmul.f32 0.10936069, %v372_v37  ;;  %v2998_v54 = vrot.slane %v7375_v43, 2  ;;  %v1195_v57 = vmul.f32 0.10936069, %v373_v42 }
  0x93   : > { %v635_v55 = vrot.slane %v513_v48, 1  ;;  %v974_v56 = vrot.slane %v7386_v49, 2  ;;  %v1535_v58 = vmul.f32 0.21300554, %v372_v37  ;;  %v976_v60 = vrot.slane %v7395_v52, 2  ;;  %v7430_v48 = vld [vmem:[%s7303_s5 + $0x10] sm:$0xff] }
  0x94   : > { %v634_v59 = vsel %vm631_vm1, %v632_v24, %v633_v51  ;;  %v1315_v61 = vrot.slane %v7397_v53, 3  ;;  %v1536_v62 = vmul.f32 0.21300554, %v373_v42  ;;  %v1317_v9 = vrot.slane %v1195_v57, 3  ;;  %314 = vst.msk [vmem:[#allocation2 + $0xa8] sm:$0xff] %vm262_vm0, %v7430_v48 }
  0x95   : > { %v7405_v63 = vsel %vm631_vm1, %v633_v51, %v635_v55  ;;  %v792_v0 = vadd.f32 %v634_v59, %v7324_v17  ;;  %v794_v1 = vadd.f32 %v635_v55, %v7384_v47  ;;  %v975_v2 = vsel %vm972_vm2, %v973_v27, %v974_v56  ;;  %v7433_v51 = vld [vmem:[%s7303_s5 + $0x18] sm:$0xff] }
  0x96   : > { %v793_v4 = vadd.f32 %v7405_v63, %v7375_v43  ;;  %v977_v5 = vsel %vm972_vm2, %v974_v56, %v976_v60  ;;  %v1316_v6 = vsel %vm1313_vm3, %v1314_v28, %v1315_v61  ;;  %v1656_v13 = vrot.slane %v1535_v58, 4  ;;  %315 = vst.msk [vmem:[#allocation2 + $0xb0] sm:$0xff] %vm262_vm0, %v7433_v51 }
  0x97   : > { %v1133_v11 = vadd.f32 %v975_v2, %v792_v0  ;;  %v1135_v12 = vadd.f32 %v976_v60, %v794_v1  ;;  %v1658_v14 = vrot.slane %v1536_v62, 4  ;;  %v1318_v18 = vsel %vm1313_vm3, %v1315_v61, %v1317_v9  ;;  %v7444_v1 = vld [vmem:[%s7303_s5 + $0x28] sm:$0xff] }
  0x98   : > { %v1134_v17 = vadd.f32 %v977_v5, %v793_v4  ;;  %v1875_v19 = vmul.f32 0.26601171, %v372_v37  ;;  %v1876_v20 = vmul.f32 0.26601171, %v373_v42  ;;  %v1657_v28 = vsel %vm1654_vm4, %v1655_v29, %v1656_v13  ;;  %317 = vst.msk [vmem:[#allocation2 + $0xd0] sm:$0xff] %vm262_vm0, %v7444_v1 }
  0x99   : > { %v1474_v24 = vadd.f32 %v1316_v6, %v1133_v11  ;;  %v1476_v27 = vadd.f32 %v1317_v9, %v1135_v12  ;;  %v1659_v44 = vsel %vm1654_vm4, %v1656_v13, %v1658_v14  ;;  %v2177_v0 = vrot.slane %v1535_v58, 6 }
  0x9a   : > { %v1475_v56 = vadd.f32 %v1318_v18, %v1134_v17  ;;  %v1956_v59 = vrot.slane %v1875_v19, 5  ;;  %v1957_v60 = vrot.slane %v1876_v20, 5  ;;  %v2178_v42 = vrot.slane %v1536_v62, 6  ;;  %v7469_v18 = vld [vmem:[#allocation2 + $0x28] sm:$0xff]  ;;  %v7471_v19 = vld [vmem:[#allocation2 + $0x30] sm:$0xff] }
  0x9b   : > { %v1815_v37 = vadd.f32 %v1657_v28, %v1474_v24  ;;  %v1817_v29 = vadd.f32 %v1658_v14, %v1476_v27  ;;  %v2438_v61 = vrot.slane %v7397_v53, 7  ;;  %v2439_v4 = vrot.slane %v1195_v57, 7 }
  0x9c   : > { %v1816_v2 = vadd.f32 %v1659_v44, %v1475_v56  ;;  %v1958_v58 = vsel %vm1955_vm5, %v1956_v59, %v1957_v60  ;;  %v2779_v5 = vsel %vm631_vm1, %v635_v55, %v2778_v32  ;;  %v2179_v62 = vsel %vm2176_vm6, %v2177_v0, %v2178_v42 }
  0x9d   : > { %v2076_v6 = vadd.f32 %v1956_v59, %v1815_v37  ;;  %v2999_v53 = vrot.slane %v7384_v47, 2  ;;  %v2078_v9 = vadd.f32 %v1957_v60, %v1817_v29  ;;  %v2440_v12 = vsel %vm2437_vm7, %v2438_v61, %v2439_v4 }
  0x9e   : > { %v2077_v11 = vadd.f32 %v1958_v58, %v1816_v2  ;;  %v2181_v57 = vsel %vm2176_vm6, %v2178_v42, %v2180_v38  ;;  %v2442_v55 = vsel %vm2437_vm7, %v2439_v4, %v2441_v39  ;;  %v3932_v38 = vand.u32 4294901760, %v7391_v50 }
  0x9f   : > { %v2337_v13 = vadd.f32 %v2177_v0, %v2076_v6  ;;  %v3000_v14 = vsel %vm972_vm2, %v2998_v54, %v2999_v53  ;;  %v3002_v47 = vsel %vm972_vm2, %v2999_v53, %v3001_v33  ;;  %v2339_v17 = vadd.f32 %v2181_v57, %v2078_v9 }
  0xa0   : > { %v2338_v26 = vadd.f32 %v2179_v62, %v2077_v11  ;;  %v7476_v39 = vmul.f32 0.0010283801, %v7469_v18  ;;  %v7479_v54 = vmul.f32 0.0010283801, %v7471_v19  ;;  %v514_v24 = vmul.f32 0.007598758, %v7365_v36 }
  0xa1   : > { %v2598_v43 = vadd.f32 %v2438_v61, %v2337_v13  ;;  %v2600_v20 = vadd.f32 %v2442_v55, %v2339_v17  ;;  %v3938_v28 = vsub.f32 %v7377_v45, %v3937_v30  ;;  %v515_v44 = vmul.f32 0.007598758, %v7469_v18 }
  0xa2   : > { %v2599_v27 = vadd.f32 %v2440_v12, %v2338_v26  ;;  %v516_v50 = vmul.f32 0.007598758, %v7471_v19  ;;  %v637_v60 = vrot.slane %v514_v24, 1  ;;  %v855_v0 = vmul.f32 0.036000773, %v7365_v36 }
  0xa3   : > { %v2678_v56 = vadd.f32 %v2598_v43, %v7386_v49  ;;  %v2680_v59 = vadd.f32 %v7360_v34, %v2600_v20  ;;  %v3939_v29 = vand.u32 4294901760, %v3938_v28  ;;  %v638_v42 = vrot.slane %v515_v44, 1 }
  0xa4   : > { %v2679_v37 = vadd.f32 %v2599_v27, %v7395_v52  ;;  %v7491_v61 = vrot.slane %v516_v50, 1  ;;  %v7497_v4 = vmul.f32 0.036000773, %v7469_v18  ;;  %v7500_v49 = vmul.f32 0.036000773, %v7471_v19 }
  0xa5   : > { %v2858_v2 = vadd.f32 %v2678_v56, %v7405_v63  ;;  %v2860_v58 = vadd.f32 %v2778_v32, %v2680_v59  ;;  %v7502_v6 = vpack.c.bf16 %v3939_v29, %v3932_v38  ;;  %v639_v52 = vsel %vm631_vm1, %v637_v60, %v638_v42 }
  0xa6   : > { %v2859_v34 = vadd.f32 %v2779_v5, %v2679_v37  ;;  %v7507_v62 = vsel %vm631_vm1, %v638_v42, %v7491_v61  ;;  %v795_v32 = vadd.f32 %v639_v52, %v7370_v40  ;;  %v797_v5 = vadd.f32 %v7491_v61, %v7479_v54 }
  0xa7   : > { %v3158_v53 = vadd.f32 %v3000_v14, %v2858_v2  ;;  %v3160_v22 = vadd.f32 %v3001_v33, %v2860_v58  ;;  %v796_v63 = vadd.f32 %v7507_v62, %v7476_v39  ;;  %6562 = vmatprep.subr.bf16.mxu1 %v7502_v6  ;;  %v978_v11 = vrot.slane %v855_v0, 2 }
  0xa8   : > { %v3159_v9 = vadd.f32 %v3002_v47, %v2859_v34  ;;  %v979_v12 = vrot.slane %v7497_v4, 2  ;;  %v981_v13 = vrot.slane %v7500_v49, 2  ;;  %v7522_v14 = vmul.f32 0.10936069, %v7469_v18 }
  0xa9   : > { %v3278_v57 = vrot.slane %v3158_v53, 3  ;;  %v3281_v55 = vrot.slane %v3160_v22, 3  ;;  %v7525_v47 = vmul.f32 0.10936069, %v7471_v19  ;;  %v1319_v43 = vrot.slane %v1196_v25, 3  ;;  %v7561_v25 = vld [vmem:[%s7303_s5 + $0x38] sm:$0xff] }
  0xaa   : > { %v3279_v33 = vrot.slane %v3159_v9, 3  ;;  %v980_v40 = vsel %vm972_vm2, %v978_v11, %v979_v12  ;;  %v982_v17 = vsel %vm972_vm2, %v979_v12, %v981_v13  ;;  %v1138_v38 = vadd.f32 %v981_v13, %v797_v5  ;;  %v7558_v13 = vld [vmem:[%s7303_s5 + $0x30] sm:$0xff]  ;;  %319 = vst.msk [vmem:[#allocation2 + $0xf0] sm:$0xff] %vm262_vm0, %v7561_v25 }
  0xab   : > { %v1136_v26 = vadd.f32 %v980_v40, %v795_v32  ;;  %v1137_v27 = vadd.f32 %v982_v17, %v796_v63  ;;  %v1320_v28 = vrot.slane %v7522_v14, 3  ;;  %v1322_v56 = vrot.slane %v7525_v47, 3  ;;  %318 = vst.msk [vmem:[#allocation2 + $0xe8] sm:$0xff] %vm262_vm0, %v7558_v13 }
  0xac   : > { %v3280_v20 = vsel %vm1313_vm3, %v3278_v57, %v3279_v33  ;;  %v3282_v24 = vsel %vm1313_vm3, %v3279_v33, %v3281_v55  ;;  %v1537_v59 = vmul.f32 0.21300554, %v7365_v36  ;;  %v1538_v29 = vmul.f32 0.21300554, %v7469_v18 }
  0xad   : > { %v3380_v44 = vsel %vm262_vm0, %v3280_v20, 0  ;;  %v3382_v50 = vsel %vm262_vm0, %v3282_v24, 0  ;;  %v1321_v37 = vsel %vm1313_vm3, %v1319_v43, %v1320_v28  ;;  %v1323_v42 = vsel %vm1313_vm3, %v1320_v28, %v1322_v56 }
  0xae   : > { %v7535_v60 = vand.u32 4294901760, %v3380_v44  ;;  %v7537_v0 = vand.u32 4294901760, %v3382_v50  ;;  %v1477_v2 = vadd.f32 %v1321_v37, %v1136_v26  ;;  %v1479_v58 = vadd.f32 %v1322_v56, %v1138_v38 }
  0xaf   : > { %v7543_v34 = vmul.f32 0.21300554, %v7471_v19  ;;  %v1478_v53 = vadd.f32 %v1323_v42, %v1137_v27  ;;  %v1660_v22 = vrot.slane %v1537_v59, 4  ;;  %v1661_v32 = vrot.slane %v1538_v29, 4 }
  0xb0   : > { %v7546_v52 = vsub.f32 %v3380_v44, %v7535_v60  ;;  %v7549_v36 = vsub.f32 %v3382_v50, %v7537_v0  ;;  %v1877_v9 = vmul.f32 0.26601171, %v7469_v18  ;;  %v1878_v5 = vmul.f32 0.26601171, %v7471_v19  ;;  %v378_v19 = vld [vmem:[#allocation2 + $0x38] sm:$0xff] }
  0xb1   : > { %v1663_v63 = vrot.slane %v7543_v34, 4  ;;  %v2182_v57 = vrot.slane %v1538_v29, 6  ;;  %v2183_v55 = vrot.slane %v7543_v34, 6  ;;  %v1662_v33 = vsel %vm1654_vm4, %v1660_v22, %v1661_v32 }
  0xb2   : > { %9837 = vst [vmem:[#allocation13_spill] sm:$0xff] %v7546_v52  ;;  %9838 = vst [vmem:[#allocation14_spill] sm:$0xff] %v7549_v36  ;;  %v3529_v11 = vand.u32 4294901760, %v7546_v52  ;;  %v3539_v12 = vand.u32 4294901760, %v7549_v36  ;;  %v1959_v17 = vrot.slane %v1877_v9, 5  ;;  %v1960_v26 = vrot.slane %v1878_v5, 5 }
  0xb3   : > { %v1664_v40 = vsel %vm1654_vm4, %v1661_v32, %v1663_v63  ;;  %v1818_v38 = vadd.f32 %v1662_v33, %v1477_v2  ;;  %v2184_v20 = vsel %vm2176_vm6, %v2182_v57, %v2183_v55  ;;  %v2443_v27 = vrot.slane %v7522_v14, 7 }
  0xb4   : > { %6369 = vmatprep.mubr.f32.mxu0 %v3529_v11  ;;  %v3530_v18 = vsub.f32 %v7546_v52, %v3529_v11  ;;  %v1819_v43 = vadd.f32 %v1664_v40, %v1478_v53  ;;  %v1961_v24 = vsel %vm1955_vm5, %v1959_v17, %v1960_v26  ;;  %v2444_v28 = vrot.slane %v7525_v47, 7 }
  0xb5   : > { %6370 = vmatmul.mubr.f32.vlgmr.msra.gmra.mrb[0].mxu0 %v3539_v12  ;;  %v7576_v44 = vmul.f32 0.007598758, %v378_v19  ;;  %v2079_v56 = vadd.f32 %v1959_v17, %v1818_v38  ;;  %v7578_v37 = vmul.f32 0.0010283801, %v378_v19  ;;  %v3003_v2 = vrot.slane %v7476_v39, 2 }
  0xb6   : > { %v3531_v50 = vand.u32 4294901760, %v3530_v18  ;;  %v2080_v59 = vadd.f32 %v1961_v24, %v1819_v43  ;;  %v2445_v29 = vsel %vm2437_vm7, %v2443_v27, %v2444_v28  ;;  %v3004_v53 = vrot.slane %v7479_v54, 2 }
  0xb7   : > { %v2780_v42 = vrot.slane %v7576_v44, 1  ;;  %v2340_v22 = vadd.f32 %v2182_v57, %v2079_v56  ;;  %v6573_v47 = vpack.c.bf16 %v3937_v30, %v3930_v35  ;;  %v3006_v9 = vrot.slane %v7578_v37, 2  ;;  %v379_v30 = vld [vmem:[#allocation2 + $0x40] sm:$0xff] }
  0xb8   : > { %6177 = vmatprep.mubr.f32.mxu1 %v3531_v50  ;;  %v2341_v14 = vadd.f32 %v2184_v20, %v2080_v59  ;;  %v3540_v5 = vsub.f32 %v7549_v36, %v3539_v12  ;;  %v1820_v39 = vadd.f32 %v1663_v63, %v1479_v58  ;;  %v3005_v57 = vsel %vm972_vm2, %v3003_v2, %v3004_v53  ;;  %v380_v20 = vld [vmem:[#allocation2 + $0x48] sm:$0xff]  ;;  %v7597_v12 = vld [vmem:[#allocation2 + $0x50] sm:$0xff] }
  0xb9   : > { %v2781_v32 = vsel %vm631_vm1, %v7491_v61, %v2780_v42  ;;  %v2601_v11 = vadd.f32 %v2443_v27, %v2340_v22  ;;  %6574 = vmatprep.subr.bf16.mxu0 %v6573_v47  ;;  %v2137_v33 = vmul.f32 0.21300554, %v378_v19  ;;  %v2398_v18 = vmul.f32 0.10936069, %v378_v19 }
  0xba   : > { %v2602_v54 = vadd.f32 %v2445_v29, %v2341_v14  ;;  %v3541_v40 = vand.u32 4294901760, %v3540_v5  ;;  %v2081_v17 = vadd.f32 %v1960_v26, %v1820_v39  ;;  %v2659_v35 = vmul.f32 0.036000773, %v378_v19  ;;  %6576 = vmatpush3.bf16.msra.mxu0 %v6573_v47 }
  0xbb   : > { %v2681_v38 = vadd.f32 %v2601_v11, %v7497_v4  ;;  %v2185_v43 = vrot.slane %v2137_v33, 6  ;;  %v457_v58 = vmul.f32 0.0010283801, %v379_v30  ;;  %6578 = vmatprep.subr.bf16.mxu0 %v7322_v16  ;;  %v3007_v63 = vsel %vm972_vm2, %v3004_v53, %v3006_v9 }
  0xbc   : > { %v2682_v61 = vadd.f32 %v2602_v54, %v7500_v49  ;;  %6178 = vmatmul.mubr.f32.vlgmr.msra.gmra.mrb[0].mxu1 %v3541_v40  ;;  %v2446_v26 = vrot.slane %v2398_v18, 7  ;;  %v7603_v19 = vmul.f32 0.0010283801, %v380_v20  ;;  %v7606_v24 = vmul.f32 0.0010283801, %v7597_v12 }
  0xbd   : > { %v2861_v4 = vadd.f32 %v2681_v38, %v7507_v62  ;;  %6564 = vmatpush3.bf16.msra.mxu1 %v7502_v6  ;;  %v2186_v27 = vsel %vm2176_vm6, %v2183_v55, %v2185_v43  ;;  %v517_v50 = vmul.f32 0.007598758, %v379_v30  ;;  %v518_v29 = vmul.f32 0.007598758, %v380_v20 }
  0xbe   : > { %v2862_v49 = vadd.f32 %v2781_v32, %v2682_v61  ;;  %v2342_v56 = vadd.f32 %v2186_v27, %v2081_v17  ;;  %v2447_v59 = vsel %vm2437_vm7, %v2444_v28, %v2446_v26  ;;  %v519_v2 = vmul.f32 0.007598758, %v7597_v12 }
  0xbf   : > { %v3161_v53 = vadd.f32 %v3005_v57, %v2861_v4  ;;  %v642_v14 = vrot.slane %v517_v50, 1  ;;  %v858_v47 = vmul.f32 0.036000773, %v379_v30  ;;  %v643_v62 = vrot.slane %v518_v29, 1 }
  0xc0   : > { %v3162_v22 = vadd.f32 %v3007_v63, %v2862_v49  ;;  %v2603_v5 = vadd.f32 %v2447_v59, %v2342_v56  ;;  %v7615_v32 = vrot.slane %v519_v2, 1  ;;  %v7617_v6 = vmul.f32 0.036000773, %v380_v20 }
  0xc1   : > { %v3283_v34 = vrot.slane %v3161_v53, 3  ;;  %v7620_v55 = vmul.f32 0.036000773, %v7597_v12  ;;  %v983_v11 = vrot.slane %v858_v47, 2  ;;  %v644_v54 = vsel %vm631_vm1, %v642_v14, %v643_v62 }
  0xc2   : > { %v3284_v39 = vrot.slane %v3162_v22, 3  ;;  %v2683_v28 = vadd.f32 %v2659_v35, %v2603_v5  ;;  %v7625_v57 = vsel %vm631_vm1, %v643_v62, %v7615_v32  ;;  %v800_v33 = vadd.f32 %v7615_v32, %v7606_v24 }
  0xc3   : > { %v798_v17 = vadd.f32 %v644_v54, %v457_v58  ;;  %v799_v18 = vadd.f32 %v7625_v57, %v7603_v19  ;;  %v984_v38 = vrot.slane %v7617_v6, 2  ;;  %v986_v43 = vrot.slane %v7620_v55, 2 }
  0xc4   : > { %v3285_v40 = vsel %vm1313_vm3, %v3283_v34, %v3284_v39  ;;  %v2863_v35 = vadd.f32 %v2780_v42, %v2683_v28  ;;  %v1199_v63 = vmul.f32 0.10936069, %v379_v30  ;;  %v7640_v49 = vmul.f32 0.10936069, %v380_v20 }
  0xc5   : > { %v3384_v61 = vsel %vm262_vm0, %v3285_v40, 0  ;;  %v985_v4 = vsel %vm972_vm2, %v983_v11, %v984_v38  ;;  %v7643_v58 = vmul.f32 0.10936069, %v7597_v12  ;;  %v987_v50 = vsel %vm972_vm2, %v984_v38, %v986_v43 }
  0xc6   : > { %v7637_v26 = vand.u32 4294901760, %v3384_v61  ;;  %v3163_v27 = vadd.f32 %v3006_v9, %v2863_v35  ;;  %v1139_v56 = vadd.f32 %v985_v4, %v798_v17  ;;  %v1141_v44 = vadd.f32 %v986_v43, %v800_v33 }
  0xc7   : > { %v1140_v59 = vadd.f32 %v987_v50, %v799_v18  ;;  %v1324_v29 = vrot.slane %v1199_v63, 3  ;;  %v1325_v2 = vrot.slane %v7640_v49, 3  ;;  %v1327_v22 = vrot.slane %v7643_v58, 3 }
  0xc8   : > { %v7649_v42 = vsub.f32 %v3384_v61, %v7637_v26  ;;  %v3286_v53 = vrot.slane %v3163_v27, 3  ;;  %v1540_v14 = vmul.f32 0.21300554, %v379_v30  ;;  %v1541_v47 = vmul.f32 0.21300554, %v380_v20 }
  0xc9   : > { %v1326_v37 = vsel %vm1313_vm3, %v1324_v29, %v1325_v2  ;;  %v7656_v9 = vmul.f32 0.21300554, %v7597_v12  ;;  %v1879_v62 = vmul.f32 0.26601171, %v380_v20  ;;  %v1328_v11 = vsel %vm1313_vm3, %v1325_v2, %v1327_v22 }
  0xca   : > { %9839 = vst [vmem:[#allocation15_spill] sm:$0xff] %v7649_v42  ;;  %v3549_v5 = vand.u32 4294901760, %v7649_v42  ;;  %v3287_v34 = vsel %vm1313_vm3, %v3284_v39, %v3286_v53  ;;  %v1480_v28 = vadd.f32 %v1326_v37, %v1139_v56  ;;  %v1482_v54 = vadd.f32 %v1327_v22, %v1141_v44  ;;  %v382_v44 = vld [vmem:[#allocation2 + $0x58] sm:$0xff] }
  0xcb   : > { %v3386_v33 = vsel %vm262_vm0, %v3287_v34, 0  ;;  %v1481_v40 = vadd.f32 %v1328_v11, %v1140_v59  ;;  %v1665_v17 = vrot.slane %v1540_v14, 4  ;;  %v1666_v38 = vrot.slane %v1541_v47, 4 }
  0xcc   : > { %6372 = vmatprep.mubr.f32.mxu0 %v3549_v5  ;;  %v3550_v30 = vsub.f32 %v7649_v42, %v3549_v5  ;;  %v7662_v18 = vand.u32 4294901760, %v3386_v33  ;;  %v1668_v61 = vrot.slane %v7656_v9, 4  ;;  %v1880_v20 = vmul.f32 0.26601171, %v7597_v12 }
  0xcd   : > { %v1962_v39 = vrot.slane %v1879_v62, 5  ;;  %v2187_v43 = vrot.slane %v1541_v47, 6  ;;  %v2188_v63 = vrot.slane %v7656_v9, 6  ;;  %v1667_v27 = vsel %vm1654_vm4, %v1665_v17, %v1666_v38 }
  0xce   : > { %v3551_v35 = vand.u32 4294901760, %v3550_v30  ;;  %v7668_v4 = vsub.f32 %v3386_v33, %v7662_v18  ;;  %v1669_v50 = vsel %vm1654_vm4, %v1666_v38, %v1668_v61  ;;  %v1963_v56 = vrot.slane %v1880_v20, 5 }
  0xcf   : > { %v1821_v59 = vadd.f32 %v1667_v27, %v1480_v28  ;;  %v1822_v29 = vadd.f32 %v1669_v50, %v1481_v40  ;;  %v2189_v2 = vsel %vm2176_vm6, %v2187_v43, %v2188_v63  ;;  %v2448_v12 = vrot.slane %v7640_v49, 7  ;;  %v383_v50 = vld [vmem:[#allocation2 + $0x60] sm:$0xff] }
  0xd0   : > { %9840 = vst [vmem:[#allocation16_spill] sm:$0xff] %v7668_v4  ;;  %6180 = vmatprep.mubr.f32.mxu1 %v3551_v35  ;;  %v3559_v53 = vand.u32 4294901760, %v7668_v4  ;;  %v1964_v22 = vsel %vm1955_vm5, %v1962_v39, %v1963_v56  ;;  %v2449_v14 = vrot.slane %v7643_v58, 7  ;;  %v7677_v47 = vmul.f32 0.007598758, %v382_v44 }
  0xd1   : > { %v2082_v5 = vadd.f32 %v1962_v39, %v1821_v59  ;;  %v2083_v37 = vadd.f32 %v1964_v22, %v1822_v29  ;;  %v7679_v9 = vmul.f32 0.0010283801, %v382_v44  ;;  %v3008_v62 = vrot.slane %v7603_v19, 2 }
  0xd2   : > { %6373 = vmatmul.mubr.f32.gmra.mrb[2].mxu0 %v3559_v53  ;;  %v2450_v34 = vsel %vm2437_vm7, %v2448_v12, %v2449_v14  ;;  %v2782_v11 = vrot.slane %v7677_v47, 1  ;;  %v3009_v49 = vrot.slane %v7606_v24, 2  ;;  %v3560_v28 = vsub.f32 %v7668_v4, %v3559_v53 }
  0xd3   : > { %v2343_v33 = vadd.f32 %v2187_v43, %v2082_v5  ;;  %v2344_v30 = vadd.f32 %v2189_v2, %v2083_v37  ;;  %v3011_v58 = vrot.slane %v7679_v9, 2  ;;  %v1823_v40 = vadd.f32 %v1668_v61, %v1482_v54  ;;  %v7691_v2 = vld [vmem:[#allocation2 + $0x68] sm:$0xff]  ;;  %v7695_v61 = vld [vmem:[#allocation2 + $0x70] sm:$0xff] }
  0xd4   : > { %v2783_v17 = vsel %vm631_vm1, %v7615_v32, %v2782_v11  ;;  %v3561_v38 = vand.u32 4294901760, %v3560_v28  ;;  %v2138_v20 = vmul.f32 0.21300554, %v382_v44  ;;  %v3010_v39 = vsel %vm972_vm2, %v3008_v62, %v3009_v49 }
  0xd5   : > { %v2604_v19 = vadd.f32 %v2448_v12, %v2343_v33  ;;  %v2605_v35 = vadd.f32 %v2450_v34, %v2344_v30  ;;  %v2084_v27 = vadd.f32 %v1963_v56, %v1823_v40  ;;  %v3012_v24 = vsel %vm972_vm2, %v3009_v49, %v3011_v58 }
  0xd6   : > { %6181 = vmatmul.mubr.f32.gmra.mrb[2].mxu1 %v3561_v38  ;;  %v2190_v59 = vrot.slane %v2138_v20, 6  ;;  %v2399_v43 = vmul.f32 0.10936069, %v382_v44  ;;  %v2660_v29 = vmul.f32 0.036000773, %v382_v44 }
  0xd7   : > { %v2684_v54 = vadd.f32 %v2604_v19, %v7617_v6  ;;  %v2685_v32 = vadd.f32 %v2605_v35, %v7620_v55  ;;  %v460_v12 = vmul.f32 0.0010283801, %v383_v50  ;;  %v7698_v53 = vmul.f32 0.0010283801, %v7691_v2 }
  0xd8   : > { %v2191_v56 = vsel %vm2176_vm6, %v2188_v63, %v2190_v59  ;;  %v2451_v22 = vrot.slane %v2399_v43, 7  ;;  %v7702_v47 = vmul.f32 0.0010283801, %v7695_v61  ;;  %v520_v5 = vmul.f32 0.007598758, %v383_v50 }
  0xd9   : > { %v2864_v44 = vadd.f32 %v2684_v54, %v7625_v57  ;;  %v2865_v37 = vadd.f32 %v2783_v17, %v2685_v32  ;;  %v2345_v9 = vadd.f32 %v2191_v56, %v2084_v27  ;;  %v521_v6 = vmul.f32 0.007598758, %v7691_v2 }
  0xda   : > { %v2452_v55 = vsel %vm2437_vm7, %v2449_v14, %v2451_v22  ;;  %v522_v62 = vmul.f32 0.007598758, %v7695_v61  ;;  %v647_v34 = vrot.slane %v520_v5, 1  ;;  %v861_v49 = vmul.f32 0.036000773, %v383_v50 }
  0xdb   : > { %v3164_v28 = vadd.f32 %v3010_v39, %v2864_v44  ;;  %v3165_v33 = vadd.f32 %v3012_v24, %v2865_v37  ;;  %v2606_v63 = vadd.f32 %v2452_v55, %v2345_v9  ;;  %v648_v30 = vrot.slane %v521_v6, 1 }
  0xdc   : > { %v7708_v40 = vrot.slane %v522_v62, 1  ;;  %v7711_v38 = vmul.f32 0.036000773, %v7691_v2  ;;  %v7714_v57 = vmul.f32 0.036000773, %v7695_v61  ;;  %v988_v17 = vrot.slane %v861_v49, 2 }
  0xdd   : > { %v3288_v20 = vrot.slane %v3164_v28, 3  ;;  %v3289_v19 = vrot.slane %v3165_v33, 3  ;;  %v2686_v14 = vadd.f32 %v2660_v29, %v2606_v63  ;;  %v649_v35 = vsel %vm631_vm1, %v647_v34, %v648_v30 }
  0xde   : > { %v7719_v39 = vsel %vm631_vm1, %v648_v30, %v7708_v40  ;;  %v801_v27 = vadd.f32 %v649_v35, %v460_v12  ;;  %v803_v24 = vadd.f32 %v7708_v40, %v7702_v47  ;;  %v989_v59 = vrot.slane %v7711_v38, 2 }
  0xdf   : > { %v3290_v43 = vsel %vm1313_vm3, %v3288_v20, %v3289_v19  ;;  %v2866_v54 = vadd.f32 %v2782_v11, %v2686_v14  ;;  %v802_v32 = vadd.f32 %v7719_v39, %v7698_v53  ;;  %v991_v29 = vrot.slane %v7714_v57, 2 }
  0xe0   : > { %v3388_v56 = vsel %vm262_vm0, %v3290_v43, 0  ;;  %v990_v22 = vsel %vm972_vm2, %v988_v17, %v989_v59  ;;  %v1202_v5 = vmul.f32 0.10936069, %v383_v50  ;;  %v7731_v12 = vmul.f32 0.10936069, %v7691_v2 }
  0xe1   : > { %v7733_v44 = vand.u32 4294901760, %v3388_v56  ;;  %v3166_v37 = vadd.f32 %v3011_v58, %v2866_v54  ;;  %v992_v9 = vsel %vm972_vm2, %v989_v59, %v991_v29  ;;  %v1142_v6 = vadd.f32 %v990_v22, %v801_v27 }
  0xe2   : > { %v1143_v11 = vadd.f32 %v992_v9, %v802_v32  ;;  %v1144_v55 = vadd.f32 %v991_v29, %v803_v24  ;;  %v7737_v62 = vmul.f32 0.10936069, %v7695_v61  ;;  %v1329_v34 = vrot.slane %v1202_v5, 3 }
  0xe3   : > { %v7740_v49 = vsub.f32 %v3388_v56, %v7733_v44  ;;  %v3291_v28 = vrot.slane %v3166_v37, 3  ;;  %v1330_v33 = vrot.slane %v7731_v12, 3  ;;  %v1543_v63 = vmul.f32 0.21300554, %v383_v50 }
  0xe4   : > { %v1332_v30 = vrot.slane %v7737_v62, 3  ;;  %v1544_v58 = vmul.f32 0.21300554, %v7691_v2  ;;  %v7746_v17 = vmul.f32 0.21300554, %v7695_v61  ;;  %v2453_v20 = vrot.slane %v7731_v12, 7 }
  0xe5   : > { %9841 = vst [vmem:[#allocation17_spill] sm:$0xff] %v7740_v49  ;;  %v3569_v14 = vand.u32 4294901760, %v7740_v49  ;;  %v3292_v35 = vsel %vm1313_vm3, %v3289_v19, %v3291_v28  ;;  %v1331_v27 = vsel %vm1313_vm3, %v1329_v34, %v1330_v33  ;;  %v1670_v24 = vrot.slane %v1543_v63, 4 }
  0xe6   : > { %v3390_v59 = vsel %vm262_vm0, %v3292_v35, 0  ;;  %v1333_v50 = vsel %vm1313_vm3, %v1330_v33, %v1332_v30  ;;  %v1483_v43 = vadd.f32 %v1331_v27, %v1142_v6  ;;  %v1485_v54 = vadd.f32 %v1332_v30, %v1144_v55 }
  0xe7   : > { %6375 = vmatprep.mubr.f32.mxu0 %v3569_v14  ;;  %v7754_v32 = vand.u32 4294901760, %v3390_v59  ;;  %v3570_v29 = vsub.f32 %v7740_v49, %v3569_v14  ;;  %v1484_v56 = vadd.f32 %v1333_v50, %v1143_v11  ;;  %v1671_v22 = vrot.slane %v1544_v58, 4 }
  0xe8   : > { %v1673_v5 = vrot.slane %v7746_v17, 4  ;;  %v1881_v19 = vmul.f32 0.26601171, %v7691_v2  ;;  %v1882_v12 = vmul.f32 0.26601171, %v7695_v61  ;;  %v2192_v37 = vrot.slane %v1544_v58, 6 }
  0xe9   : > { %9842 = vst [vmem:[#allocation18_spill] sm:$0xff] %v7754_v32  ;;  %v7761_v9 = vsub.f32 %v3390_v59, %v7754_v32  ;;  %v3571_v34 = vand.u32 4294901760, %v3570_v29  ;;  %v1672_v6 = vsel %vm1654_vm4, %v1670_v24, %v1671_v22  ;;  %v2193_v55 = vrot.slane %v7746_v17, 6  ;;  %v386_v2 = vld [vmem:[#allocation2 + $0x78] sm:$0xff] }
  0xea   : > { %v1674_v28 = vsel %vm1654_vm4, %v1671_v22, %v1673_v5  ;;  %v1824_v33 = vadd.f32 %v1672_v6, %v1483_v43  ;;  %v1965_v11 = vrot.slane %v1881_v19, 5  ;;  %v1966_v63 = vrot.slane %v1882_v12, 5 }
  0xeb   : > { %9843 = vst [vmem:[#allocation19_spill] sm:$0xff] %v7761_v9  ;;  %v3579_v30 = vand.u32 4294901760, %v7761_v9  ;;  %6183 = vmatprep.mubr.f32.mxu1 %v3571_v34  ;;  %v1825_v14 = vadd.f32 %v1674_v28, %v1484_v56  ;;  %v2194_v61 = vsel %vm2176_vm6, %v2192_v37, %v2193_v55  ;;  %v2454_v58 = vrot.slane %v7737_v62, 7 }
  0xec   : > { %v1967_v35 = vsel %vm1955_vm5, %v1965_v11, %v1966_v63  ;;  %v2085_v27 = vadd.f32 %v1965_v11, %v1824_v33  ;;  %v2741_v24 = vmul.f32 0.007598758, %v386_v2  ;;  %v7770_v59 = vmul.f32 0.0010283801, %v386_v2 }
  0xed   : > { %6376 = vmatmul.mubr.f32.gmra.mrb[4].mxu0 %v3579_v30  ;;  %v2086_v17 = vadd.f32 %v1967_v35, %v1825_v14  ;;  %v2455_v50 = vsel %vm2437_vm7, %v2453_v20, %v2454_v58  ;;  %v3013_v43 = vrot.slane %v7698_v53, 2  ;;  %v3014_v29 = vrot.slane %v7702_v47, 2 }
  0xee   : > { %v2346_v22 = vadd.f32 %v2192_v37, %v2085_v27  ;;  %v2784_v56 = vrot.slane %v2741_v24, 1  ;;  %v3016_v19 = vrot.slane %v7770_v59, 2  ;;  %v3580_v62 = vsub.f32 %v7761_v9, %v3579_v30  ;;  %v387_v24 = vld [vmem:[#allocation2 + $0x80] sm:$0xff]  ;;  %v7781_v59 = vld [vmem:[#allocation2 + $0x88] sm:$0xff]  ;;  %v7783_v30 = vld [vmem:[#allocation2 + $0x90] sm:$0xff] }
  0xef   : > { %v2347_v12 = vadd.f32 %v2194_v61, %v2086_v17  ;;  %v3015_v34 = vsel %vm972_vm2, %v3013_v43, %v3014_v29  ;;  %v1826_v6 = vadd.f32 %v1673_v5, %v1485_v54  ;;  %v2139_v28 = vmul.f32 0.21300554, %v386_v2 }
  0xf0   : > { %v2607_v33 = vadd.f32 %v2453_v20, %v2346_v22  ;;  %v2785_v11 = vsel %vm631_vm1, %v7708_v40, %v2784_v56  ;;  %v3017_v14 = vsel %vm972_vm2, %v3014_v29, %v3016_v19  ;;  %v3581_v53 = vand.u32 4294901760, %v3580_v62 }
  0xf1   : > { %v2608_v35 = vadd.f32 %v2455_v50, %v2347_v12  ;;  %v2087_v47 = vadd.f32 %v1966_v63, %v1826_v6  ;;  %v2195_v37 = vrot.slane %v2139_v28, 6  ;;  %v2400_v27 = vmul.f32 0.10936069, %v386_v2 }
  0xf2   : > { %v2687_v61 = vadd.f32 %v2607_v33, %v7711_v38  ;;  %6184 = vmatmul.mubr.f32.gmra.mrb[4].mxu1 %v3581_v53  ;;  %v2661_v54 = vmul.f32 0.036000773, %v386_v2  ;;  %v463_v20 = vmul.f32 0.0010283801, %v387_v24  ;;  %v7787_v5 = vmul.f32 0.0010283801, %v7781_v59 }
  0xf3   : > { %v2688_v40 = vadd.f32 %v2608_v35, %v7714_v57  ;;  %v2196_v17 = vsel %vm2176_vm6, %v2193_v55, %v2195_v37  ;;  %v2456_v63 = vrot.slane %v2400_v27, 7  ;;  %v7792_v50 = vmul.f32 0.0010283801, %v7783_v30 }
  0xf4   : > { %v2867_v43 = vadd.f32 %v2687_v61, %v7719_v39  ;;  %v2348_v29 = vadd.f32 %v2196_v17, %v2087_v47  ;;  %v523_v22 = vmul.f32 0.007598758, %v387_v24  ;;  %v524_v38 = vmul.f32 0.007598758, %v7781_v59 }
  0xf5   : > { %v2868_v62 = vadd.f32 %v2785_v11, %v2688_v40  ;;  %v2457_v2 = vsel %vm2437_vm7, %v2454_v58, %v2456_v63  ;;  %v525_v12 = vmul.f32 0.007598758, %v7783_v30  ;;  %v864_v6 = vmul.f32 0.036000773, %v387_v24 }
  0xf6   : > { %v3167_v28 = vadd.f32 %v3015_v34, %v2867_v43  ;;  %v2609_v57 = vadd.f32 %v2457_v2, %v2348_v29  ;;  %v652_v33 = vrot.slane %v523_v22, 1  ;;  %v653_v55 = vrot.slane %v524_v38, 1 }
  0xf7   : > { %v3168_v53 = vadd.f32 %v3017_v14, %v2868_v62  ;;  %v7798_v35 = vrot.slane %v525_v12, 1  ;;  %v7801_v37 = vmul.f32 0.036000773, %v7781_v59  ;;  %v7804_v39 = vmul.f32 0.036000773, %v7783_v30 }
  0xf8   : > { %v3293_v47 = vrot.slane %v3167_v28, 3  ;;  %v2689_v11 = vadd.f32 %v2661_v54, %v2609_v57  ;;  %v654_v58 = vsel %vm631_vm1, %v652_v33, %v653_v55  ;;  %v993_v27 = vrot.slane %v864_v6, 2 }
  0xf9   : > { %v3294_v61 = vrot.slane %v3168_v53, 3  ;;  %v7809_v34 = vsel %vm631_vm1, %v653_v55, %v7798_v35  ;;  %v804_v40 = vadd.f32 %v654_v58, %v463_v20  ;;  %v806_v14 = vadd.f32 %v7798_v35, %v7792_v50 }
  0xfa   : > { %v2869_v17 = vadd.f32 %v2784_v56, %v2689_v11  ;;  %v805_v63 = vadd.f32 %v7809_v34, %v7787_v5  ;;  %v994_v43 = vrot.slane %v7801_v37, 2  ;;  %v996_v54 = vrot.slane %v7804_v39, 2 }
  0xfb   : > { %v3295_v29 = vsel %vm1313_vm3, %v3293_v47, %v3294_v61  ;;  %v1205_v22 = vmul.f32 0.10936069, %v387_v24  ;;  %v7819_v38 = vmul.f32 0.10936069, %v7781_v59  ;;  %v7822_v62 = vmul.f32 0.10936069, %v7783_v30 }
  0xfc   : > { %v3392_v20 = vsel %vm262_vm0, %v3295_v29, 0  ;;  %v3169_v2 = vadd.f32 %v3016_v19, %v2869_v17  ;;  %v995_v56 = vsel %vm972_vm2, %v993_v27, %v994_v43  ;;  %v997_v12 = vsel %vm972_vm2, %v994_v43, %v996_v54 }
  0xfd   : > { %v7827_v6 = vand.u32 4294901760, %v3392_v20  ;;  %v1145_v28 = vadd.f32 %v995_v56, %v804_v40  ;;  %v1146_v57 = vadd.f32 %v997_v12, %v805_v63  ;;  %v1147_v33 = vadd.f32 %v996_v54, %v806_v14 }
  0xfe   : > { %v3296_v55 = vrot.slane %v3169_v2, 3  ;;  %v1334_v53 = vrot.slane %v1205_v22, 3  ;;  %v1335_v47 = vrot.slane %v7819_v38, 3  ;;  %v1337_v11 = vrot.slane %v7822_v62, 3 }
  0xff   : > { %9844 = vst [vmem:[#allocation20_spill] sm:$0xff] %v7827_v6  ;;  %v7832_v58 = vsub.f32 %v3392_v20, %v7827_v6  ;;  %v1546_v29 = vmul.f32 0.21300554, %v387_v24  ;;  %v1547_v19 = vmul.f32 0.21300554, %v7781_v59 }
 0x100   : > { %v7836_v27 = vmul.f32 0.21300554, %v7783_v30  ;;  %v3297_v17 = vsel %vm1313_vm3, %v3294_v61, %v3296_v55  ;;  %v1336_v40 = vsel %vm1313_vm3, %v1334_v53, %v1335_v47  ;;  %v1338_v14 = vsel %vm1313_vm3, %v1335_v47, %v1337_v11 }
 0x101   : > { %9845 = vst [vmem:[#allocation21_spill] sm:$0xff] %v7832_v58  ;;  %v1488_v63 = vadd.f32 %v1337_v11, %v1147_v33  ;;  %v3589_v43 = vand.u32 4294901760, %v7832_v58  ;;  %v3394_v54 = vsel %vm262_vm0, %v3297_v17, 0  ;;  %v1486_v22 = vadd.f32 %v1336_v40, %v1145_v28 }
 0x102   : > { %v1487_v20 = vadd.f32 %v1338_v14, %v1146_v57  ;;  %v7843_v2 = vand.u32 4294901760, %v3394_v54  ;;  %v1675_v24 = vrot.slane %v1546_v29, 4  ;;  %v1676_v56 = vrot.slane %v1547_v19, 4 }
 0x103   : > { %v1678_v12 = vrot.slane %v7836_v27, 4  ;;  %6378 = vmatprep.mubr.f32.mxu0 %v3589_v43  ;;  %v3590_v61 = vsub.f32 %v7832_v58, %v3589_v43  ;;  %v1883_v55 = vmul.f32 0.26601171, %v7781_v59  ;;  %v1884_v53 = vmul.f32 0.26601171, %v7783_v30  ;;  %v390_v58 = vld [vmem:[#allocation2 + $0x98] sm:$0xff] }
 0x104   : > { %9846 = vst [vmem:[#allocation22_spill] sm:$0xff] %v7843_v2  ;;  %v2197_v33 = vrot.slane %v1547_v19, 6  ;;  %v7850_v47 = vsub.f32 %v3394_v54, %v7843_v2  ;;  %v1677_v28 = vsel %vm1654_vm4, %v1675_v24, %v1676_v56  ;;  %v2198_v11 = vrot.slane %v7836_v27, 6 }
 0x105   : > { %v1679_v57 = vsel %vm1654_vm4, %v1676_v56, %v1678_v12  ;;  %v3591_v29 = vand.u32 4294901760, %v3590_v61  ;;  %v1827_v17 = vadd.f32 %v1677_v28, %v1486_v22  ;;  %v1968_v14 = vrot.slane %v1883_v55, 5 }
 0x106   : > { %9847 = vst [vmem:[#allocation23_spill] sm:$0xff] %v7850_v47  ;;  %v1828_v40 = vadd.f32 %v1679_v57, %v1487_v20  ;;  %v3599_v43 = vand.u32 4294901760, %v7850_v47  ;;  %v1969_v59 = vrot.slane %v1884_v53, 5  ;;  %v2199_v30 = vsel %vm2176_vm6, %v2197_v33, %v2198_v11 }
 0x107   : > { %v2458_v19 = vrot.slane %v7819_v38, 7  ;;  %6186 = vmatprep.mubr.f32.mxu1 %v3591_v29  ;;  %v2088_v54 = vadd.f32 %v1968_v14, %v1827_v17  ;;  %v2459_v24 = vrot.slane %v7822_v62, 7  ;;  %v7859_v9 = vmul.f32 0.007598758, %v390_v58 }
 0x108   : > { %v7861_v56 = vmul.f32 0.0010283801, %v390_v58  ;;  %6379 = vmatmul.mubr.f32.gmra.mrb[6].mxu0 %v3599_v43  ;;  %v1970_v27 = vsel %vm1955_vm5, %v1968_v14, %v1969_v59  ;;  %v3018_v22 = vrot.slane %v7787_v5, 2  ;;  %v3019_v20 = vrot.slane %v7792_v50, 2 }
 0x109   : > { %v3600_v61 = vsub.f32 %v7850_v47, %v3599_v43  ;;  %v2089_v55 = vadd.f32 %v1970_v27, %v1828_v40  ;;  %v2349_v53 = vadd.f32 %v2197_v33, %v2088_v54  ;;  %v2460_v38 = vsel %vm2437_vm7, %v2458_v19, %v2459_v24  ;;  %v391_v27 = vld [vmem:[#allocation2 + $0xa0] sm:$0xff] }
 0x10a   : > { %v2786_v28 = vrot.slane %v7859_v9, 1  ;;  %v3020_v62 = vsel %vm972_vm2, %v3018_v22, %v3019_v20  ;;  %v3021_v57 = vrot.slane %v7861_v56, 2  ;;  %v1829_v17 = vadd.f32 %v1678_v12, %v1488_v63  ;;  %v392_v56 = vld [vmem:[#allocation2 + $0xa8] sm:$0xff] }
 0x10b   : > { %v3601_v29 = vand.u32 4294901760, %v3600_v61  ;;  %v2350_v49 = vadd.f32 %v2199_v30, %v2089_v55  ;;  %v2610_v14 = vadd.f32 %v2458_v19, %v2349_v53  ;;  %v2140_v50 = vmul.f32 0.21300554, %v390_v58  ;;  %v7875_v61 = vld [vmem:[#allocation2 + $0xb0] sm:$0xff] }
 0x10c   : > { %v2787_v5 = vsel %vm631_vm1, %v7798_v35, %v2786_v28  ;;  %v3022_v43 = vsel %vm972_vm2, %v3019_v20, %v3021_v57  ;;  %v2090_v33 = vadd.f32 %v1969_v59, %v1829_v17  ;;  %v2401_v40 = vmul.f32 0.10936069, %v390_v58 }
 0x10d   : > { %6187 = vmatmul.mubr.f32.gmra.mrb[6].mxu1 %v3601_v29  ;;  %v2662_v54 = vmul.f32 0.036000773, %v390_v58  ;;  %v2611_v9 = vadd.f32 %v2460_v38, %v2350_v49  ;;  %v2690_v22 = vadd.f32 %v2610_v14, %v7801_v37  ;;  %v2200_v47 = vrot.slane %v2140_v50, 6 }
 0x10e   : > { %v466_v63 = vmul.f32 0.0010283801, %v391_v27  ;;  %v2461_v12 = vrot.slane %v2401_v40, 7  ;;  %v7877_v30 = vmul.f32 0.0010283801, %v392_v56  ;;  %v322_v59 = vmul.f32 %v7320_v15, %v7320_v15 }
 0x10f   : > { %v7880_v35 = vmul.f32 0.0010283801, %v7875_v61  ;;  %v2691_v58 = vadd.f32 %v2611_v9, %v7804_v39  ;;  %v2870_v49 = vadd.f32 %v2690_v22, %v7809_v34  ;;  %v2201_v37 = vsel %vm2176_vm6, %v2198_v11, %v2200_v47 }
 0x110   : > { %v526_v19 = vmul.f32 0.007598758, %v391_v27  ;;  %v2351_v20 = vadd.f32 %v2201_v37, %v2090_v33  ;;  %v2462_v55 = vsel %vm2437_vm7, %v2459_v24, %v2461_v12  ;;  %v527_v53 = vmul.f32 0.007598758, %v392_v56  ;;  %331 = vst.msk [vmem:[#allocation2 + $0x128] sm:$0xff] %vm262_vm0, %v322_v59 }
 0x111   : > { %v528_v38 = vmul.f32 0.007598758, %v7875_v61  ;;  %v2871_v29 = vadd.f32 %v2787_v5, %v2691_v58  ;;  %v3170_v17 = vadd.f32 %v3020_v62, %v2870_v49  ;;  %v867_v50 = vmul.f32 0.036000773, %v391_v27 }
 0x112   : > { %v657_v14 = vrot.slane %v526_v19, 1  ;;  %v2612_v40 = vadd.f32 %v2462_v55, %v2351_v20  ;;  %v658_v4 = vrot.slane %v527_v53, 1  ;;  %v7892_v34 = vmul.f32 0.036000773, %v392_v56 }
 0x113   : > { %v7890_v39 = vrot.slane %v528_v38, 1  ;;  %v3171_v47 = vadd.f32 %v3022_v43, %v2871_v29  ;;  %v3298_v11 = vrot.slane %v3170_v17, 3  ;;  %v7895_v33 = vmul.f32 0.036000773, %v7875_v61 }
 0x114   : > { %v998_v24 = vrot.slane %v867_v50, 2  ;;  %v2692_v9 = vadd.f32 %v2662_v54, %v2612_v40  ;;  %v659_v22 = vsel %vm631_vm1, %v657_v14, %v658_v4  ;;  %v999_v58 = vrot.slane %v7892_v34, 2 }
 0x115   : > { %v7900_v62 = vsel %vm631_vm1, %v658_v4, %v7890_v39  ;;  %v809_v5 = vadd.f32 %v7890_v39, %v7880_v35  ;;  %v3299_v12 = vrot.slane %v3171_v47, 3  ;;  %v807_v59 = vadd.f32 %v659_v22, %v466_v63 }
 0x116   : > { %v808_v43 = vadd.f32 %v7900_v62, %v7877_v30  ;;  %v2872_v49 = vadd.f32 %v2786_v28, %v2692_v9  ;;  %v1001_v37 = vrot.slane %v7895_v33, 2  ;;  %v1208_v54 = vmul.f32 0.10936069, %v391_v27 }
 0x117   : > { %v7908_v19 = vmul.f32 0.10936069, %v392_v56  ;;  %v3300_v20 = vsel %vm1313_vm3, %v3298_v11, %v3299_v12  ;;  %v1000_v4 = vsel %vm972_vm2, %v998_v24, %v999_v58  ;;  %v7913_v55 = vmul.f32 0.10936069, %v7875_v61 }
 0x118   : > { %v1549_v53 = vmul.f32 0.21300554, %v391_v27  ;;  %v3396_v63 = vsel %vm262_vm0, %v3300_v20, 0  ;;  %v3172_v38 = vadd.f32 %v3021_v57, %v2872_v49  ;;  %v1002_v29 = vsel %vm972_vm2, %v999_v58, %v1001_v37 }
 0x119   : > { %v1148_v17 = vadd.f32 %v1000_v4, %v807_v59  ;;  %v7917_v28 = vand.u32 4294901760, %v3396_v63  ;;  %v1149_v14 = vadd.f32 %v1002_v29, %v808_v43  ;;  %v1150_v50 = vadd.f32 %v1001_v37, %v809_v5 }
 0x11a   : > { %v1339_v40 = vrot.slane %v1208_v54, 3  ;;  %v3301_v47 = vrot.slane %v3172_v38, 3  ;;  %v1340_v11 = vrot.slane %v7908_v19, 3  ;;  %v1342_v24 = vrot.slane %v7913_v55, 3 }
 0x11b   : > { %9848 = vst [vmem:[#allocation24_spill] sm:$0xff] %v7917_v28  ;;  %v1550_v9 = vmul.f32 0.21300554, %v392_v56  ;;  %v7922_v22 = vsub.f32 %v3396_v63, %v7917_v28  ;;  %v7925_v27 = vmul.f32 0.21300554, %v7875_v61  ;;  %v1680_v57 = vrot.slane %v1549_v53, 4 }
 0x11c   : > { %v1885_v58 = vmul.f32 0.26601171, %v392_v56  ;;  %v3302_v59 = vsel %vm1313_vm3, %v3299_v12, %v3301_v47  ;;  %v1341_v43 = vsel %vm1313_vm3, %v1339_v40, %v1340_v11  ;;  %v1343_v5 = vsel %vm1313_vm3, %v1340_v11, %v1342_v24 }
 0x11d   : > { %9849 = vst [vmem:[#allocation25_spill] sm:$0xff] %v7922_v22  ;;  %v1491_v49 = vadd.f32 %v1342_v24, %v1150_v50  ;;  %v3609_v37 = vand.u32 4294901760, %v7922_v22  ;;  %v3398_v54 = vsel %vm262_vm0, %v3302_v59, 0  ;;  %v1489_v20 = vadd.f32 %v1341_v43, %v1148_v17 }
 0x11e   : > { %v1490_v4 = vadd.f32 %v1343_v5, %v1149_v14  ;;  %v7932_v63 = vand.u32 4294901760, %v3398_v54  ;;  %v1681_v38 = vrot.slane %v1550_v9, 4  ;;  %v1683_v29 = vrot.slane %v7925_v27, 4 }
 0x11f   : > { %v1886_v56 = vmul.f32 0.26601171, %v7875_v61  ;;  %6381 = vmatprep.mubr.f32.mxu0 %v3609_v37  ;;  %v3610_v12 = vsub.f32 %v7922_v22, %v3609_v37  ;;  %v1971_v53 = vrot.slane %v1885_v58, 5  ;;  %v2202_v40 = vrot.slane %v1550_v9, 6  ;;  %v394_v37 = vld [vmem:[#allocation2 + $0xb8] sm:$0xff] }
 0x120   : > { %9850 = vst [vmem:[#allocation26_spill] sm:$0xff] %v7932_v63  ;;  %v2203_v50 = vrot.slane %v7925_v27, 6  ;;  %v7939_v47 = vsub.f32 %v3398_v54, %v7932_v63  ;;  %v1682_v17 = vsel %vm1654_vm4, %v1680_v57, %v1681_v38  ;;  %v1684_v14 = vsel %vm1654_vm4, %v1681_v38, %v1683_v29 }
 0x121   : > { %v1972_v11 = vrot.slane %v1886_v56, 5  ;;  %v3611_v24 = vand.u32 4294901760, %v3610_v12  ;;  %v1830_v59 = vadd.f32 %v1682_v17, %v1489_v20  ;;  %v1831_v43 = vadd.f32 %v1684_v14, %v1490_v4 }
 0x122   : > { %9851 = vst [vmem:[#allocation27_spill] sm:$0xff] %v7939_v47  ;;  %v2204_v61 = vsel %vm2176_vm6, %v2202_v40, %v2203_v50  ;;  %v3619_v5 = vand.u32 4294901760, %v7939_v47  ;;  %v2463_v27 = vrot.slane %v7908_v19, 7  ;;  %v2464_v58 = vrot.slane %v7913_v55, 7 }
 0x123   : > { %v1973_v9 = vsel %vm1955_vm5, %v1971_v53, %v1972_v11  ;;  %6189 = vmatprep.mubr.f32.mxu1 %v3611_v24  ;;  %v2091_v54 = vadd.f32 %v1971_v53, %v1830_v59  ;;  %v2743_v22 = vmul.f32 0.007598758, %v394_v37  ;;  %v7948_v38 = vmul.f32 0.0010283801, %v394_v37 }
 0x124   : > { %v2092_v57 = vadd.f32 %v1973_v9, %v1831_v43  ;;  %6382 = vmatmul.mubr.f32.gmra.mrb[8].mxu0 %v3619_v5  ;;  %v2465_v20 = vsel %vm2437_vm7, %v2463_v27, %v2464_v58  ;;  %v3023_v4 = vrot.slane %v7877_v30, 2  ;;  %v3024_v56 = vrot.slane %v7880_v35, 2  ;;  %v395_v35 = vld [vmem:[#allocation2 + $0xc0] sm:$0xff] }
 0x125   : > { %v3620_v12 = vsub.f32 %v7939_v47, %v3619_v5  ;;  %v2352_v17 = vadd.f32 %v2202_v40, %v2091_v54  ;;  %v2788_v19 = vrot.slane %v2743_v22, 1  ;;  %v3026_v55 = vrot.slane %v7948_v38, 2  ;;  %v7959_v54 = vld [vmem:[#allocation2 + $0xc8] sm:$0xff] }
 0x126   : > { %v2353_v14 = vadd.f32 %v2204_v61, %v2092_v57  ;;  %v3025_v53 = vsel %vm972_vm2, %v3023_v4, %v3024_v56  ;;  %v1832_v59 = vadd.f32 %v1683_v29, %v1491_v49  ;;  %v2141_v43 = vmul.f32 0.21300554, %v394_v37  ;;  %v7963_v29 = vld [vmem:[#allocation2 + $0xd0] sm:$0xff] }
 0x127   : > { %v3621_v24 = vand.u32 4294901760, %v3620_v12  ;;  %v2613_v9 = vadd.f32 %v2463_v27, %v2352_v17  ;;  %v2789_v36 = vsel %vm631_vm1, %v7890_v39, %v2788_v19  ;;  %v3027_v30 = vsel %vm972_vm2, %v3024_v56, %v3026_v55 }
 0x128   : > { %v2614_v42 = vadd.f32 %v2465_v20, %v2353_v14  ;;  %v2093_v5 = vadd.f32 %v1972_v11, %v1832_v59  ;;  %v2205_v40 = vrot.slane %v2141_v43, 6  ;;  %v2402_v61 = vmul.f32 0.10936069, %v394_v37 }
 0x129   : > { %6190 = vmatmul.mubr.f32.gmra.mrb[8].mxu1 %v3621_v24  ;;  %v2663_v22 = vmul.f32 0.036000773, %v394_v37  ;;  %v2693_v57 = vadd.f32 %v2613_v9, %v7892_v34  ;;  %v469_v27 = vmul.f32 0.0010283801, %v395_v35  ;;  %v7966_v38 = vmul.f32 0.0010283801, %v7959_v54 }
 0x12a   : > { %v2694_v49 = vadd.f32 %v2614_v42, %v7895_v33  ;;  %v2206_v39 = vsel %vm2176_vm6, %v2203_v50, %v2205_v40  ;;  %v2466_v20 = vrot.slane %v2402_v61, 7  ;;  %v7970_v11 = vmul.f32 0.0010283801, %v7963_v29 }
 0x12b   : > { %v529_v4 = vmul.f32 0.007598758, %v395_v35  ;;  %v2873_v37 = vadd.f32 %v2693_v57, %v7900_v62  ;;  %v2354_v12 = vadd.f32 %v2206_v39, %v2093_v5  ;;  %v530_v34 = vmul.f32 0.007598758, %v7959_v54 }
 0x12c   : > { %v2874_v56 = vadd.f32 %v2789_v36, %v2694_v49  ;;  %v2467_v42 = vsel %vm2437_vm7, %v2464_v58, %v2466_v20  ;;  %v531_v33 = vmul.f32 0.007598758, %v7963_v29  ;;  %v870_v14 = vmul.f32 0.036000773, %v395_v35 }
 0x12d   : > { %v662_v17 = vrot.slane %v529_v4, 1  ;;  %v3173_v24 = vadd.f32 %v3025_v53, %v2873_v37  ;;  %v2615_v50 = vadd.f32 %v2467_v42, %v2354_v12  ;;  %v663_v43 = vrot.slane %v530_v34, 1 }
 0x12e   : > { %v3174_v59 = vadd.f32 %v3027_v30, %v2874_v56  ;;  %v7976_v9 = vrot.slane %v531_v33, 1  ;;  %v7979_v40 = vmul.f32 0.036000773, %v7959_v54  ;;  %v7982_v36 = vmul.f32 0.036000773, %v7963_v29 }
 0x12f   : > { %v1003_v62 = vrot.slane %v870_v14, 2  ;;  %v3303_v5 = vrot.slane %v3173_v24, 3  ;;  %v2695_v58 = vadd.f32 %v2663_v22, %v2615_v50  ;;  %v664_v57 = vsel %vm631_vm1, %v662_v17, %v663_v43 }
 0x130   : > { %v3304_v61 = vrot.slane %v3174_v59, 3  ;;  %v7987_v53 = vsel %vm631_vm1, %v663_v43, %v7976_v9  ;;  %v810_v30 = vadd.f32 %v664_v57, %v469_v27  ;;  %v812_v49 = vadd.f32 %v7976_v9, %v7970_v11 }
 0x131   : > { %v1004_v39 = vrot.slane %v7979_v40, 2  ;;  %v2875_v4 = vadd.f32 %v2788_v19, %v2695_v58  ;;  %v811_v37 = vadd.f32 %v7987_v53, %v7966_v38  ;;  %v1006_v22 = vrot.slane %v7982_v36, 2 }
 0x132   : > { %v3305_v20 = vsel %vm1313_vm3, %v3303_v5, %v3304_v61  ;;  %v1211_v34 = vmul.f32 0.10936069, %v395_v35  ;;  %v7999_v27 = vmul.f32 0.10936069, %v7959_v54  ;;  %v8005_v59 = vmul.f32 0.10936069, %v7963_v29 }
 0x133   : > { %v3400_v56 = vsel %vm262_vm0, %v3305_v20, 0  ;;  %v1005_v12 = vsel %vm972_vm2, %v1003_v62, %v1004_v39  ;;  %v3175_v33 = vadd.f32 %v3026_v55, %v2875_v4  ;;  %v1007_v17 = vsel %vm972_vm2, %v1004_v39, %v1006_v22 }
 0x134   : > { %v8001_v42 = vand.u32 4294901760, %v3400_v56  ;;  %v1151_v14 = vadd.f32 %v1005_v12, %v810_v30  ;;  %v1152_v19 = vadd.f32 %v1007_v17, %v811_v37  ;;  %v1153_v24 = vadd.f32 %v1006_v22, %v812_v49 }
 0x135   : > { %v1344_v50 = vrot.slane %v1211_v34, 3  ;;  %v3306_v62 = vrot.slane %v3175_v33, 3  ;;  %v1345_v5 = vrot.slane %v7999_v27, 3  ;;  %v1552_v58 = vmul.f32 0.21300554, %v395_v35 }
 0x136   : > { %9852 = vst [vmem:[#allocation28_spill] sm:$0xff] %v8001_v42  ;;  %v8008_v43 = vsub.f32 %v3400_v56, %v8001_v42  ;;  %v1347_v57 = vrot.slane %v8005_v59, 3  ;;  %v1553_v55 = vmul.f32 0.21300554, %v7959_v54  ;;  %v8014_v39 = vmul.f32 0.21300554, %v7963_v29 }
 0x137   : > { %v2468_v30 = vrot.slane %v7999_v27, 7  ;;  %v3307_v20 = vsel %vm1313_vm3, %v3304_v61, %v3306_v62  ;;  %v1346_v4 = vsel %vm1313_vm3, %v1344_v50, %v1345_v5  ;;  %v1685_v37 = vrot.slane %v1552_v58, 4 }
 0x138   : > { %9853 = vst [vmem:[#allocation29_spill] sm:$0xff] %v8008_v43  ;;  %v3629_v49 = vand.u32 4294901760, %v8008_v43  ;;  %v3402_v22 = vsel %vm262_vm0, %v3307_v20, 0  ;;  %v1348_v35 = vsel %vm1313_vm3, %v1345_v5, %v1347_v57  ;;  %v1492_v56 = vadd.f32 %v1346_v4, %v1151_v14 }
 0x139   : > { %v1494_v12 = vadd.f32 %v1347_v57, %v1153_v24  ;;  %v8022_v34 = vand.u32 4294901760, %v3402_v22  ;;  %v1493_v17 = vadd.f32 %v1348_v35, %v1152_v19  ;;  %v1686_v27 = vrot.slane %v1553_v55, 4 }
 0x13a   : > { %6384 = vmatprep.mubr.f32.mxu0 %v3629_v49  ;;  %v3630_v33 = vsub.f32 %v8008_v43, %v3629_v49  ;;  %v1688_v47 = vrot.slane %v8014_v39, 4  ;;  %v1887_v61 = vmul.f32 0.26601171, %v7959_v54  ;;  %v1888_v50 = vmul.f32 0.26601171, %v7963_v29  ;;  %v398_v54 = vld [vmem:[#allocation2 + $0xd8] sm:$0xff] }
 0x13b   : > { %9854 = vst [vmem:[#allocation30_spill] sm:$0xff] %v8022_v34  ;;  %v2207_v62 = vrot.slane %v1553_v55, 6  ;;  %v8029_v58 = vsub.f32 %v3402_v22, %v8022_v34  ;;  %v1687_v14 = vsel %vm1654_vm4, %v1685_v37, %v1686_v27  ;;  %v2208_v24 = vrot.slane %v8014_v39, 6 }
 0x13c   : > { %v3631_v5 = vand.u32 4294901760, %v3630_v33  ;;  %v1689_v57 = vsel %vm1654_vm4, %v1686_v27, %v1688_v47  ;;  %v1833_v49 = vadd.f32 %v1687_v14, %v1492_v56  ;;  %v1974_v19 = vrot.slane %v1887_v61, 5 }
 0x13d   : > { %9855 = vst [vmem:[#allocation31_spill] sm:$0xff] %v8029_v58  ;;  %v1975_v20 = vrot.slane %v1888_v50, 5  ;;  %v3639_v4 = vand.u32 4294901760, %v8029_v58  ;;  %v1834_v35 = vadd.f32 %v1689_v57, %v1493_v17  ;;  %v2209_v29 = vsel %vm2176_vm6, %v2207_v62, %v2208_v24 }
 0x13e   : > { %6192 = vmatprep.mubr.f32.mxu1 %v3631_v5  ;;  %v2469_v55 = vrot.slane %v8005_v59, 7  ;;  %v2094_v33 = vadd.f32 %v1974_v19, %v1833_v49  ;;  %v2744_v37 = vmul.f32 0.007598758, %v398_v54  ;;  %v8038_v43 = vmul.f32 0.0010283801, %v398_v54 }
 0x13f   : > { %v1976_v22 = vsel %vm1955_vm5, %v1974_v19, %v1975_v20  ;;  %6385 = vmatmul.mubr.f32.gmra.mrb[10].mxu0 %v3639_v4  ;;  %v3028_v27 = vrot.slane %v7966_v38, 2  ;;  %v3029_v61 = vrot.slane %v7970_v11, 2  ;;  %v3640_v59 = vsub.f32 %v8029_v58, %v3639_v4  ;;  %v8051_v4 = vld [vmem:[#allocation2 + $0xf0] sm:$0xff] }
 0x140   : > { %v2095_v39 = vadd.f32 %v1976_v22, %v1834_v35  ;;  %v2470_v56 = vsel %vm2437_vm7, %v2468_v30, %v2469_v55  ;;  %v2355_v50 = vadd.f32 %v2207_v62, %v2094_v33  ;;  %v2790_v17 = vrot.slane %v2744_v37, 1  ;;  %v399_v37 = vld [vmem:[#allocation2 + $0xe0] sm:$0xff] }
 0x141   : > { %v3031_v5 = vrot.slane %v8038_v43, 2  ;;  %v3030_v57 = vsel %vm972_vm2, %v3028_v27, %v3029_v61  ;;  %v1835_v49 = vadd.f32 %v1688_v47, %v1494_v12  ;;  %v2142_v19 = vmul.f32 0.21300554, %v398_v54  ;;  %v8049_v43 = vld [vmem:[#allocation2 + $0xe8] sm:$0xff] }
 0x142   : > { %v2356_v14 = vadd.f32 %v2209_v29, %v2095_v39  ;;  %v2616_v52 = vadd.f32 %v2468_v30, %v2355_v50  ;;  %v2791_v35 = vsel %vm631_vm1, %v7976_v9, %v2790_v17  ;;  %v3641_v38 = vand.u32 4294901760, %v3640_v59 }
 0x143   : > { %v3032_v22 = vsel %vm972_vm2, %v3029_v61, %v3031_v5  ;;  %v2096_v11 = vadd.f32 %v1975_v20, %v1835_v49  ;;  %v2210_v62 = vrot.slane %v2142_v19, 6  ;;  %v2403_v33 = vmul.f32 0.10936069, %v398_v54 }
 0x144   : > { %v2617_v34 = vadd.f32 %v2470_v56, %v2356_v14  ;;  %v2696_v29 = vadd.f32 %v2616_v52, %v7979_v40  ;;  %6193 = vmatmul.mubr.f32.gmra.mrb[10].mxu1 %v3641_v38  ;;  %v2664_v47 = vmul.f32 0.036000773, %v398_v54  ;;  %v472_v30 = vmul.f32 0.0010283801, %v399_v37 }
 0x145   : > { %v8055_v12 = vmul.f32 0.0010283801, %v8049_v43  ;;  %v2211_v39 = vsel %vm2176_vm6, %v2208_v24, %v2210_v62  ;;  %v2471_v20 = vrot.slane %v2403_v33, 7  ;;  %v8060_v56 = vmul.f32 0.0010283801, %v8051_v4 }
 0x146   : > { %v2697_v9 = vadd.f32 %v2617_v34, %v7982_v36  ;;  %v2876_v27 = vadd.f32 %v2696_v29, %v7987_v53  ;;  %v2357_v61 = vadd.f32 %v2211_v39, %v2096_v11  ;;  %v532_v50 = vmul.f32 0.007598758, %v399_v37 }
 0x147   : > { %v533_v52 = vmul.f32 0.007598758, %v8049_v43  ;;  %v2472_v54 = vsel %vm2437_vm7, %v2469_v55, %v2471_v20  ;;  %v534_v59 = vmul.f32 0.007598758, %v8051_v4  ;;  %v873_v14 = vmul.f32 0.036000773, %v399_v37 }
 0x148   : > { %v2877_v40 = vadd.f32 %v2791_v35, %v2697_v9  ;;  %v3176_v49 = vadd.f32 %v3030_v57, %v2876_v27  ;;  %v2618_v36 = vadd.f32 %v2472_v54, %v2357_v61  ;;  %v667_v34 = vrot.slane %v532_v50, 1 }
 0x149   : > { %v668_v24 = vrot.slane %v533_v52, 1  ;;  %v8066_v38 = vrot.slane %v534_v59, 1  ;;  %v8069_v62 = vmul.f32 0.036000773, %v8049_v43  ;;  %v8072_v53 = vmul.f32 0.036000773, %v8051_v4 }
 0x14a   : > { %v3177_v19 = vadd.f32 %v3032_v22, %v2877_v40  ;;  %v3308_v11 = vrot.slane %v3176_v49, 3  ;;  %v2698_v35 = vadd.f32 %v2664_v47, %v2618_v36  ;;  %v1008_v33 = vrot.slane %v873_v14, 2 }
 0x14b   : > { %v669_v55 = vsel %vm631_vm1, %v667_v34, %v668_v24  ;;  %v8077_v57 = vsel %vm631_vm1, %v668_v24, %v8066_v38  ;;  %v815_v22 = vadd.f32 %v8066_v38, %v8060_v56  ;;  %v1009_v27 = vrot.slane %v8069_v62, 2 }
 0x14c   : > { %v3309_v29 = vrot.slane %v3177_v19, 3  ;;  %v813_v9 = vadd.f32 %v669_v55, %v472_v30  ;;  %v2878_v39 = vadd.f32 %v2790_v17, %v2698_v35  ;;  %v814_v20 = vadd.f32 %v8077_v57, %v8055_v12 }
 0x14d   : > { %v1011_v47 = vrot.slane %v8072_v53, 2  ;;  %v1214_v50 = vmul.f32 0.10936069, %v399_v37  ;;  %v8087_v52 = vmul.f32 0.10936069, %v8049_v43  ;;  %v1010_v17 = vsel %vm972_vm2, %v1008_v33, %v1009_v27 }
 0x14e   : > { %v3310_v61 = vsel %vm1313_vm3, %v3308_v11, %v3309_v29  ;;  %v8090_v40 = vmul.f32 0.10936069, %v8051_v4  ;;  %v3178_v54 = vadd.f32 %v3031_v5, %v2878_v39  ;;  %v1154_v49 = vadd.f32 %v1010_v17, %v813_v9 }
 0x14f   : > { %v3404_v30 = vsel %vm262_vm0, %v3310_v61, 0  ;;  %v1012_v59 = vsel %vm972_vm2, %v1009_v27, %v1011_v47  ;;  %v1156_v34 = vadd.f32 %v1011_v47, %v815_v22  ;;  %v1349_v19 = vrot.slane %v1214_v50, 3 }
 0x150   : > { %v8095_v14 = vand.u32 4294901760, %v3404_v30  ;;  %v1155_v36 = vadd.f32 %v1012_v59, %v814_v20  ;;  %v3311_v24 = vrot.slane %v3178_v54, 3  ;;  %v1350_v11 = vrot.slane %v8087_v52, 3 }
 0x151   : > { %v1352_v35 = vrot.slane %v8090_v40, 3  ;;  %v1555_v61 = vmul.f32 0.21300554, %v399_v37  ;;  %v1556_v5 = vmul.f32 0.21300554, %v8049_v43 }
 0x152   : > { %9856 = vst [vmem:[#allocation32_spill] sm:$0xff] %v8095_v14  ;;  %v8100_v55 = vsub.f32 %v3404_v30, %v8095_v14  ;;  %v8104_v33 = vmul.f32 0.21300554, %v8051_v4  ;;  %v3312_v39 = vsel %vm1313_vm3, %v3309_v29, %v3311_v24  ;;  %v1351_v9 = vsel %vm1313_vm3, %v1349_v19, %v1350_v11 }
 0x153   : > { %v1353_v22 = vsel %vm1313_vm3, %v1350_v11, %v1352_v35  ;;  %v1497_v20 = vadd.f32 %v1352_v35, %v1156_v34  ;;  %v3406_v47 = vsel %vm262_vm0, %v3312_v39, 0  ;;  %v1495_v50 = vadd.f32 %v1351_v9, %v1154_v49 }
 0x154   : > { %9857 = vst [vmem:[#allocation33_spill] sm:$0xff] %v8100_v55  ;;  %v3649_v27 = vand.u32 4294901760, %v8100_v55  ;;  %v1496_v30 = vadd.f32 %v1353_v22, %v1155_v36  ;;  %v8111_v54 = vand.u32 4294901760, %v3406_v47  ;;  %v1690_v37 = vrot.slane %v1555_v61, 4 }
 0x155   : > { %v1691_v17 = vrot.slane %v1556_v5, 4  ;;  %v1693_v59 = vrot.slane %v8104_v33, 4  ;;  %v1889_v24 = vmul.f32 0.26601171, %v8049_v43  ;;  %v1890_v19 = vmul.f32 0.26601171, %v8051_v4 }
 0x156   : > { %9858 = vst [vmem:[#allocation34_spill] sm:$0xff] %v8111_v54  ;;  %6387 = vmatprep.mubr.f32.mxu0 %v3649_v27  ;;  %v3650_v29 = vsub.f32 %v8100_v55, %v3649_v27  ;;  %v2212_v34 = vrot.slane %v1556_v5, 6  ;;  %v8118_v11 = vsub.f32 %v3406_v47, %v8111_v54  ;;  %v2213_v35 = vrot.slane %v8104_v33, 6  ;;  %v402_v55 = vld [vmem:[#allocation2 + $0xf8] sm:$0xff] }
 0x157   : > { %v1692_v49 = vsel %vm1654_vm4, %v1690_v37, %v1691_v17  ;;  %v1694_v36 = vsel %vm1654_vm4, %v1691_v17, %v1693_v59  ;;  %v1977_v22 = vrot.slane %v1889_v24, 5  ;;  %v1978_v43 = vrot.slane %v1890_v19, 5 }
 0x158   : > { %9859 = vst [vmem:[#allocation35_spill] sm:$0xff] %v8118_v11  ;;  %v3651_v61 = vand.u32 4294901760, %v3650_v29  ;;  %v1836_v39 = vadd.f32 %v1692_v49, %v1495_v50  ;;  %v1837_v9 = vadd.f32 %v1694_v36, %v1496_v30  ;;  %v3659_v27 = vand.u32 4294901760, %v8118_v11 }
 0x159   : > { %v2214_v4 = vsel %vm2176_vm6, %v2212_v34, %v2213_v35  ;;  %v2473_v5 = vrot.slane %v8087_v52, 7  ;;  %v2474_v37 = vrot.slane %v8090_v40, 7  ;;  %v8127_v58 = vmul.f32 0.007598758, %v402_v55 }
 0x15a   : > { %6195 = vmatprep.mubr.f32.mxu1 %v3651_v61  ;;  %v2097_v47 = vadd.f32 %v1977_v22, %v1836_v39  ;;  %v8129_v17 = vmul.f32 0.0010283801, %v402_v55  ;;  %6388 = vmatmul.mubr.f32.gmra.mrb[12].mxu0 %v3659_v27  ;;  %v1979_v33 = vsel %vm1955_vm5, %v1977_v22, %v1978_v43  ;;  %v3033_v50 = vrot.slane %v8055_v12, 2 }
 0x15b   : > { %v3034_v30 = vrot.slane %v8060_v56, 2  ;;  %v3660_v29 = vsub.f32 %v8118_v11, %v3659_v27  ;;  %v2098_v24 = vadd.f32 %v1979_v33, %v1837_v9  ;;  %v2475_v52 = vsel %vm2437_vm7, %v2473_v5, %v2474_v37  ;;  %v403_v33 = vld [vmem:[#allocation2 + $0x100] sm:$0xff] }
 0x15c   : > { %v2358_v19 = vadd.f32 %v2212_v34, %v2097_v47  ;;  %v2792_v49 = vrot.slane %v8127_v58, 1  ;;  %v3036_v36 = vrot.slane %v8129_v17, 2  ;;  %v1838_v39 = vadd.f32 %v1693_v59, %v1497_v20  ;;  %v404_v17 = vld [vmem:[#allocation2 + $0x108] sm:$0xff] }
 0x15d   : > { %v3035_v40 = vsel %vm972_vm2, %v3033_v50, %v3034_v30  ;;  %v3661_v61 = vand.u32 4294901760, %v3660_v29  ;;  %v2359_v54 = vadd.f32 %v2214_v4, %v2098_v24  ;;  %v2143_v56 = vmul.f32 0.21300554, %v402_v55  ;;  %v8143_v29 = vld [vmem:[#allocation2 + $0x110] sm:$0xff] }
 0x15e   : > { %v2619_v22 = vadd.f32 %v2473_v5, %v2358_v19  ;;  %v2793_v12 = vsel %vm631_vm1, %v8066_v38, %v2792_v49  ;;  %v3037_v27 = vsel %vm972_vm2, %v3034_v30, %v3036_v36  ;;  %v2099_v34 = vadd.f32 %v1978_v43, %v1838_v39 }
 0x15f   : > { %6196 = vmatmul.mubr.f32.gmra.mrb[12].mxu1 %v3661_v61  ;;  %v2404_v9 = vmul.f32 0.10936069, %v402_v55  ;;  %v2665_v47 = vmul.f32 0.036000773, %v402_v55  ;;  %v2620_v58 = vadd.f32 %v2475_v52, %v2359_v54  ;;  %v2215_v11 = vrot.slane %v2143_v56, 6 }
 0x160   : > { %v2699_v50 = vadd.f32 %v2619_v22, %v8069_v62  ;;  %v475_v20 = vmul.f32 0.0010283801, %v403_v33  ;;  %v8145_v4 = vmul.f32 0.0010283801, %v404_v17  ;;  %v8148_v38 = vmul.f32 0.0010283801, %v8143_v29 }
 0x161   : > { %v2476_v59 = vrot.slane %v2404_v9, 7  ;;  %v323_v43 = vmul.f32 %v7356_v31, %v7356_v31  ;;  %v2700_v55 = vadd.f32 %v2620_v58, %v8072_v53  ;;  %v2216_v62 = vsel %vm2176_vm6, %v2213_v35, %v2215_v11 }
 0x162   : > { %v2879_v54 = vadd.f32 %v2699_v50, %v8077_v57  ;;  %v535_v5 = vmul.f32 0.007598758, %v403_v33  ;;  %v2360_v30 = vadd.f32 %v2216_v62, %v2099_v34  ;;  %v536_v19 = vmul.f32 0.007598758, %v404_v17 }
 0x163   : > { %v2477_v24 = vsel %vm2437_vm7, %v2474_v37, %v2476_v59  ;;  %v537_v52 = vmul.f32 0.007598758, %v8143_v29  ;;  %332 = vst.msk [vmem:[#allocation2 + $0x130] sm:$0xff] %vm262_vm0, %v323_v43  ;;  %v2880_v61 = vadd.f32 %v2793_v12, %v2700_v55  ;;  %v876_v56 = vmul.f32 0.036000773, %v403_v33 }
 0x164   : > { %v3179_v39 = vadd.f32 %v3035_v40, %v2879_v54  ;;  %v672_v22 = vrot.slane %v535_v5, 1  ;;  %v2621_v9 = vadd.f32 %v2477_v24, %v2360_v30  ;;  %v673_v14 = vrot.slane %v536_v19, 1 }
 0x165   : > { %v8158_v53 = vrot.slane %v537_v52, 1  ;;  %v8160_v57 = vmul.f32 0.036000773, %v404_v17  ;;  %v3180_v11 = vadd.f32 %v3037_v27, %v2880_v61  ;;  %v8163_v34 = vmul.f32 0.036000773, %v8143_v29 }
 0x166   : > { %v3313_v35 = vrot.slane %v3179_v39, 3  ;;  %v1013_v37 = vrot.slane %v876_v56, 2  ;;  %v2701_v58 = vadd.f32 %v2665_v47, %v2621_v9  ;;  %v674_v50 = vsel %vm631_vm1, %v672_v22, %v673_v14 }
 0x167   : > { %v8168_v40 = vsel %vm631_vm1, %v673_v14, %v8158_v53  ;;  %v818_v12 = vadd.f32 %v8158_v53, %v8148_v38  ;;  %v3314_v59 = vrot.slane %v3180_v11, 3  ;;  %v816_v43 = vadd.f32 %v674_v50, %v475_v20 }
 0x168   : > { %v817_v27 = vadd.f32 %v8168_v40, %v8145_v4  ;;  %v1014_v55 = vrot.slane %v8160_v57, 2  ;;  %v2881_v54 = vadd.f32 %v2792_v49, %v2701_v58  ;;  %v1016_v62 = vrot.slane %v8163_v34, 2 }
 0x169   : > { %v1217_v47 = vmul.f32 0.10936069, %v403_v33  ;;  %v8176_v5 = vmul.f32 0.10936069, %v404_v17  ;;  %v3315_v30 = vsel %vm1313_vm3, %v3313_v35, %v3314_v59  ;;  %v8181_v24 = vmul.f32 0.10936069, %v8143_v29 }
 0x16a   : > { %v1015_v14 = vsel %vm972_vm2, %v1013_v37, %v1014_v55  ;;  %v1558_v19 = vmul.f32 0.21300554, %v403_v33  ;;  %v3408_v20 = vsel %vm262_vm0, %v3315_v30, 0  ;;  %v3181_v52 = vadd.f32 %v3036_v36, %v2881_v54 }
 0x16b   : > { %v1017_v61 = vsel %vm972_vm2, %v1014_v55, %v1016_v62  ;;  %v1157_v39 = vadd.f32 %v1015_v14, %v816_v43  ;;  %v8185_v49 = vand.u32 4294901760, %v3408_v20  ;;  %v1159_v56 = vadd.f32 %v1016_v62, %v818_v12 }
 0x16c   : > { %v1158_v22 = vadd.f32 %v1017_v61, %v817_v27  ;;  %v1354_v9 = vrot.slane %v1217_v47, 3  ;;  %v3316_v11 = vrot.slane %v3181_v52, 3  ;;  %v1355_v35 = vrot.slane %v8176_v5, 3 }
 0x16d   : > { %9860 = vst [vmem:[#allocation36_spill] sm:$0xff] %v8185_v49  ;;  %v1357_v37 = vrot.slane %v8181_v24, 3  ;;  %v1559_v58 = vmul.f32 0.21300554, %v404_v17  ;;  %v8190_v50 = vsub.f32 %v3408_v20, %v8185_v49  ;;  %v8193_v33 = vmul.f32 0.21300554, %v8143_v29 }
 0x16e   : > { %v1695_v36 = vrot.slane %v1558_v19, 4  ;;  %v1891_v55 = vmul.f32 0.26601171, %v404_v17  ;;  %v3317_v43 = vsel %vm1313_vm3, %v3314_v59, %v3316_v11  ;;  %v1356_v27 = vsel %vm1313_vm3, %v1354_v9, %v1355_v35 }
 0x16f   : > { %9861 = vst [vmem:[#allocation37_spill] sm:$0xff] %v8190_v50  ;;  %v1358_v12 = vsel %vm1313_vm3, %v1355_v35, %v1357_v37  ;;  %v1500_v54 = vadd.f32 %v1357_v37, %v1159_v56  ;;  %v3669_v62 = vand.u32 4294901760, %v8190_v50  ;;  %v3410_v47 = vsel %vm262_vm0, %v3317_v43, 0 }
 0x170   : > { %v1498_v30 = vadd.f32 %v1356_v27, %v1157_v39  ;;  %v1499_v14 = vadd.f32 %v1358_v12, %v1158_v22  ;;  %v8200_v20 = vand.u32 4294901760, %v3410_v47  ;;  %v1696_v52 = vrot.slane %v1559_v58, 4 }
 0x171   : > { %v1698_v61 = vrot.slane %v8193_v33, 4  ;;  %v1892_v17 = vmul.f32 0.26601171, %v8143_v29  ;;  %6390 = vmatprep.mubr.f32.mxu0 %v3669_v62  ;;  %v3670_v59 = vsub.f32 %v8190_v50, %v3669_v62  ;;  %v1980_v19 = vrot.slane %v1891_v55, 5  ;;  %v406_v62 = vld [vmem:[#allocation2 + $0x118] sm:$0xff] }
 0x172   : > { %9862 = vst [vmem:[#allocation38_spill] sm:$0xff] %v8200_v20  ;;  %v2217_v9 = vrot.slane %v1559_v58, 6  ;;  %v2218_v56 = vrot.slane %v8193_v33, 6  ;;  %v8207_v11 = vsub.f32 %v3410_v47, %v8200_v20  ;;  %v1697_v39 = vsel %vm1654_vm4, %v1695_v36, %v1696_v52 }
 0x173   : > { %v1699_v22 = vsel %vm1654_vm4, %v1696_v52, %v1698_v61  ;;  %v1981_v35 = vrot.slane %v1892_v17, 5  ;;  %v3671_v37 = vand.u32 4294901760, %v3670_v59  ;;  %v1839_v43 = vadd.f32 %v1697_v39, %v1498_v30 }
 0x174   : > { %9863 = vst [vmem:[#allocation39_spill] sm:$0xff] %v8207_v11  ;;  %v1840_v27 = vadd.f32 %v1699_v22, %v1499_v14  ;;  %v2219_v29 = vsel %vm2176_vm6, %v2217_v9, %v2218_v56  ;;  %v3679_v12 = vand.u32 4294901760, %v8207_v11  ;;  %v2478_v33 = vrot.slane %v8176_v5, 7 }
 0x175   : > { %v1982_v58 = vsel %vm1955_vm5, %v1980_v19, %v1981_v35  ;;  %v2479_v55 = vrot.slane %v8181_v24, 7  ;;  %6198 = vmatprep.mubr.f32.mxu1 %v3671_v37  ;;  %v2100_v47 = vadd.f32 %v1980_v19, %v1839_v43  ;;  %v2746_v50 = vmul.f32 0.007598758, %v406_v62 }
 0x176   : > { %v2101_v36 = vadd.f32 %v1982_v58, %v1840_v27  ;;  %v8216_v52 = vmul.f32 0.0010283801, %v406_v62  ;;  %6391 = vmatmul.mubr.f32.gmra.mrb[14].mxu0 %v3679_v12  ;;  %v3038_v14 = vrot.slane %v8145_v4, 2  ;;  %v3039_v17 = vrot.slane %v8148_v38, 2  ;;  %v407_v38 = vld [vmem:[#allocation2 + $0x120] sm:$0xff] }
 0x177   : > { %v2480_v30 = vsel %vm2437_vm7, %v2478_v33, %v2479_v55  ;;  %v3680_v59 = vsub.f32 %v8207_v11, %v3679_v12  ;;  %v2361_v39 = vadd.f32 %v2217_v9, %v2100_v47  ;;  %v2794_v5 = vrot.slane %v2746_v50, 1  ;;  %v8227_v47 = vld [vmem:[#allocation2 + $0x128] sm:$0xff] }
 0x178   : > { %v2362_v22 = vadd.f32 %v2219_v29, %v2101_v36  ;;  %v3041_v24 = vrot.slane %v8216_v52, 2  ;;  %v3040_v19 = vsel %vm972_vm2, %v3038_v14, %v3039_v17  ;;  %v1841_v43 = vadd.f32 %v1698_v61, %v1500_v54  ;;  %v8231_v61 = vld [vmem:[#allocation2 + $0x130] sm:$0xff] }
 0x179   : > { %v3681_v37 = vand.u32 4294901760, %v3680_v59  ;;  %v2144_v27 = vmul.f32 0.21300554, %v406_v62  ;;  %v2622_v58 = vadd.f32 %v2478_v33, %v2361_v39  ;;  %v2795_v49 = vsel %vm631_vm1, %v8158_v53, %v2794_v5 }
 0x17a   : > { %v2623_v20 = vadd.f32 %v2480_v30, %v2362_v22  ;;  %v3042_v4 = vsel %vm972_vm2, %v3039_v17, %v3041_v24  ;;  %v2102_v12 = vadd.f32 %v1981_v35, %v1841_v43  ;;  %v2405_v29 = vmul.f32 0.10936069, %v406_v62 }
 0x17b   : > { %6199 = vmatmul.mubr.f32.gmra.mrb[14].mxu1 %v3681_v37  ;;  %v2220_v9 = vrot.slane %v2144_v27, 6  ;;  %v2666_v50 = vmul.f32 0.036000773, %v406_v62  ;;  %v2702_v36 = vadd.f32 %v2622_v58, %v8160_v57  ;;  %v478_v33 = vmul.f32 0.0010283801, %v407_v38 }
 0x17c   : > { %v2703_v54 = vadd.f32 %v2623_v20, %v8163_v34  ;;  %v8234_v52 = vmul.f32 0.0010283801, %v8227_v47  ;;  %v2481_v30 = vrot.slane %v2405_v29, 7  ;;  %v8238_v35 = vmul.f32 0.0010283801, %v8231_v61 }
 0x17d   : > { %v2221_v53 = vsel %vm2176_vm6, %v2218_v56, %v2220_v9  ;;  %v538_v14 = vmul.f32 0.007598758, %v407_v38  ;;  %v2882_v62 = vadd.f32 %v2702_v36, %v8168_v40  ;;  %v539_v57 = vmul.f32 0.007598758, %v8227_v47 }
 0x17e   : > { %v2883_v17 = vadd.f32 %v2795_v49, %v2703_v54  ;;  %v2363_v59 = vadd.f32 %v2221_v53, %v2102_v12  ;;  %v2482_v34 = vsel %vm2437_vm7, %v2479_v55, %v2481_v30  ;;  %v540_v20 = vmul.f32 0.007598758, %v8231_v61 }
 0x17f   : > { %v677_v39 = vrot.slane %v538_v14, 1  ;;  %v879_v22 = vmul.f32 0.036000773, %v407_v38  ;;  %v3182_v37 = vadd.f32 %v3040_v19, %v2882_v62  ;;  %v678_v27 = vrot.slane %v539_v57, 1 }
 0x180   : > { %v3183_v43 = vadd.f32 %v3042_v4, %v2883_v17  ;;  %v2624_v56 = vadd.f32 %v2482_v34, %v2363_v59  ;;  %v8244_v58 = vrot.slane %v540_v20, 1  ;;  %v8247_v9 = vmul.f32 0.036000773, %v8227_v47 }
 0x181   : > { %v8250_v40 = vmul.f32 0.036000773, %v8231_v61  ;;  %v1018_v49 = vrot.slane %v879_v22, 2  ;;  %v3318_v12 = vrot.slane %v3182_v37, 3  ;;  %v679_v36 = vsel %vm631_vm1, %v677_v39, %v678_v27 }
 0x182   : > { %v3319_v29 = vrot.slane %v3183_v43, 3  ;;  %v2704_v55 = vadd.f32 %v2666_v50, %v2624_v56  ;;  %v8255_v19 = vsel %vm631_vm1, %v678_v27, %v8244_v58  ;;  %v819_v4 = vadd.f32 %v679_v36, %v478_v33 }
 0x183   : > { %v821_v54 = vadd.f32 %v8244_v58, %v8238_v35  ;;  %v1019_v53 = vrot.slane %v8247_v9, 2  ;;  %v820_v62 = vadd.f32 %v8255_v19, %v8234_v52  ;;  %v1021_v50 = vrot.slane %v8250_v40, 2 }
 0x184   : > { %v3320_v30 = vsel %vm1313_vm3, %v3318_v12, %v3319_v29  ;;  %v2884_v14 = vadd.f32 %v2794_v5, %v2704_v55  ;;  %v1220_v57 = vmul.f32 0.10936069, %v407_v38  ;;  %v8267_v33 = vmul.f32 0.10936069, %v8227_v47 }
 0x185   : > { %v3412_v17 = vsel %vm262_vm0, %v3320_v30, 0  ;;  %v1020_v59 = vsel %vm972_vm2, %v1018_v49, %v1019_v53  ;;  %v1022_v39 = vsel %vm972_vm2, %v1019_v53, %v1021_v50  ;;  %v1162_v37 = vadd.f32 %v1021_v50, %v821_v54 }
 0x186   : > { %v8269_v34 = vand.u32 4294901760, %v3412_v17  ;;  %v3184_v20 = vadd.f32 %v3041_v24, %v2884_v14  ;;  %v1160_v22 = vadd.f32 %v1020_v59, %v819_v4  ;;  %v1161_v5 = vadd.f32 %v1022_v39, %v820_v62 }
 0x187   : > { %v8273_v43 = vmul.f32 0.10936069, %v8231_v61  ;;  %v1359_v56 = vrot.slane %v1220_v57, 3  ;;  %v1360_v12 = vrot.slane %v8267_v33, 3  ;;  %v1561_v55 = vmul.f32 0.21300554, %v407_v38 }
 0x188   : > { %9864 = vst [vmem:[#allocation40_spill] sm:$0xff] %v8269_v34  ;;  %v8276_v27 = vsub.f32 %v3412_v17, %v8269_v34  ;;  %v3321_v49 = vrot.slane %v3184_v20, 3  ;;  %v1562_v24 = vmul.f32 0.21300554, %v8227_v47  ;;  %v8282_v53 = vmul.f32 0.21300554, %v8231_v61 }
 0x189   : > { %v1362_v36 = vrot.slane %v8273_v43, 3  ;;  %v2483_v4 = vrot.slane %v8267_v33, 7  ;;  %v1361_v14 = vsel %vm1313_vm3, %v1359_v56, %v1360_v12  ;;  %v1700_v62 = vrot.slane %v1561_v55, 4  ;;  %v411_v34 = vld [vmem:[#allocation2 + $0x140] sm:$0xff] }
 0x18a   : > { %9865 = vst [vmem:[#allocation41_spill] sm:$0xff] %v8276_v27  ;;  %v3689_v54 = vand.u32 4294901760, %v8276_v27  ;;  %v3322_v30 = vsel %vm1313_vm3, %v3319_v29, %v3321_v49  ;;  %v1501_v17 = vadd.f32 %v1361_v14, %v1160_v22  ;;  %v1701_v33 = vrot.slane %v1562_v24, 4 }
 0x18b   : > { %v3414_v50 = vsel %vm262_vm0, %v3322_v30, 0  ;;  %v1363_v38 = vsel %vm1313_vm3, %v1360_v12, %v1362_v36  ;;  %v1503_v59 = vadd.f32 %v1362_v36, %v1162_v37  ;;  %v1703_v11 = vrot.slane %v8282_v53, 4 }
 0x18c   : > { %6393 = vmatprep.mubr.f32.mxu0 %v3689_v54  ;;  %v8290_v57 = vand.u32 4294901760, %v3414_v50  ;;  %v3690_v20 = vsub.f32 %v8276_v27, %v3689_v54  ;;  %v1502_v39 = vadd.f32 %v1363_v38, %v1161_v5  ;;  %v1893_v29 = vmul.f32 0.26601171, %v8227_v47  ;;  %v410_v47 = vld [vmem:[#allocation2 + $0x138] sm:$0xff] }
 0x18d   : > { %v1894_v56 = vmul.f32 0.26601171, %v8231_v61  ;;  %v2222_v49 = vrot.slane %v1562_v24, 6  ;;  %v1702_v22 = vsel %vm1654_vm4, %v1700_v62, %v1701_v33  ;;  %v2223_v37 = vrot.slane %v8282_v53, 6 }
 0x18e   : > { %9866 = vst [vmem:[#allocation42_spill] sm:$0xff] %v8290_v57  ;;  %v8297_v55 = vsub.f32 %v3414_v50, %v8290_v57  ;;  %v3691_v12 = vand.u32 4294901760, %v3690_v20  ;;  %v1704_v36 = vsel %vm1654_vm4, %v1701_v33, %v1703_v11  ;;  %v1842_v54 = vadd.f32 %v1702_v22, %v1501_v17 }
 0x18f   : > { %v1983_v5 = vrot.slane %v1893_v29, 5  ;;  %v1984_v30 = vrot.slane %v1894_v56, 5  ;;  %v1843_v38 = vadd.f32 %v1704_v36, %v1502_v39  ;;  %v2224_v61 = vsel %vm2176_vm6, %v2222_v49, %v2223_v37 }
 0x190   : > { %9867 = vst [vmem:[#allocation43_spill] sm:$0xff] %v8297_v55  ;;  %v3699_v14 = vand.u32 4294901760, %v8297_v55  ;;  %6201 = vmatprep.mubr.f32.mxu1 %v3691_v12  ;;  %v2484_v24 = vrot.slane %v8273_v43, 7  ;;  %v2747_v62 = vmul.f32 0.007598758, %v410_v47  ;;  %v3043_v33 = vrot.slane %v8234_v52, 2 }
 0x191   : > { %v1985_v50 = vsel %vm1955_vm5, %v1983_v5, %v1984_v30  ;;  %v2103_v20 = vadd.f32 %v1983_v5, %v1842_v54  ;;  %v8306_v27 = vmul.f32 0.0010283801, %v410_v47  ;;  %v3044_v29 = vrot.slane %v8238_v35, 2 }
 0x192   : > { %6394 = vmatmul.mubr.f32.gmra.mrb[16].mxu0 %v3699_v14  ;;  %v2104_v53 = vadd.f32 %v1985_v50, %v1843_v38  ;;  %v2485_v17 = vsel %vm2437_vm7, %v2483_v4, %v2484_v24  ;;  %v2796_v39 = vrot.slane %v2747_v62, 1  ;;  %v3700_v43 = vsub.f32 %v8297_v55, %v3699_v14 }
 0x193   : > { %v2364_v56 = vadd.f32 %v2222_v49, %v2103_v20  ;;  %v3046_v12 = vrot.slane %v8306_v27, 2  ;;  %v3045_v36 = vsel %vm972_vm2, %v3043_v33, %v3044_v29  ;;  %v1844_v54 = vadd.f32 %v1703_v11, %v1503_v59 }
 0x194   : > { %v2365_v22 = vadd.f32 %v2224_v61, %v2104_v53  ;;  %v2145_v5 = vmul.f32 0.21300554, %v410_v47  ;;  %v2797_v38 = vsel %vm631_vm1, %v8244_v58, %v2796_v39  ;;  %v3701_v35 = vand.u32 4294901760, %v3700_v43 }
 0x195   : > { %v2625_v57 = vadd.f32 %v2483_v4, %v2364_v56  ;;  %v3047_v52 = vsel %vm972_vm2, %v3044_v29, %v3046_v12  ;;  %v2105_v50 = vadd.f32 %v1984_v30, %v1844_v54  ;;  %v2406_v62 = vmul.f32 0.10936069, %v410_v47  ;;  %v414_v56 = vld [vmem:[#allocation2 + $0x158] sm:$0xff] }
 0x196   : > { %v2626_v49 = vadd.f32 %v2485_v17, %v2365_v22  ;;  %v2225_v20 = vrot.slane %v2145_v5, 6  ;;  %6202 = vmatmul.mubr.f32.gmra.mrb[16].mxu1 %v3701_v35  ;;  %v2667_v61 = vmul.f32 0.036000773, %v410_v47  ;;  %v324_v11 = vmul.f32 %v7373_v41, %v7373_v41 }
 0x197   : > { %v2705_v14 = vadd.f32 %v2625_v57, %v8247_v9  ;;  %v325_v58 = vmul.f32 %v7380_v46, %v7380_v46  ;;  %v2486_v53 = vrot.slane %v2406_v62, 7  ;;  %v8326_v17 = vmul.f32 0.0010283801, %v411_v34 }
 0x198   : > { %v2706_v4 = vadd.f32 %v2626_v49, %v8250_v40  ;;  %v2226_v59 = vsel %vm2176_vm6, %v2223_v37, %v2225_v20  ;;  %333 = vst.msk [vmem:[#allocation2 + $0x148] sm:$0xff] %vm262_vm0, %v324_v11  ;;  %v541_v9 = vmul.f32 0.007598758, %v411_v34  ;;  %v8331_v57 = vmul.f32 0.036000773, %v411_v34 }
 0x199   : > { %v2885_v30 = vadd.f32 %v2705_v14, %v8255_v19  ;;  %v2366_v33 = vadd.f32 %v2226_v59, %v2105_v50  ;;  %334 = vst.msk [vmem:[#allocation2 + $0x150] sm:$0xff] %vm262_vm0, %v325_v58  ;;  %v2487_v29 = vsel %vm2437_vm7, %v2484_v24, %v2486_v53  ;;  %v8334_v40 = vmul.f32 0.10936069, %v411_v34 }
 0x19a   : > { %v2886_v47 = vadd.f32 %v2797_v38, %v2706_v4  ;;  %v8336_v37 = vmul.f32 0.21300554, %v411_v34  ;;  %v682_v54 = vrot.slane %v541_v9, 1  ;;  %v1023_v19 = vrot.slane %v8331_v57, 2 }
 0x19b   : > { %v3185_v43 = vadd.f32 %v3045_v36, %v2885_v30  ;;  %v2627_v22 = vadd.f32 %v2487_v29, %v2366_v33  ;;  %v8341_v50 = vmul.f32 0.007598758, %v414_v56  ;;  %v8343_v24 = vmul.f32 0.0010283801, %v414_v56 }
 0x19c   : > { %v3186_v5 = vadd.f32 %v3047_v52, %v2886_v47  ;;  %v8345_v62 = vmul.f32 0.21300554, %v414_v56  ;;  %v8348_v14 = vmul.f32 0.10936069, %v414_v56  ;;  %v8350_v11 = vmul.f32 0.036000773, %v414_v56 }
 0x19d   : > { %v3323_v38 = vrot.slane %v3185_v43, 3  ;;  %v2707_v20 = vadd.f32 %v2667_v61, %v2627_v22  ;;  %v326_v59 = vmul.f32 %v7411_v3, %v7411_v3  ;;  %v8356_v61 = vld [vmem:[#allocation2 + $0x160] sm:$0xff]  ;;  %v327_v57 = vmul.f32 %v7418_v10, %v7418_v10 }
 0x19e   : > { %v3324_v34 = vrot.slane %v3186_v5, 3  ;;  %v9872_v63 = vrot.slane %v8334_v40, 3 }
 0x19f   : > { %v2887_v52 = vadd.f32 %v2796_v39, %v2707_v20  ;;  %v412_v30 = vld [vmem:[#allocation2 + $0x148] sm:$0xff]  ;;  %v8363_v39 = vmul.f32 0.0010283801, %v8356_v61  ;;  %335 = vst.msk [vmem:[#allocation2 + $0x168] sm:$0xff] %vm262_vm0, %v326_v59  ;;  %336 = vst.msk [vmem:[#allocation2 + $0x170] sm:$0xff] %vm262_vm0, %v327_v57  ;;  %v337_v20 = vmul.f32 %v7306_v7, %v7306_v7 }
 0x1a0   : > { %v3325_v53 = vsel %vm1313_vm3, %v3323_v38, %v3324_v34  ;;  %v413_v33 = vld [vmem:[#allocation2 + $0x150] sm:$0xff]  ;;  %v8368_v56 = vmul.f32 0.0010283801, %v412_v30  ;;  %v542_v5 = vmul.f32 0.007598758, %v412_v30 }
 0x1a1   : > { %v3416_v47 = vsel %vm262_vm0, %v3325_v53, 0  ;;  %v3187_v29 = vadd.f32 %v3046_v12, %v2887_v52  ;;  %v8370_v43 = vmul.f32 0.0010283801, %v413_v33  ;;  %v543_v38 = vmul.f32 0.007598758, %v413_v33  ;;  %346 = vst.msk [vmem:[#allocation2 + $0x188] sm:$0xff] %vm262_vm0, %v337_v20 }
 0x1a2   : > { %v8373_v22 = vand.u32 4294901760, %v3416_v47  ;;  %v8378_v53 = vmul.f32 0.036000773, %v412_v30  ;;  %v8380_v27 = vmul.f32 0.036000773, %v413_v33  ;;  %v683_v59 = vrot.slane %v542_v5, 1 }
 0x1a3   : > { %v3326_v9 = vrot.slane %v3187_v29, 3  ;;  %v685_v4 = vrot.slane %v543_v38, 1  ;;  %v8386_v58 = vmul.f32 0.10936069, %v412_v30  ;;  %v8392_v36 = vmul.f32 0.10936069, %v413_v33 }
 0x1a4   : > { %9868 = vst [vmem:[#allocation44_spill] sm:$0xff] %v8373_v22  ;;  %v8384_v52 = vsub.f32 %v3416_v47, %v8373_v22  ;;  %v1024_v7 = vrot.slane %v8378_v53, 2  ;;  %v1026_v29 = vrot.slane %v8380_v27, 2  ;;  %v684_v47 = vsel %vm631_vm1, %v682_v54, %v683_v59 }
 0x1a5   : > { %v3327_v57 = vsel %vm1313_vm3, %v3324_v34, %v3326_v9  ;;  %v8398_v5 = vsel %vm631_vm1, %v683_v59, %v685_v4  ;;  %v822_v20 = vadd.f32 %v684_v47, %v8326_v17  ;;  %v824_v9 = vadd.f32 %v685_v4, %v8370_v43 }
 0x1a6   : > { %9869 = vst [vmem:[#allocation45_spill] sm:$0xff] %v8384_v52  ;;  %v3709_v49 = vand.u32 4294901760, %v8384_v52  ;;  %v3418_v12 = vsel %vm262_vm0, %v3327_v57, 0  ;;  %v823_v34 = vadd.f32 %v8398_v5, %v8368_v56  ;;  %v1025_v55 = vsel %vm972_vm2, %v1023_v19, %v1024_v7 }
 0x1a7   : > { %v8400_v38 = vand.u32 4294901760, %v3418_v12  ;;  %v1027_v57 = vsel %vm972_vm2, %v1024_v7, %v1026_v29  ;;  %v1365_v54 = vrot.slane %v8386_v58, 3  ;;  %v1163_v22 = vadd.f32 %v1025_v55, %v822_v20 }
 0x1a8   : > { %6396 = vmatprep.mubr.f32.mxu0 %v3709_v49  ;;  %v3710_v35 = vsub.f32 %v8384_v52, %v3709_v49  ;;  %v1164_v42 = vadd.f32 %v1027_v57, %v823_v34  ;;  %v1165_v17 = vadd.f32 %v1026_v29, %v824_v9  ;;  %v1367_v2 = vrot.slane %v8392_v36, 3 }
 0x1a9   : > { %9870 = vst [vmem:[#allocation46_spill] sm:$0xff] %v8400_v38  ;;  %v8411_v59 = vsub.f32 %v3418_v12, %v8400_v38  ;;  %v1366_v28 = vsel %vm1313_vm3, %v9872_v63, %v1365_v54  ;;  %v1565_v49 = vmul.f32 0.21300554, %v412_v30  ;;  %v1566_v7 = vmul.f32 0.21300554, %v413_v33 }
 0x1aa   : > { %v3711_v47 = vand.u32 4294901760, %v3710_v35  ;;  %v1504_v52 = vadd.f32 %v1366_v28, %v1163_v22  ;;  %v1895_v6 = vmul.f32 0.26601171, %v412_v30  ;;  %v1368_v12 = vsel %vm1313_vm3, %v1365_v54, %v1367_v2 }
 0x1ab   : > { %9871 = vst [vmem:[#allocation47_spill] sm:$0xff] %v8411_v59  ;;  %v3719_v19 = vand.u32 4294901760, %v8411_v59  ;;  %v1506_v38 = vadd.f32 %v1367_v2, %v1165_v17  ;;  %v1706_v55 = vrot.slane %v1565_v49, 4  ;;  %v1896_v20 = vmul.f32 0.26601171, %v413_v33 }
 0x1ac   : > { %6204 = vmatprep.mubr.f32.mxu1 %v3711_v47  ;;  %v1505_v35 = vadd.f32 %v1368_v12, %v1164_v42  ;;  %v1708_v29 = vrot.slane %v1566_v7, 4  ;;  %v1986_v40 = vrot.slane %v1895_v6, 5  ;;  %v2227_v34 = vrot.slane %v1565_v49, 6 }
 0x1ad   : > { %6397 = vmatmul.mubr.f32.gmra.mrb[18].mxu0 %v3719_v19  ;;  %v9873_v63 = vrot.slane %v8336_v37, 4  ;;  %v1987_v57 = vrot.slane %v1896_v20, 5  ;;  %v2228_v32 = vrot.slane %v1566_v7, 6  ;;  %v2488_v28 = vrot.slane %v8386_v58, 7 }
 0x1ae   : > { %v1709_v30 = vsel %vm1654_vm4, %v1706_v55, %v1708_v29  ;;  %v2489_v2 = vrot.slane %v8392_v36, 7  ;;  %v9874_v33 = vrot.slane %v8341_v50, 1  ;;  %v3049_v17 = vrot.slane %v8370_v43, 2  ;;  %v416_v43 = vld [vmem:[#allocation2 + $0x168] sm:$0xff] }
 0x1af   : > { %v1707_v9 = vsel %vm1654_vm4, %v9873_v63, %v1706_v55  ;;  %v1846_v54 = vadd.f32 %v1709_v30, %v1505_v35  ;;  %v1988_v6 = vsel %vm1955_vm5, %v1986_v40, %v1987_v57  ;;  %v2229_v37 = vsel %vm2176_vm6, %v2227_v34, %v2228_v32 }
 0x1b0   : > { %v1845_v22 = vadd.f32 %v1707_v9, %v1504_v52  ;;  %v2799_v42 = vsel %vm631_vm1, %v685_v4, %v9874_v33  ;;  %v2490_v49 = vsel %vm2437_vm7, %v2488_v28, %v2489_v2  ;;  %v3720_v58 = vsub.f32 %v8411_v59, %v3719_v19 }
 0x1b1   : > { %v1847_v7 = vadd.f32 %v1708_v29, %v1506_v38  ;;  %v2107_v52 = vadd.f32 %v1988_v6, %v1846_v54  ;;  %v9875_v36 = vrot.slane %v8368_v56, 2  ;;  %v9876_v4 = vrot.slane %v8343_v24, 2 }
 0x1b2   : > { %v2106_v47 = vadd.f32 %v1986_v40, %v1845_v22  ;;  %v9877_v20 = vrot.slane %v8345_v62, 6  ;;  %v8442_v40 = vld [vmem:[#allocation2 + $0x170] sm:$0xff]  ;;  %v3721_v9 = vand.u32 4294901760, %v3720_v58  ;;  %v9878_v38 = vrot.slane %v8348_v14, 7 }
 0x1b3   : > { %v3050_v12 = vsel %vm972_vm2, %v9875_v36, %v3049_v17  ;;  %v3052_v55 = vsel %vm972_vm2, %v3049_v17, %v9876_v4  ;;  %v2108_v19 = vadd.f32 %v1987_v57, %v1847_v7  ;;  %v2368_v29 = vadd.f32 %v2229_v37, %v2107_v52 }
 0x1b4   : > { %v2231_v35 = vsel %vm2176_vm6, %v2228_v32, %v9877_v20  ;;  %v2367_v63 = vadd.f32 %v2227_v34, %v2106_v47  ;;  %v2492_v56 = vsel %vm2437_vm7, %v2489_v2, %v9878_v38  ;;  %v8447_v30 = vmul.f32 0.0010283801, %v416_v43  ;;  %6205 = vmatmul.mubr.f32.gmra.mrb[18].mxu1 %v3721_v9 }
 0x1b5   : > { %v8450_v22 = vmul.f32 0.0010283801, %v8442_v40  ;;  %v544_v62 = vmul.f32 0.007598758, %v8356_v61  ;;  %v2369_v32 = vadd.f32 %v2231_v35, %v2108_v19  ;;  %v545_v54 = vmul.f32 0.007598758, %v416_v43 }
 0x1b6   : > { %v2628_v33 = vadd.f32 %v2488_v28, %v2367_v63  ;;  %v546_v34 = vmul.f32 0.007598758, %v8442_v40  ;;  %v2629_v6 = vadd.f32 %v2490_v49, %v2368_v29  ;;  %v885_v14 = vmul.f32 0.036000773, %v8356_v61 }
 0x1b7   : > { %v687_v57 = vrot.slane %v544_v62, 1  ;;  %v8455_v17 = vmul.f32 0.036000773, %v416_v43  ;;  %v2630_v37 = vadd.f32 %v2492_v56, %v2369_v32  ;;  %v688_v47 = vrot.slane %v545_v54, 1 }
 0x1b8   : > { %v2708_v2 = vadd.f32 %v2628_v33, %v8378_v53  ;;  %v8458_v58 = vrot.slane %v546_v34, 1  ;;  %v2709_v7 = vadd.f32 %v2629_v6, %v8380_v27  ;;  %v8462_v28 = vmul.f32 0.036000773, %v8442_v40 }
 0x1b9   : > { %v1028_v52 = vrot.slane %v885_v14, 2  ;;  %v1029_v36 = vrot.slane %v8455_v17, 2  ;;  %v2710_v4 = vadd.f32 %v8350_v11, %v2630_v37  ;;  %v689_v20 = vsel %vm631_vm1, %v687_v57, %v688_v47 }
 0x1ba   : > { %v2888_v49 = vadd.f32 %v2708_v2, %v8398_v5  ;;  %v8470_v53 = vsel %vm631_vm1, %v688_v47, %v8458_v58  ;;  %v2889_v35 = vadd.f32 %v2799_v42, %v2709_v7  ;;  %v825_v63 = vadd.f32 %v689_v20, %v8363_v39 }
 0x1bb   : > { %v826_v27 = vadd.f32 %v8470_v53, %v8447_v30  ;;  %v827_v9 = vadd.f32 %v8458_v58, %v8450_v22  ;;  %v9879_v5 = vrot.slane %v8341_v50, 1  ;;  %v1030_v11 = vsel %vm972_vm2, %v1028_v52, %v1029_v36 }
 0x1bc   : > { %v3188_v19 = vadd.f32 %v3050_v12, %v2888_v49  ;;  %v1031_v56 = vrot.slane %v8462_v28, 2  ;;  %v3189_v29 = vadd.f32 %v3052_v55, %v2889_v35  ;;  %v1166_v62 = vadd.f32 %v1030_v11, %v825_v63 }
 0x1bd   : > { %v2890_v38 = vadd.f32 %v9879_v5, %v2710_v4  ;;  %v1226_v42 = vmul.f32 0.10936069, %v8356_v61  ;;  %v8482_v33 = vmul.f32 0.10936069, %v416_v43  ;;  %v9880_v32 = vrot.slane %v8343_v24, 2 }
 0x1be   : > { %v3328_v39 = vrot.slane %v3188_v19, 3  ;;  %v1032_v34 = vsel %vm972_vm2, %v1029_v36, %v1031_v56  ;;  %v1168_v12 = vadd.f32 %v1031_v56, %v827_v9  ;;  %v3329_v6 = vrot.slane %v3189_v29, 3 }
 0x1bf   : > { %v3190_v54 = vadd.f32 %v9880_v32, %v2890_v38  ;;  %v1167_v50 = vadd.f32 %v1032_v34, %v826_v27  ;;  %v8488_v57 = vmul.f32 0.10936069, %v8442_v40  ;;  %v1369_v14 = vrot.slane %v1226_v42, 3 }
 0x1c0   : > { %v1370_v55 = vrot.slane %v8482_v33, 3  ;;  %v1567_v37 = vmul.f32 0.21300554, %v8356_v61  ;;  %v1568_v47 = vmul.f32 0.21300554, %v416_v43  ;;  %v3330_v7 = vsel %vm1313_vm3, %v3328_v39, %v3329_v6 }
 0x1c1   : > { %v3331_v2 = vrot.slane %v3190_v54, 3  ;;  %v1372_v24 = vrot.slane %v8488_v57, 3  ;;  %v8495_v52 = vmul.f32 0.21300554, %v8442_v40  ;;  %v1897_v36 = vmul.f32 0.26601171, %v416_v43 }
 0x1c2   : > { %v3420_v49 = vsel %vm262_vm0, %v3330_v7, 0  ;;  %v1371_v20 = vsel %vm1313_vm3, %v1369_v14, %v1370_v55  ;;  %v1710_v35 = vrot.slane %v1567_v37, 4  ;;  %v1711_v11 = vrot.slane %v1568_v47, 4  ;;  %v418_v7 = vld [vmem:[#allocation2 + $0x178] sm:$0xff] }
 0x1c3   : > { %v3332_v4 = vsel %vm1313_vm3, %v3329_v6, %v3331_v2  ;;  %v8500_v63 = vand.u32 4294901760, %v3420_v49  ;;  %v1373_v27 = vsel %vm1313_vm3, %v1370_v55, %v1372_v24  ;;  %v1507_v9 = vadd.f32 %v1371_v20, %v1166_v62 }
 0x1c4   : > { %v3422_v61 = vsel %vm262_vm0, %v3332_v4, 0  ;;  %v1508_v5 = vadd.f32 %v1373_v27, %v1167_v50  ;;  %v1509_v38 = vadd.f32 %v1372_v24, %v1168_v12  ;;  %v1713_v56 = vrot.slane %v8495_v52, 4 }
 0x1c5   : > { %v8504_v19 = vand.u32 4294901760, %v3422_v61  ;;  %v8507_v43 = vsub.f32 %v3420_v49, %v8500_v63  ;;  %v1898_v29 = vmul.f32 0.26601171, %v8442_v40  ;;  %v1989_v42 = vrot.slane %v1897_v36, 5 }
 0x1c6   : > { %v1712_v32 = vsel %vm1654_vm4, %v1710_v35, %v1711_v11  ;;  %v2232_v54 = vrot.slane %v1568_v47, 6  ;;  %v2233_v62 = vrot.slane %v8495_v52, 6  ;;  %v1714_v12 = vsel %vm1654_vm4, %v1711_v11, %v1713_v56 }
 0x1c7   : > { %9881 = vst [vmem:[#allocation48_spill] sm:$0xff] %v8507_v43  ;;  %v8512_v39 = vsub.f32 %v3422_v61, %v8504_v19  ;;  %v3729_v34 = vand.u32 4294901760, %v8507_v43  ;;  %v1848_v6 = vadd.f32 %v1712_v32, %v1507_v9  ;;  %v1990_v50 = vrot.slane %v1898_v29, 5 }
 0x1c8   : > { %v1849_v2 = vadd.f32 %v1714_v12, %v1508_v5  ;;  %v2234_v40 = vsel %vm2176_vm6, %v2232_v54, %v2233_v62  ;;  %v2493_v55 = vrot.slane %v8482_v33, 7  ;;  %v2494_v52 = vrot.slane %v8488_v57, 7 }
 0x1c9   : > { %9882 = vst [vmem:[#allocation49_spill] sm:$0xff] %v8512_v39  ;;  %v3739_v14 = vand.u32 4294901760, %v8512_v39  ;;  %6399 = vmatprep.mubr.f32.mxu0 %v3729_v34  ;;  %v3730_v37 = vsub.f32 %v8507_v43, %v3729_v34  ;;  %v1991_v47 = vsel %vm1955_vm5, %v1989_v42, %v1990_v50  ;;  %v2109_v24 = vadd.f32 %v1989_v42, %v1848_v6 }
 0x1ca   : > { %v2110_v36 = vadd.f32 %v1991_v47, %v1849_v2  ;;  %v2749_v49 = vmul.f32 0.007598758, %v418_v7  ;;  %v8524_v4 = vmul.f32 0.0010283801, %v418_v7  ;;  %v3053_v20 = vrot.slane %v8447_v30, 2  ;;  %v419_v47 = vld [vmem:[#allocation2 + $0x180] sm:$0xff] }
 0x1cb   : > { %6400 = vmatmul.mubr.f32.gmra.mrb[20].mxu0 %v3739_v14  ;;  %v3731_v35 = vand.u32 4294901760, %v3730_v37  ;;  %v2370_v61 = vadd.f32 %v2232_v54, %v2109_v24  ;;  %v2495_v33 = vsel %vm2437_vm7, %v2493_v55, %v2494_v52  ;;  %v3054_v27 = vrot.slane %v8450_v22, 2 }
 0x1cc   : > { %v2371_v9 = vadd.f32 %v2234_v40, %v2110_v36  ;;  %v2800_v5 = vrot.slane %v2749_v49, 1  ;;  %v3056_v11 = vrot.slane %v8524_v4, 2  ;;  %v3740_v29 = vsub.f32 %v8512_v39, %v3739_v14  ;;  %v420_v14 = vld [vmem:[#allocation2 + $0x188] sm:$0xff] }
 0x1cd   : > { %6207 = vmatprep.mubr.f32.mxu1 %v3731_v35  ;;  %v2631_v57 = vadd.f32 %v2493_v55, %v2370_v61  ;;  %v3055_v42 = vsel %vm972_vm2, %v3053_v20, %v3054_v27  ;;  %v1850_v32 = vadd.f32 %v1713_v56, %v1509_v38  ;;  %v2147_v34 = vmul.f32 0.21300554, %v418_v7 }
 0x1ce   : > { %v2632_v12 = vadd.f32 %v2495_v33, %v2371_v9  ;;  %v2801_v30 = vsel %vm631_vm1, %v8458_v58, %v2800_v5  ;;  %v3057_v54 = vsel %vm972_vm2, %v3054_v27, %v3056_v11  ;;  %v3741_v6 = vand.u32 4294901760, %v3740_v29 }
 0x1cf   : > { %v2711_v22 = vadd.f32 %v2631_v57, %v8455_v17  ;;  %v2111_v2 = vadd.f32 %v1990_v50, %v1850_v32  ;;  %v2235_v40 = vrot.slane %v2147_v34, 6  ;;  %v2408_v37 = vmul.f32 0.10936069, %v418_v7 }
 0x1d0   : > { %v2712_v55 = vadd.f32 %v2632_v12, %v8462_v28  ;;  %6208 = vmatmul.mubr.f32.gmra.mrb[20].mxu1 %v3741_v6  ;;  %v2669_v24 = vmul.f32 0.036000773, %v418_v7  ;;  %v338_v38 = vmul.f32 %v7309_v8, %v7309_v8  ;;  %v487_v56 = vmul.f32 0.0010283801, %v419_v47 }
 0x1d1   : > { %v2891_v58 = vadd.f32 %v2711_v22, %v8470_v53  ;;  %v2236_v36 = vsel %vm2176_vm6, %v2233_v62, %v2235_v40  ;;  %v2496_v49 = vrot.slane %v2408_v37, 7  ;;  %v8541_v4 = vmul.f32 0.0010283801, %v420_v14 }
 0x1d2   : > { %v2892_v17 = vadd.f32 %v2801_v30, %v2712_v55  ;;  %v2372_v50 = vadd.f32 %v2236_v36, %v2111_v2  ;;  %347 = vst.msk [vmem:[#allocation2 + $0x190] sm:$0xff] %vm262_vm0, %v338_v38  ;;  %v547_v20 = vmul.f32 0.007598758, %v419_v47  ;;  %v548_v35 = vmul.f32 0.007598758, %v420_v14 }
 0x1d3   : > { %v3191_v28 = vadd.f32 %v3055_v42, %v2891_v58  ;;  %v2497_v7 = vsel %vm2437_vm7, %v2494_v52, %v2496_v49  ;;  %v888_v61 = vmul.f32 0.036000773, %v419_v47  ;;  %v8545_v33 = vmul.f32 0.036000773, %v420_v14 }
 0x1d4   : > { %v3192_v8 = vadd.f32 %v3057_v54, %v2892_v17  ;;  %v2633_v27 = vadd.f32 %v2497_v7, %v2372_v50  ;;  %v692_v53 = vrot.slane %v547_v20, 1  ;;  %v693_v9 = vrot.slane %v548_v35, 1 }
 0x1d5   : > { %v3333_v62 = vrot.slane %v3191_v28, 3  ;;  %v1033_v29 = vrot.slane %v888_v61, 2  ;;  %v1034_v57 = vrot.slane %v8545_v33, 2  ;;  %v1229_v32 = vmul.f32 0.10936069, %v419_v47 }
 0x1d6   : > { %v3334_v34 = vrot.slane %v3192_v8, 3  ;;  %v2713_v12 = vadd.f32 %v2669_v24, %v2633_v27  ;;  %v694_v30 = vsel %vm631_vm1, %v692_v53, %v693_v9  ;;  %v8549_v6 = vmul.f32 0.10936069, %v420_v14 }
 0x1d7   : > { %v828_v42 = vadd.f32 %v694_v30, %v487_v56  ;;  %v1035_v52 = vsel %vm972_vm2, %v1033_v29, %v1034_v57  ;;  %v1374_v22 = vrot.slane %v1229_v32, 3  ;;  %v1570_v2 = vmul.f32 0.21300554, %v419_v47 }
 0x1d8   : > { %v3335_v54 = vsel %vm1313_vm3, %v3333_v62, %v3334_v34  ;;  %v2893_v40 = vadd.f32 %v2800_v5, %v2713_v12  ;;  %v1375_v37 = vrot.slane %v8549_v6, 3  ;;  %v1571_v55 = vmul.f32 0.21300554, %v420_v14 }
 0x1d9   : > { %v3424_v38 = vsel %vm262_vm0, %v3335_v54, 0  ;;  %v421_v58 = vld [vmem:[#allocation2 + $0x190] sm:$0xff]  ;;  %v1169_v36 = vadd.f32 %v1035_v52, %v828_v42  ;;  %v1715_v24 = vrot.slane %v1570_v2, 4  ;;  %v1899_v49 = vmul.f32 0.26601171, %v420_v14 }
 0x1da   : > { %v8555_v17 = vand.u32 4294901760, %v3424_v38  ;;  %v3193_v50 = vadd.f32 %v3056_v11, %v2893_v40  ;;  %v8557_v56 = vmul.f32 0.0010283801, %v421_v58  ;;  %v549_v20 = vmul.f32 0.007598758, %v421_v58 }
 0x1db   : > { %v8559_v35 = vmul.f32 0.036000773, %v421_v58  ;;  %v8561_v47 = vmul.f32 0.10936069, %v421_v58  ;;  %v1376_v5 = vsel %vm1313_vm3, %v1374_v22, %v1375_v37  ;;  %v8564_v28 = vmul.f32 0.21300554, %v421_v58 }
 0x1dc   : > { %9883 = vst [vmem:[#allocation50_spill] sm:$0xff] %v8555_v17  ;;  %v8567_v7 = vsub.f32 %v3424_v38, %v8555_v17  ;;  %v3336_v61 = vrot.slane %v3193_v50, 3  ;;  %v695_v8 = vrot.slane %v549_v20, 1  ;;  %v1510_v14 = vadd.f32 %v1376_v5, %v1169_v36 }
 0x1dd   : > { %v1036_v27 = vrot.slane %v8559_v35, 2  ;;  %v1377_v11 = vrot.slane %v8561_v47, 3  ;;  %v1716_v53 = vrot.slane %v1571_v55, 4  ;;  %v1718_v62 = vrot.slane %v8564_v28, 4 }
 0x1de   : > { %9884 = vst [vmem:[#allocation51_spill] sm:$0xff] %v8567_v7  ;;  %v3749_v29 = vand.u32 4294901760, %v8567_v7  ;;  %v3337_v32 = vsel %vm1313_vm3, %v3334_v34, %v3336_v61  ;;  %v696_v12 = vsel %vm631_vm1, %v693_v9, %v695_v8  ;;  %v830_v30 = vadd.f32 %v695_v8, %v8557_v56 }
 0x1df   : > { %v3426_v42 = vsel %vm262_vm0, %v3337_v32, 0  ;;  %v829_v52 = vadd.f32 %v696_v12, %v8541_v4  ;;  %v1037_v22 = vsel %vm972_vm2, %v1034_v57, %v1036_v27  ;;  %v1378_v2 = vsel %vm1313_vm3, %v1375_v37, %v1377_v11 }
 0x1e0   : > { %6402 = vmatprep.mubr.f32.mxu0 %v3749_v29  ;;  %v8580_v54 = vand.u32 4294901760, %v3426_v42  ;;  %v3750_v40 = vsub.f32 %v8567_v7, %v3749_v29  ;;  %v1171_v38 = vadd.f32 %v1036_v27, %v830_v30  ;;  %v1717_v34 = vsel %vm1654_vm4, %v1715_v24, %v1716_v53  ;;  %v422_v24 = vld [vmem:[#allocation2 + $0x198] sm:$0xff] }
 0x1e1   : > { %v1170_v36 = vadd.f32 %v1037_v22, %v829_v52  ;;  %v1719_v9 = vsel %vm1654_vm4, %v1716_v53, %v1718_v62  ;;  %v1851_v50 = vadd.f32 %v1717_v34, %v1510_v14  ;;  %v1900_v20 = vmul.f32 0.26601171, %v421_v58 }
 0x1e2   : > { %9885 = vst [vmem:[#allocation52_spill] sm:$0xff] %v8580_v54  ;;  %v8586_v5 = vsub.f32 %v3426_v42, %v8580_v54  ;;  %v3751_v61 = vand.u32 4294901760, %v3750_v40  ;;  %v1512_v57 = vadd.f32 %v1377_v11, %v1171_v38  ;;  %v1992_v32 = vrot.slane %v1899_v49, 5 }
 0x1e3   : > { %v1511_v37 = vadd.f32 %v1378_v2, %v1170_v36  ;;  %v1993_v39 = vrot.slane %v1900_v20, 5  ;;  %v2237_v43 = vrot.slane %v1571_v55, 6  ;;  %v2238_v59 = vrot.slane %v8564_v28, 6 }
 0x1e4   : > { %9886 = vst [vmem:[#allocation53_spill] sm:$0xff] %v8586_v5  ;;  %v3759_v27 = vand.u32 4294901760, %v8586_v5  ;;  %6210 = vmatprep.mubr.f32.mxu1 %v3751_v61  ;;  %v2112_v29 = vadd.f32 %v1992_v32, %v1851_v50  ;;  %v2498_v53 = vrot.slane %v8549_v6, 7  ;;  %v2499_v58 = vrot.slane %v8561_v47, 7 }
 0x1e5   : > { %v1852_v14 = vadd.f32 %v1719_v9, %v1511_v37  ;;  %v1994_v30 = vsel %vm1955_vm5, %v1992_v32, %v1993_v39  ;;  %v2239_v11 = vsel %vm2176_vm6, %v2237_v43, %v2238_v59  ;;  %v8594_v49 = vmul.f32 0.007598758, %v422_v24  ;;  %v423_v37 = vld [vmem:[#allocation2 + $0x1a0] sm:$0xff] }
 0x1e6   : > { %6403 = vmatmul.mubr.f32.gmra.mrb[22].mxu0 %v3759_v27  ;;  %v2373_v55 = vadd.f32 %v2237_v43, %v2112_v29  ;;  %v2500_v28 = vsel %vm2437_vm7, %v2498_v53, %v2499_v58  ;;  %v8597_v42 = vmul.f32 0.0010283801, %v422_v24  ;;  %v3058_v52 = vrot.slane %v8541_v4, 2 }
 0x1e7   : > { %v2113_v22 = vadd.f32 %v1994_v30, %v1852_v14  ;;  %v2802_v6 = vrot.slane %v8594_v49, 1  ;;  %v3059_v47 = vrot.slane %v8557_v56, 2  ;;  %v3760_v2 = vsub.f32 %v8586_v5, %v3759_v27  ;;  %v426_v49 = vld [vmem:[#allocation2 + $0x1b8] sm:$0xff] }
 0x1e8   : > { %v2634_v40 = vadd.f32 %v2498_v53, %v2373_v55  ;;  %v3061_v38 = vrot.slane %v8597_v42, 2  ;;  %v1853_v34 = vadd.f32 %v1718_v62, %v1512_v57  ;;  %v2148_v36 = vmul.f32 0.21300554, %v422_v24 }
 0x1e9   : > { %v2374_v9 = vadd.f32 %v2239_v11, %v2113_v22  ;;  %v2803_v43 = vsel %vm631_vm1, %v695_v8, %v2802_v6  ;;  %v3060_v50 = vsel %vm972_vm2, %v3058_v52, %v3059_v47  ;;  %v3761_v20 = vand.u32 4294901760, %v3760_v2 }
 0x1ea   : > { %v2714_v4 = vadd.f32 %v2634_v40, %v8545_v33  ;;  %v3062_v61 = vsel %vm972_vm2, %v3059_v47, %v3061_v38  ;;  %v2114_v56 = vadd.f32 %v1993_v39, %v1853_v34  ;;  %v2240_v32 = vrot.slane %v2148_v36, 6 }
 0x1eb   : > { %v2635_v27 = vadd.f32 %v2500_v28, %v2374_v9  ;;  %6211 = vmatmul.mubr.f32.gmra.mrb[22].mxu1 %v3761_v20  ;;  %v2409_v29 = vmul.f32 0.10936069, %v422_v24  ;;  %v2670_v62 = vmul.f32 0.036000773, %v422_v24  ;;  %v339_v57 = vmul.f32 %v7430_v48, %v7430_v48 }
 0x1ec   : > { %v2894_v8 = vadd.f32 %v2714_v4, %v696_v12  ;;  %v2241_v53 = vsel %vm2176_vm6, %v2238_v59, %v2240_v32  ;;  %v340_v33 = vmul.f32 %v7433_v51, %v7433_v51  ;;  %v8615_v14 = vmul.f32 0.0010283801, %v423_v37 }
 0x1ed   : > { %v2715_v30 = vadd.f32 %v2635_v27, %v8559_v35  ;;  %v2375_v39 = vadd.f32 %v2241_v53, %v2114_v56  ;;  %v2501_v11 = vrot.slane %v2409_v29, 7  ;;  %348 = vst.msk [vmem:[#allocation2 + $0x1a8] sm:$0xff] %vm262_vm0, %v339_v57  ;;  %v550_v55 = vmul.f32 0.007598758, %v423_v37  ;;  %v8643_v57 = vld [vmem:[#allocation2 + $0x1c0] sm:$0xff] }
 0x1ee   : > { %v3194_v24 = vadd.f32 %v3060_v50, %v2894_v8  ;;  %349 = vst.msk [vmem:[#allocation2 + $0x1b0] sm:$0xff] %vm262_vm0, %v340_v33  ;;  %v891_v28 = vmul.f32 0.036000773, %v423_v37  ;;  %v8620_v12 = vmul.f32 0.10936069, %v423_v37  ;;  %v341_v29 = vmul.f32 %v7440_v21, %v7440_v21 }
 0x1ef   : > { %v8622_v59 = vmul.f32 0.21300554, %v423_v37  ;;  %v2895_v52 = vadd.f32 %v2803_v43, %v2715_v30  ;;  %v2502_v22 = vsel %vm2437_vm7, %v2499_v58, %v2501_v11  ;;  %v697_v47 = vrot.slane %v550_v55, 1 }
 0x1f0   : > { %v8625_v2 = vmul.f32 0.007598758, %v426_v49  ;;  %v3338_v35 = vrot.slane %v3194_v24, 3  ;;  %v2636_v40 = vadd.f32 %v2502_v22, %v2375_v39  ;;  %v1038_v34 = vrot.slane %v891_v28, 2  ;;  %350 = vst.msk [vmem:[#allocation2 + $0x1c8] sm:$0xff] %vm262_vm0, %v341_v29 }
 0x1f1   : > { %v3195_v9 = vadd.f32 %v3062_v61, %v2895_v52  ;;  %v8630_v4 = vmul.f32 0.0010283801, %v426_v49  ;;  %v8632_v32 = vmul.f32 0.21300554, %v426_v49  ;;  %v8634_v43 = vmul.f32 0.10936069, %v426_v49 }
 0x1f2   : > { %v2716_v56 = vadd.f32 %v2670_v62, %v2636_v40  ;;  %v8636_v58 = vmul.f32 0.036000773, %v426_v49  ;;  %v342_v61 = vmul.f32 %v7444_v1, %v7444_v1  ;;  %v8648_v30 = vmul.f32 0.0010283801, %v8643_v57 }
 0x1f3   : > { %v3339_v37 = vrot.slane %v3195_v9, 3  ;;  %v9891_v17 = vrot.slane %v8620_v12, 3 }
 0x1f4   : > { %v2896_v8 = vadd.f32 %v2802_v6, %v2716_v56  ;;  %v424_v53 = vld [vmem:[#allocation2 + $0x1a8] sm:$0xff]  ;;  %351 = vst.msk [vmem:[#allocation2 + $0x1d0] sm:$0xff] %vm262_vm0, %v342_v61  ;;  %v343_v6 = vmul.f32 %v7558_v13, %v7558_v13 }
 0x1f5   : > { %v3340_v39 = vsel %vm1313_vm3, %v3338_v35, %v3339_v37  ;;  %v425_v11 = vld [vmem:[#allocation2 + $0x1b0] sm:$0xff]  ;;  %v8651_v49 = vmul.f32 0.0010283801, %v424_v53  ;;  %v551_v55 = vmul.f32 0.007598758, %v424_v53 }
 0x1f6   : > { %v3428_v24 = vsel %vm262_vm0, %v3340_v39, 0  ;;  %v3196_v28 = vadd.f32 %v3061_v38, %v2896_v8  ;;  %v8660_v52 = vmul.f32 0.0010283801, %v425_v11  ;;  %v552_v22 = vmul.f32 0.007598758, %v425_v11  ;;  %352 = vst.msk [vmem:[#allocation2 + $0x1e8] sm:$0xff] %vm262_vm0, %v343_v6 }
 0x1f7   : > { %v8662_v35 = vand.u32 4294901760, %v3428_v24  ;;  %v698_v40 = vrot.slane %v551_v55, 1  ;;  %v8664_v9 = vmul.f32 0.036000773, %v424_v53  ;;  %v8666_v56 = vmul.f32 0.036000773, %v425_v11 }
 0x1f8   : > { %v3341_v29 = vrot.slane %v3196_v28, 3  ;;  %v700_v61 = vrot.slane %v552_v22, 1  ;;  %v8669_v27 = vmul.f32 0.10936069, %v424_v53  ;;  %v1234_v39 = vmul.f32 0.10936069, %v425_v11 }
 0x1f9   : > { %9887 = vst [vmem:[#allocation54_spill] sm:$0xff] %v8662_v35  ;;  %v8672_v42 = vsub.f32 %v3428_v24, %v8662_v35  ;;  %v699_v38 = vsel %vm631_vm1, %v697_v47, %v698_v40  ;;  %v1039_v8 = vrot.slane %v8664_v9, 2  ;;  %v1041_v55 = vrot.slane %v8666_v56, 2 }
 0x1fa   : > { %v3342_v33 = vsel %vm1313_vm3, %v3339_v37, %v3341_v29  ;;  %v8679_v62 = vsel %vm631_vm1, %v698_v40, %v700_v61  ;;  %v831_v6 = vadd.f32 %v699_v38, %v8615_v14  ;;  %v833_v28 = vadd.f32 %v700_v61, %v8660_v52 }
 0x1fb   : > { %9888 = vst [vmem:[#allocation55_spill] sm:$0xff] %v8672_v42  ;;  %v3769_v22 = vand.u32 4294901760, %v8672_v42  ;;  %v3430_v24 = vsel %vm262_vm0, %v3342_v33, 0  ;;  %v832_v47 = vadd.f32 %v8679_v62, %v8651_v49  ;;  %v1040_v20 = vsel %vm972_vm2, %v1038_v34, %v1039_v8 }
 0x1fc   : > { %v8688_v50 = vand.u32 4294901760, %v3430_v24  ;;  %v1042_v37 = vsel %vm972_vm2, %v1039_v8, %v1041_v55  ;;  %v1172_v29 = vadd.f32 %v1040_v20, %v831_v6  ;;  %v1174_v40 = vadd.f32 %v1041_v55, %v833_v28 }
 0x1fd   : > { %6405 = vmatprep.mubr.f32.mxu0 %v3769_v22  ;;  %v3770_v14 = vsub.f32 %v8672_v42, %v3769_v22  ;;  %v1173_v38 = vadd.f32 %v1042_v37, %v832_v47  ;;  %v1380_v36 = vrot.slane %v8669_v27, 3  ;;  %v1382_v5 = vrot.slane %v1234_v39, 3 }
 0x1fe   : > { %9889 = vst [vmem:[#allocation56_spill] sm:$0xff] %v8688_v50  ;;  %v8694_v33 = vsub.f32 %v3430_v24, %v8688_v50  ;;  %v1574_v7 = vmul.f32 0.21300554, %v424_v53  ;;  %v1575_v35 = vmul.f32 0.21300554, %v425_v11 }
 0x1ff   : > { %v1901_v54 = vmul.f32 0.26601171, %v424_v53  ;;  %v3771_v34 = vand.u32 4294901760, %v3770_v14  ;;  %v1381_v8 = vsel %vm1313_vm3, %v9891_v17, %v1380_v36  ;;  %v1383_v20 = vsel %vm1313_vm3, %v1380_v36, %v1382_v5 }
 0x200   : > { %9890 = vst [vmem:[#allocation57_spill] sm:$0xff] %v8694_v33  ;;  %v1515_v55 = vadd.f32 %v1382_v5, %v1174_v40  ;;  %v3779_v6 = vand.u32 4294901760, %v8694_v33  ;;  %v1513_v28 = vadd.f32 %v1381_v8, %v1172_v29  ;;  %v1514_v22 = vadd.f32 %v1383_v20, %v1173_v38 }
 0x201   : > { %v1721_v47 = vrot.slane %v1574_v7, 4  ;;  %6213 = vmatprep.mubr.f32.mxu1 %v3771_v34  ;;  %v1723_v37 = vrot.slane %v1575_v35, 4  ;;  %v1902_v24 = vmul.f32 0.26601171, %v425_v11  ;;  %v1995_v42 = vrot.slane %v1901_v54, 5 }
 0x202   : > { %v2242_v50 = vrot.slane %v1574_v7, 6  ;;  %6406 = vmatmul.mubr.f32.gmra.mrb[24].mxu0 %v3779_v6  ;;  %v9892_v53 = vrot.slane %v8622_v59, 4  ;;  %v2243_v14 = vrot.slane %v1575_v35, 6  ;;  %v2503_v17 = vrot.slane %v8669_v27, 7 }
 0x203   : > { %v2504_v36 = vrot.slane %v1234_v39, 7  ;;  %v1724_v5 = vsel %vm1654_vm4, %v1721_v47, %v1723_v37  ;;  %v1996_v29 = vrot.slane %v1902_v24, 5  ;;  %v9893_v38 = vrot.slane %v8625_v2, 1 }
 0x204   : > { %v1722_v12 = vsel %vm1654_vm4, %v9892_v53, %v1721_v47  ;;  %v1855_v11 = vadd.f32 %v1724_v5, %v1514_v22  ;;  %v2244_v7 = vsel %vm2176_vm6, %v2242_v50, %v2243_v14  ;;  %v3063_v59 = vrot.slane %v8651_v49, 2  ;;  %v8721_v53 = vld [vmem:[#allocation2 + $0x1c8] sm:$0xff]  ;;  %v8723_v49 = vld [vmem:[#allocation2 + $0x1d0] sm:$0xff] }
 0x205   : > { %v1854_v40 = vadd.f32 %v1722_v12, %v1513_v28  ;;  %v2805_v34 = vsel %vm631_vm1, %v700_v61, %v9893_v38  ;;  %v2505_v54 = vsel %vm2437_vm7, %v2503_v17, %v2504_v36  ;;  %v1997_v35 = vsel %vm1955_vm5, %v1995_v42, %v1996_v29 }
 0x206   : > { %v3064_v27 = vrot.slane %v8660_v52, 2  ;;  %v3780_v39 = vsub.f32 %v8694_v33, %v3779_v6  ;;  %v2116_v20 = vadd.f32 %v1997_v35, %v1855_v11  ;;  %v1856_v28 = vadd.f32 %v1723_v37, %v1515_v55 }
 0x207   : > { %v2115_v8 = vadd.f32 %v1995_v42, %v1854_v40  ;;  %v9894_v47 = vrot.slane %v8632_v32, 6  ;;  %v9895_v22 = vrot.slane %v8634_v43, 7  ;;  %v9896_v52 = vrot.slane %v8630_v4, 2 }
 0x208   : > { %v3065_v42 = vsel %vm972_vm2, %v3063_v59, %v3064_v27  ;;  %v3781_v55 = vand.u32 4294901760, %v3780_v39  ;;  %v2377_v37 = vadd.f32 %v2244_v7, %v2116_v20  ;;  %v2117_v32 = vadd.f32 %v1996_v29, %v1856_v28 }
 0x209   : > { %v2246_v61 = vsel %vm2176_vm6, %v2243_v14, %v9894_v47  ;;  %v2507_v24 = vsel %vm2437_vm7, %v2504_v36, %v9895_v22  ;;  %v2376_v12 = vadd.f32 %v2242_v50, %v2115_v8  ;;  %v3067_v6 = vsel %vm972_vm2, %v3064_v27, %v9896_v52 }
 0x20a   : > { %v8730_v14 = vmul.f32 0.0010283801, %v8721_v53  ;;  %v8733_v43 = vmul.f32 0.0010283801, %v8723_v49  ;;  %6214 = vmatmul.mubr.f32.gmra.mrb[24].mxu1 %v3781_v55  ;;  %v553_v5 = vmul.f32 0.007598758, %v8643_v57  ;;  %v2638_v38 = vadd.f32 %v2505_v54, %v2377_v37 }
 0x20b   : > { %v2637_v36 = vadd.f32 %v2503_v17, %v2376_v12  ;;  %v554_v50 = vmul.f32 0.007598758, %v8721_v53  ;;  %v555_v40 = vmul.f32 0.007598758, %v8723_v49  ;;  %v2378_v11 = vadd.f32 %v2246_v61, %v2117_v32 }
 0x20c   : > { %v894_v59 = vmul.f32 0.036000773, %v8643_v57  ;;  %v8740_v29 = vmul.f32 0.036000773, %v8721_v53  ;;  %v702_v35 = vrot.slane %v553_v5, 1  ;;  %v2718_v17 = vadd.f32 %v2638_v38, %v8666_v56 }
 0x20d   : > { %v2717_v7 = vadd.f32 %v2637_v36, %v8664_v9  ;;  %v703_v8 = vrot.slane %v554_v50, 1  ;;  %v8743_v27 = vrot.slane %v555_v40, 1  ;;  %v2639_v39 = vadd.f32 %v2507_v24, %v2378_v11 }
 0x20e   : > { %v8747_v20 = vmul.f32 0.036000773, %v8723_v49  ;;  %v1043_v28 = vrot.slane %v894_v59, 2  ;;  %v2898_v22 = vadd.f32 %v2805_v34, %v2718_v17  ;;  %v1235_v37 = vmul.f32 0.10936069, %v8643_v57 }
 0x20f   : > { %v2897_v54 = vadd.f32 %v2717_v7, %v8679_v62  ;;  %v704_v47 = vsel %vm631_vm1, %v702_v35, %v703_v8  ;;  %v8753_v61 = vsel %vm631_vm1, %v703_v8, %v8743_v27  ;;  %v836_v9 = vadd.f32 %v8743_v27, %v8733_v43 }
 0x210   : > { %v2719_v12 = vadd.f32 %v8636_v58, %v2639_v39  ;;  %v834_v56 = vadd.f32 %v704_v47, %v8648_v30  ;;  %v835_v24 = vadd.f32 %v8753_v61, %v8730_v14  ;;  %v1044_v62 = vrot.slane %v8740_v29, 2 }
 0x211   : > { %v3197_v52 = vadd.f32 %v3065_v42, %v2897_v54  ;;  %v1046_v55 = vrot.slane %v8747_v20, 2  ;;  %v3198_v32 = vadd.f32 %v3067_v6, %v2898_v22  ;;  %v9897_v36 = vrot.slane %v8625_v2, 1 }
 0x212   : > { %v8767_v34 = vmul.f32 0.10936069, %v8721_v53  ;;  %v8770_v58 = vmul.f32 0.10936069, %v8723_v49  ;;  %v1045_v50 = vsel %vm972_vm2, %v1043_v28, %v1044_v62  ;;  %v9898_v11 = vrot.slane %v8630_v4, 2 }
 0x213   : > { %v2899_v5 = vadd.f32 %v9897_v36, %v2719_v12  ;;  %v3343_v30 = vrot.slane %v3197_v52, 3  ;;  %v1047_v42 = vsel %vm972_vm2, %v1044_v62, %v1046_v55  ;;  %v1177_v40 = vadd.f32 %v1046_v55, %v836_v9 }
 0x214   : > { %v3344_v38 = vrot.slane %v3198_v32, 3  ;;  %v1175_v6 = vadd.f32 %v1045_v50, %v834_v56  ;;  %v1176_v7 = vadd.f32 %v1047_v42, %v835_v24  ;;  %v1384_v2 = vrot.slane %v1235_v37, 3 }
 0x215   : > { %v3199_v59 = vadd.f32 %v9898_v11, %v2899_v5  ;;  %v1385_v35 = vrot.slane %v8767_v34, 3  ;;  %v1387_v8 = vrot.slane %v8770_v58, 3  ;;  %v1576_v17 = vmul.f32 0.21300554, %v8643_v57 }
 0x216   : > { %v3345_v39 = vsel %vm1313_vm3, %v3343_v30, %v3344_v38  ;;  %v1577_v28 = vmul.f32 0.21300554, %v8721_v53  ;;  %v8782_v47 = vmul.f32 0.21300554, %v8723_v49  ;;  %v1903_v30 = vmul.f32 0.26601171, %v8721_v53 }
 0x217   : > { %v3346_v54 = vrot.slane %v3199_v59, 3  ;;  %v3432_v4 = vsel %vm262_vm0, %v3345_v39, 0  ;;  %v1386_v9 = vsel %vm1313_vm3, %v1384_v2, %v1385_v35  ;;  %v1388_v22 = vsel %vm1313_vm3, %v1385_v35, %v1387_v8  ;;  %v430_v35 = vld [vmem:[#allocation2 + $0x1d8] sm:$0xff] }
 0x218   : > { %v1518_v12 = vadd.f32 %v1387_v8, %v1177_v40  ;;  %v8787_v56 = vand.u32 4294901760, %v3432_v4  ;;  %v1516_v57 = vadd.f32 %v1386_v9, %v1175_v6  ;;  %v1517_v52 = vadd.f32 %v1388_v22, %v1176_v7 }
 0x219   : > { %v3347_v24 = vsel %vm1313_vm3, %v3344_v38, %v3346_v54  ;;  %v1725_v55 = vrot.slane %v1576_v17, 4  ;;  %v1726_v37 = vrot.slane %v1577_v28, 4  ;;  %v1728_v32 = vrot.slane %v8782_v47, 4 }
 0x21a   : > { %v3434_v62 = vsel %vm262_vm0, %v3347_v24, 0  ;;  %v8793_v36 = vsub.f32 %v3432_v4, %v8787_v56  ;;  %v1904_v50 = vmul.f32 0.26601171, %v8723_v49  ;;  %v2247_v38 = vrot.slane %v1577_v28, 6 }
 0x21b   : > { %v8795_v5 = vand.u32 4294901760, %v3434_v62  ;;  %v1727_v42 = vsel %vm1654_vm4, %v1725_v55, %v1726_v37  ;;  %v1729_v40 = vsel %vm1654_vm4, %v1726_v37, %v1728_v32  ;;  %v2248_v11 = vrot.slane %v8782_v47, 6 }
 0x21c   : > { %9899 = vst [vmem:[#allocation58_spill] sm:$0xff] %v8793_v36  ;;  %v3789_v59 = vand.u32 4294901760, %v8793_v36  ;;  %v1857_v7 = vadd.f32 %v1727_v42, %v1516_v57  ;;  %v1858_v2 = vadd.f32 %v1729_v40, %v1517_v52  ;;  %v1998_v8 = vrot.slane %v1903_v30, 5 }
 0x21d   : > { %v8804_v6 = vsub.f32 %v3434_v62, %v8795_v5  ;;  %v1999_v17 = vrot.slane %v1904_v50, 5  ;;  %v2249_v53 = vsel %vm2176_vm6, %v2247_v38, %v2248_v11  ;;  %v2508_v49 = vrot.slane %v8767_v34, 7 }
 0x21e   : > { %6408 = vmatprep.mubr.f32.mxu0 %v3789_v59  ;;  %v3790_v54 = vsub.f32 %v8793_v36, %v3789_v59  ;;  %v2509_v28 = vrot.slane %v8770_v58, 7  ;;  %v8811_v47 = vmul.f32 0.007598758, %v430_v35  ;;  %v2118_v9 = vadd.f32 %v1998_v8, %v1857_v7 }
 0x21f   : > { %9900 = vst [vmem:[#allocation59_spill] sm:$0xff] %v8804_v6  ;;  %v3799_v39 = vand.u32 4294901760, %v8804_v6  ;;  %v2000_v4 = vsel %vm1955_vm5, %v1998_v8, %v1999_v17  ;;  %v8814_v22 = vmul.f32 0.0010283801, %v430_v35  ;;  %v3068_v24 = vrot.slane %v8730_v14, 2 }
 0x220   : > { %v3791_v57 = vand.u32 4294901760, %v3790_v54  ;;  %v2119_v52 = vadd.f32 %v2000_v4, %v1858_v2  ;;  %v2510_v34 = vsel %vm2437_vm7, %v2508_v49, %v2509_v28  ;;  %v2806_v62 = vrot.slane %v8811_v47, 1  ;;  %v431_v4 = vld [vmem:[#allocation2 + $0x1e0] sm:$0xff] }
 0x221   : > { %6409 = vmatmul.mubr.f32.gmra.mrb[26].mxu0 %v3799_v39  ;;  %v2379_v55 = vadd.f32 %v2247_v38, %v2118_v9  ;;  %v3069_v37 = vrot.slane %v8733_v43, 2  ;;  %v3071_v58 = vrot.slane %v8814_v22, 2  ;;  %v3800_v30 = vsub.f32 %v8804_v6, %v3799_v39  ;;  %v432_v9 = vld [vmem:[#allocation2 + $0x1e8] sm:$0xff] }
 0x222   : > { %6216 = vmatprep.mubr.f32.mxu1 %v3791_v57  ;;  %v2380_v50 = vadd.f32 %v2249_v53, %v2119_v52  ;;  %v2807_v42 = vsel %vm631_vm1, %v8743_v27, %v2806_v62  ;;  %v1859_v14 = vadd.f32 %v1728_v32, %v1518_v12  ;;  %v2150_v40 = vmul.f32 0.21300554, %v430_v35 }
 0x223   : > { %v2640_v59 = vadd.f32 %v2508_v49, %v2379_v55  ;;  %v3070_v7 = vsel %vm972_vm2, %v3068_v24, %v3069_v37  ;;  %v3072_v2 = vsel %vm972_vm2, %v3069_v37, %v3071_v58  ;;  %v3801_v8 = vand.u32 4294901760, %v3800_v30 }
 0x224   : > { %v2641_v38 = vadd.f32 %v2510_v34, %v2380_v50  ;;  %v2120_v54 = vadd.f32 %v1999_v17, %v1859_v14  ;;  %v2250_v43 = vrot.slane %v2150_v40, 6  ;;  %v2411_v47 = vmul.f32 0.10936069, %v430_v35 }
 0x225   : > { %v2720_v39 = vadd.f32 %v2640_v59, %v8740_v29  ;;  %6217 = vmatmul.mubr.f32.gmra.mrb[26].mxu1 %v3801_v8  ;;  %v2672_v53 = vmul.f32 0.036000773, %v430_v35  ;;  %v344_v27 = vmul.f32 %v7561_v25, %v7561_v25  ;;  %v496_v12 = vmul.f32 0.0010283801, %v431_v4 }
 0x226   : > { %v2721_v32 = vadd.f32 %v2641_v38, %v8747_v20  ;;  %v2251_v49 = vsel %vm2176_vm6, %v2248_v11, %v2250_v43  ;;  %v2511_v22 = vrot.slane %v2411_v47, 7  ;;  %v8831_v24 = vmul.f32 0.0010283801, %v432_v9 }
 0x227   : > { %v2900_v17 = vadd.f32 %v2720_v39, %v8753_v61  ;;  %v2381_v57 = vadd.f32 %v2251_v49, %v2120_v54  ;;  %353 = vst.msk [vmem:[#allocation2 + $0x1f0] sm:$0xff] %vm262_vm0, %v344_v27  ;;  %v556_v52 = vmul.f32 0.007598758, %v431_v4  ;;  %v557_v29 = vmul.f32 0.007598758, %v432_v9 }
 0x228   : > { %v2901_v34 = vadd.f32 %v2807_v42, %v2721_v32  ;;  %v2512_v35 = vsel %vm2437_vm7, %v2509_v28, %v2511_v22  ;;  %v897_v55 = vmul.f32 0.036000773, %v431_v4  ;;  %v8836_v37 = vmul.f32 0.036000773, %v432_v9 }
 0x229   : > { %v3200_v30 = vadd.f32 %v3070_v7, %v2900_v17  ;;  %v2642_v20 = vadd.f32 %v2512_v35, %v2381_v57  ;;  %v707_v50 = vrot.slane %v556_v52, 1  ;;  %v708_v11 = vrot.slane %v557_v29, 1 }
 0x22a   : > { %v3201_v14 = vadd.f32 %v3072_v2, %v2901_v34  ;;  %v1048_v40 = vrot.slane %v897_v55, 2  ;;  %v1049_v59 = vrot.slane %v8836_v37, 2  ;;  %v1238_v61 = vmul.f32 0.10936069, %v431_v4 }
 0x22b   : > { %v3348_v8 = vrot.slane %v3200_v30, 3  ;;  %v2722_v38 = vadd.f32 %v2672_v53, %v2642_v20  ;;  %v709_v54 = vsel %vm631_vm1, %v707_v50, %v708_v11  ;;  %v8840_v43 = vmul.f32 0.10936069, %v432_v9 }
 0x22c   : > { %v3349_v42 = vrot.slane %v3201_v14, 3  ;;  %v837_v28 = vadd.f32 %v709_v54, %v496_v12  ;;  %v1050_v47 = vsel %vm972_vm2, %v1048_v40, %v1049_v59  ;;  %v1389_v39 = vrot.slane %v1238_v61, 3 }
 0x22d   : > { %v2902_v7 = vadd.f32 %v2806_v62, %v2722_v38  ;;  %v1390_v27 = vrot.slane %v8840_v43, 3  ;;  %v1579_v32 = vmul.f32 0.21300554, %v431_v4  ;;  %v1580_v2 = vmul.f32 0.21300554, %v432_v9 }
 0x22e   : > { %v3350_v49 = vsel %vm1313_vm3, %v3348_v8, %v3349_v42  ;;  %v433_v22 = vld [vmem:[#allocation2 + $0x1f0] sm:$0xff]  ;;  %v1178_v17 = vadd.f32 %v1050_v47, %v837_v28  ;;  %v1905_v57 = vmul.f32 0.26601171, %v432_v9  ;;  %v2513_v53 = vrot.slane %v8840_v43, 7 }
 0x22f   : > { %v3436_v52 = vsel %vm262_vm0, %v3350_v49, 0  ;;  %v3202_v29 = vadd.f32 %v3071_v58, %v2902_v7  ;;  %v8847_v34 = vmul.f32 0.0010283801, %v433_v22  ;;  %v558_v12 = vmul.f32 0.007598758, %v433_v22 }
 0x230   : > { %v8849_v35 = vand.u32 4294901760, %v3436_v52  ;;  %v8851_v62 = vmul.f32 0.036000773, %v433_v22  ;;  %v8853_v55 = vmul.f32 0.10936069, %v433_v22  ;;  %v1391_v4 = vsel %vm1313_vm3, %v1389_v39, %v1390_v27 }
 0x231   : > { %v3351_v30 = vrot.slane %v3202_v29, 3  ;;  %v710_v20 = vrot.slane %v558_v12, 1  ;;  %v1519_v50 = vadd.f32 %v1391_v4, %v1178_v17  ;;  %v8856_v9 = vmul.f32 0.21300554, %v433_v22 }
 0x232   : > { %v8859_v14 = vsub.f32 %v3436_v52, %v8849_v35  ;;  %v1051_v58 = vrot.slane %v8851_v62, 2  ;;  %v1392_v40 = vrot.slane %v8853_v55, 3  ;;  %v1730_v61 = vrot.slane %v1579_v32, 4 }
 0x233   : > { %v3352_v8 = vsel %vm1313_vm3, %v3349_v42, %v3351_v30  ;;  %v711_v38 = vsel %vm631_vm1, %v708_v11, %v710_v20  ;;  %v839_v54 = vadd.f32 %v710_v20, %v8847_v34  ;;  %v1731_v43 = vrot.slane %v1580_v2, 4 }
 0x234   : > { %9901 = vst [vmem:[#allocation60_spill] sm:$0xff] %v8859_v14  ;;  %v3809_v28 = vand.u32 4294901760, %v8859_v14  ;;  %v3438_v47 = vsel %vm262_vm0, %v3352_v8, 0  ;;  %v838_v39 = vadd.f32 %v711_v38, %v8831_v24  ;;  %v1052_v7 = vsel %vm972_vm2, %v1049_v59, %v1051_v58 }
 0x235   : > { %v8870_v49 = vand.u32 4294901760, %v3438_v47  ;;  %v1180_v17 = vadd.f32 %v1051_v58, %v839_v54  ;;  %v1393_v32 = vsel %vm1313_vm3, %v1390_v27, %v1392_v40  ;;  %v1732_v42 = vsel %vm1654_vm4, %v1730_v61, %v1731_v43  ;;  %v434_v54 = vld [vmem:[#allocation2 + $0x1f8] sm:$0xff] }
 0x236   : > { %6411 = vmatprep.mubr.f32.mxu0 %v3809_v28  ;;  %v3810_v11 = vsub.f32 %v8859_v14, %v3809_v28  ;;  %v1179_v52 = vadd.f32 %v1052_v7, %v838_v39  ;;  %v1733_v29 = vrot.slane %v8856_v9, 4  ;;  %v1860_v12 = vadd.f32 %v1732_v42, %v1519_v50 }
 0x237   : > { %v8877_v4 = vsub.f32 %v3438_v47, %v8870_v49  ;;  %v1521_v30 = vadd.f32 %v1392_v40, %v1180_v17  ;;  %v1906_v8 = vmul.f32 0.26601171, %v433_v22  ;;  %v2001_v59 = vrot.slane %v1905_v57, 5 }
 0x238   : > { %v3811_v6 = vand.u32 4294901760, %v3810_v11  ;;  %v1520_v36 = vadd.f32 %v1393_v32, %v1179_v52  ;;  %v1734_v58 = vsel %vm1654_vm4, %v1731_v43, %v1733_v29  ;;  %v2252_v27 = vrot.slane %v1580_v2, 6 }
 0x239   : > { %9902 = vst [vmem:[#allocation61_spill] sm:$0xff] %v8877_v4  ;;  %v3819_v61 = vand.u32 4294901760, %v8877_v4  ;;  %v2002_v33 = vrot.slane %v1906_v8, 5  ;;  %v2121_v28 = vadd.f32 %v2001_v59, %v1860_v12  ;;  %v2253_v39 = vrot.slane %v8856_v9, 6 }
 0x23a   : > { %6219 = vmatprep.mubr.f32.mxu1 %v3811_v6  ;;  %v1861_v50 = vadd.f32 %v1734_v58, %v1520_v36  ;;  %v2514_v47 = vrot.slane %v8853_v55, 7  ;;  %v8883_v7 = vmul.f32 0.007598758, %v434_v54  ;;  %v8885_v22 = vmul.f32 0.0010283801, %v434_v54 }
 0x23b   : > { %6412 = vmatmul.mubr.f32.gmra.mrb[28].mxu0 %v3819_v61  ;;  %v2003_v57 = vsel %vm1955_vm5, %v2001_v59, %v2002_v33  ;;  %v2254_v2 = vsel %vm2176_vm6, %v2252_v27, %v2253_v39  ;;  %v2382_v40 = vadd.f32 %v2252_v27, %v2121_v28  ;;  %v3073_v43 = vrot.slane %v8831_v24, 2 }
 0x23c   : > { %v2122_v17 = vadd.f32 %v2003_v57, %v1861_v50  ;;  %v2515_v32 = vsel %vm2437_vm7, %v2513_v53, %v2514_v47  ;;  %v2808_v6 = vrot.slane %v8883_v7, 1  ;;  %v3074_v36 = vrot.slane %v8847_v34, 2  ;;  %v435_v50 = vld [vmem:[#allocation2 + $0x200] sm:$0xff]  ;;  %v436_v34 = vld [vmem:[#allocation2 + $0x208] sm:$0xff] }
 0x23d   : > { %v2643_v55 = vadd.f32 %v2513_v53, %v2382_v40  ;;  %v3076_v9 = vrot.slane %v8885_v22, 2  ;;  %v3820_v42 = vsub.f32 %v8877_v4, %v3819_v61  ;;  %v1862_v11 = vadd.f32 %v1733_v29, %v1521_v30  ;;  %v8899_v61 = vld [vmem:[#allocation2 + $0x210] sm:$0xff] }
 0x23e   : > { %v2383_v52 = vadd.f32 %v2254_v2, %v2122_v17  ;;  %v2809_v12 = vsel %vm631_vm1, %v710_v20, %v2808_v6  ;;  %v3075_v8 = vsel %vm972_vm2, %v3073_v43, %v3074_v36  ;;  %v2151_v59 = vmul.f32 0.21300554, %v434_v54 }
 0x23f   : > { %v2723_v24 = vadd.f32 %v2643_v55, %v8836_v37  ;;  %v3077_v58 = vsel %vm972_vm2, %v3074_v36, %v3076_v9  ;;  %v3821_v27 = vand.u32 4294901760, %v3820_v42  ;;  %v2123_v28 = vadd.f32 %v2002_v33, %v1862_v11 }
 0x240   : > { %v2644_v53 = vadd.f32 %v2515_v32, %v2383_v52  ;;  %v2255_v7 = vrot.slane %v2151_v59, 6  ;;  %v2412_v22 = vmul.f32 0.10936069, %v434_v54  ;;  %v2673_v57 = vmul.f32 0.036000773, %v434_v54 }
 0x241   : > { %v2903_v29 = vadd.f32 %v2723_v24, %v711_v38  ;;  %6220 = vmatmul.mubr.f32.gmra.mrb[28].mxu1 %v3821_v27  ;;  %v499_v20 = vmul.f32 0.0010283801, %v435_v50  ;;  %v8901_v30 = vmul.f32 0.0010283801, %v436_v34  ;;  %v8904_v2 = vmul.f32 0.0010283801, %v8899_v61 }
 0x242   : > { %v2724_v37 = vadd.f32 %v2644_v53, %v8851_v62  ;;  %v2256_v33 = vsel %vm2176_vm6, %v2253_v39, %v2255_v7  ;;  %v2516_v40 = vrot.slane %v2412_v22, 7  ;;  %v559_v43 = vmul.f32 0.007598758, %v435_v50 }
 0x243   : > { %v3203_v17 = vadd.f32 %v3075_v8, %v2903_v29  ;;  %v2384_v32 = vadd.f32 %v2256_v33, %v2123_v28  ;;  %v560_v36 = vmul.f32 0.007598758, %v436_v34  ;;  %v561_v54 = vmul.f32 0.007598758, %v8899_v61 }
 0x244   : > { %v2904_v55 = vadd.f32 %v2809_v12, %v2724_v37  ;;  %v2517_v38 = vsel %vm2437_vm7, %v2514_v47, %v2516_v40  ;;  %v712_v42 = vrot.slane %v559_v43, 1  ;;  %v900_v11 = vmul.f32 0.036000773, %v435_v50 }
 0x245   : > { %v3353_v52 = vrot.slane %v3203_v17, 3  ;;  %v2645_v59 = vadd.f32 %v2517_v38, %v2384_v32  ;;  %v713_v24 = vrot.slane %v560_v36, 1  ;;  %v8910_v27 = vrot.slane %v561_v54, 1 }
 0x246   : > { %v3204_v62 = vadd.f32 %v3077_v58, %v2904_v55  ;;  %v8912_v53 = vmul.f32 0.036000773, %v436_v34  ;;  %v8915_v39 = vmul.f32 0.036000773, %v8899_v61  ;;  %v1053_v8 = vrot.slane %v900_v11, 2 }
 0x247   : > { %v2725_v28 = vadd.f32 %v2673_v57, %v2645_v59  ;;  %v714_v7 = vsel %vm631_vm1, %v712_v42, %v713_v24  ;;  %v8920_v47 = vsel %vm631_vm1, %v713_v24, %v8910_v27  ;;  %v842_v12 = vadd.f32 %v8910_v27, %v8904_v2 }
 0x248   : > { %v3354_v22 = vrot.slane %v3204_v62, 3  ;;  %v840_v29 = vadd.f32 %v714_v7, %v499_v20  ;;  %v841_v58 = vadd.f32 %v8920_v47, %v8901_v30  ;;  %v1054_v37 = vrot.slane %v8912_v53, 2 }
 0x249   : > { %v2905_v33 = vadd.f32 %v2808_v6, %v2725_v28  ;;  %v1056_v40 = vrot.slane %v8915_v39, 2  ;;  %v1241_v57 = vmul.f32 0.10936069, %v435_v50  ;;  %v8928_v43 = vmul.f32 0.10936069, %v436_v34 }
 0x24a   : > { %v3355_v17 = vsel %vm1313_vm3, %v3353_v52, %v3354_v22  ;;  %v1055_v32 = vsel %vm972_vm2, %v1053_v8, %v1054_v37  ;;  %v8933_v36 = vmul.f32 0.10936069, %v8899_v61  ;;  %v1582_v54 = vmul.f32 0.21300554, %v435_v50 }
 0x24b   : > { %v3440_v20 = vsel %vm262_vm0, %v3355_v17, 0  ;;  %v3205_v55 = vadd.f32 %v3076_v9, %v2905_v33  ;;  %v1057_v38 = vsel %vm972_vm2, %v1054_v37, %v1056_v40  ;;  %v1181_v42 = vadd.f32 %v1055_v32, %v840_v29 }
 0x24c   : > { %v8937_v6 = vand.u32 4294901760, %v3440_v20  ;;  %v1182_v11 = vadd.f32 %v1057_v38, %v841_v58  ;;  %v1183_v59 = vadd.f32 %v1056_v40, %v842_v12  ;;  %v1394_v24 = vrot.slane %v1241_v57, 3 }
 0x24d   : > { %v3356_v62 = vrot.slane %v3205_v55, 3  ;;  %v1395_v52 = vrot.slane %v8928_v43, 3  ;;  %v1397_v8 = vrot.slane %v8933_v36, 3  ;;  %v1583_v28 = vmul.f32 0.21300554, %v436_v34 }
 0x24e   : > { %v8942_v7 = vsub.f32 %v3440_v20, %v8937_v6  ;;  %v8945_v50 = vmul.f32 0.21300554, %v8899_v61  ;;  %v1735_v9 = vrot.slane %v1582_v54, 4  ;;  %v1907_v37 = vmul.f32 0.26601171, %v436_v34 }
 0x24f   : > { %v3357_v29 = vsel %vm1313_vm3, %v3354_v22, %v3356_v62  ;;  %v1396_v58 = vsel %vm1313_vm3, %v1394_v24, %v1395_v52  ;;  %v1398_v12 = vsel %vm1313_vm3, %v1395_v52, %v1397_v8  ;;  %v1524_v33 = vadd.f32 %v1397_v8, %v1183_v59 }
 0x250   : > { %9903 = vst [vmem:[#allocation62_spill] sm:$0xff] %v8942_v7  ;;  %v3829_v40 = vand.u32 4294901760, %v8942_v7  ;;  %v3442_v57 = vsel %vm262_vm0, %v3357_v29, 0  ;;  %v1522_v17 = vadd.f32 %v1396_v58, %v1181_v42  ;;  %v1523_v32 = vadd.f32 %v1398_v12, %v1182_v11 }
 0x251   : > { %v8952_v20 = vand.u32 4294901760, %v3442_v57  ;;  %v1736_v55 = vrot.slane %v1583_v28, 4  ;;  %v1738_v38 = vrot.slane %v8945_v50, 4  ;;  %v1908_v34 = vmul.f32 0.26601171, %v8899_v61 }
 0x252   : > { %6414 = vmatprep.mubr.f32.mxu0 %v3829_v40  ;;  %v3830_v22 = vsub.f32 %v8942_v7, %v3829_v40  ;;  %v2004_v54 = vrot.slane %v1907_v37, 5  ;;  %v2257_v24 = vrot.slane %v1583_v28, 6  ;;  %v2258_v59 = vrot.slane %v8945_v50, 6  ;;  %v438_v40 = vld [vmem:[#allocation2 + $0x218] sm:$0xff] }
 0x253   : > { %v8959_v62 = vsub.f32 %v3442_v57, %v8952_v20  ;;  %v1737_v42 = vsel %vm1654_vm4, %v1735_v9, %v1736_v55  ;;  %v1739_v11 = vsel %vm1654_vm4, %v1736_v55, %v1738_v38  ;;  %v2005_v52 = vrot.slane %v1908_v34, 5 }
 0x254   : > { %v3831_v8 = vand.u32 4294901760, %v3830_v22  ;;  %v1863_v29 = vadd.f32 %v1737_v42, %v1522_v17  ;;  %v1864_v58 = vadd.f32 %v1739_v11, %v1523_v32  ;;  %v2259_v61 = vsel %vm2176_vm6, %v2257_v24, %v2258_v59 }
 0x255   : > { %v3839_v12 = vand.u32 4294901760, %v8959_v62  ;;  %v2006_v28 = vsel %vm1955_vm5, %v2004_v54, %v2005_v52  ;;  %v2518_v50 = vrot.slane %v8928_v43, 7  ;;  %v2519_v37 = vrot.slane %v8933_v36, 7 }
 0x256   : > { %6222 = vmatprep.mubr.f32.mxu1 %v3831_v8  ;;  %v2124_v57 = vadd.f32 %v2004_v54, %v1863_v29  ;;  %v2125_v9 = vadd.f32 %v2006_v28, %v1864_v58  ;;  %v2754_v7 = vmul.f32 0.007598758, %v438_v40  ;;  %v8968_v55 = vmul.f32 0.0010283801, %v438_v40 }
 0x257   : > { %6415 = vmatmul.mubr.f32.gmra.mrb[30].mxu0 %v3839_v12  ;;  %v2520_v17 = vsel %vm2437_vm7, %v2518_v50, %v2519_v37  ;;  %v3078_v32 = vrot.slane %v8901_v30, 2  ;;  %v3079_v34 = vrot.slane %v8904_v2, 2  ;;  %v3840_v22 = vsub.f32 %v8959_v62, %v3839_v12  ;;  %v439_v2 = vld [vmem:[#allocation2 + $0x220] sm:$0xff] }
 0x258   : > { %v2385_v42 = vadd.f32 %v2257_v24, %v2124_v57  ;;  %v2386_v11 = vadd.f32 %v2259_v61, %v2125_v9  ;;  %v2810_v43 = vrot.slane %v2754_v7, 1  ;;  %v3081_v36 = vrot.slane %v8968_v55, 2 }
 0x259   : > { %v3080_v54 = vsel %vm972_vm2, %v3078_v32, %v3079_v34  ;;  %v3841_v8 = vand.u32 4294901760, %v3840_v22  ;;  %v1865_v29 = vadd.f32 %v1738_v38, %v1524_v33  ;;  %v2152_v58 = vmul.f32 0.21300554, %v438_v40 }
 0x25a   : > { %v2646_v28 = vadd.f32 %v2518_v50, %v2385_v42  ;;  %v2647_v4 = vadd.f32 %v2520_v17, %v2386_v11  ;;  %v2811_v14 = vsel %vm631_vm1, %v8910_v27, %v2810_v43  ;;  %v3082_v30 = vsel %vm972_vm2, %v3079_v34, %v3081_v36 }
 0x25b   : > { %6223 = vmatmul.mubr.f32.gmra.mrb[30].mxu1 %v3841_v8  ;;  %v2126_v12 = vadd.f32 %v2005_v52, %v1865_v29  ;;  %v2260_v24 = vrot.slane %v2152_v58, 6  ;;  %v2413_v61 = vmul.f32 0.10936069, %v438_v40  ;;  %v2674_v7 = vmul.f32 0.036000773, %v438_v40 }
 0x25c   : > { %v2726_v57 = vadd.f32 %v2646_v28, %v8912_v53  ;;  %v2727_v9 = vadd.f32 %v2647_v4, %v8915_v39  ;;  %v356_v33 = vmul.f32 %v7430_v48, %v7320_v15  ;;  %v357_v38 = vmul.f32 %v7433_v51, %v7356_v31  ;;  %v442_v31 = vld [vmem:[#allocation2 + $0x238] sm:$0xff] }
 0x25d   : > { %v2261_v27 = vsel %vm2176_vm6, %v2258_v59, %v2260_v24  ;;  %v2521_v50 = vrot.slane %v2413_v61, 7  ;;  %v8986_v55 = vmul.f32 0.0010283801, %v439_v2  ;;  %v8988_v17 = vmul.f32 0.007598758, %v439_v2 }
 0x25e   : > { %v2906_v52 = vadd.f32 %v2726_v57, %v8920_v47  ;;  %v2907_v40 = vadd.f32 %v2811_v14, %v2727_v9  ;;  %v2387_v32 = vadd.f32 %v2261_v27, %v2126_v12  ;;  %365 = vst.msk [vmem:[#allocation2 + $0x228] sm:$0xff] %vm262_vm0, %v356_v33  ;;  %366 = vst.msk [vmem:[#allocation2 + $0x230] sm:$0xff] %vm262_vm0, %v357_v38  ;;  %v8993_v4 = vmul.f32 0.036000773, %v439_v2  ;;  %v9020_v9 = vld [vmem:[#allocation2 + $0x240] sm:$0xff] }
 0x25f   : > { %v2522_v15 = vsel %vm2437_vm7, %v2519_v37, %v2521_v50  ;;  %v717_v48 = vrot.slane %v8988_v17, 1  ;;  %v8997_v51 = vmul.f32 0.10936069, %v439_v2  ;;  %v8999_v53 = vmul.f32 0.21300554, %v439_v2 }
 0x260   : > { %v3206_v39 = vadd.f32 %v3080_v54, %v2906_v52  ;;  %v3207_v59 = vadd.f32 %v3082_v30, %v2907_v40  ;;  %v2648_v47 = vadd.f32 %v2522_v15, %v2387_v32  ;;  %v1058_v14 = vrot.slane %v8993_v4, 2 }
 0x261   : > { %v1399_v34 = vrot.slane %v8997_v51, 3  ;;  %v9004_v42 = vmul.f32 0.007598758, %v442_v31  ;;  %v9006_v11 = vmul.f32 0.0010283801, %v442_v31  ;;  %v358_v57 = vmul.f32 %v7440_v21, %v7373_v41 }
 0x262   : > { %v3358_v37 = vrot.slane %v3206_v39, 3  ;;  %v3359_v8 = vrot.slane %v3207_v59, 3  ;;  %v2728_v29 = vadd.f32 %v2674_v7, %v2648_v47  ;;  %v9008_v58 = vmul.f32 0.21300554, %v442_v31 }
 0x263   : > { %v9012_v30 = vmul.f32 0.10936069, %v442_v31  ;;  %v9014_v2 = vmul.f32 0.036000773, %v442_v31  ;;  %v359_v50 = vmul.f32 %v7444_v1, %v7380_v46  ;;  %v9027_v17 = vmul.f32 0.0010283801, %v9020_v9 }
 0x264   : > { %v3360_v12 = vsel %vm1313_vm3, %v3358_v37, %v3359_v8  ;;  %v2908_v24 = vadd.f32 %v2810_v43, %v2728_v29  ;;  %367 = vst.msk [vmem:[#allocation2 + $0x248] sm:$0xff] %vm262_vm0, %v358_v57  ;;  %v360_v46 = vmul.f32 %v7558_v13, %v7411_v3 }
 0x265   : > { %v3444_v7 = vsel %vm262_vm0, %v3360_v12, 0  ;;  %v440_v33 = vld [vmem:[#allocation2 + $0x228] sm:$0xff]  ;;  %v441_v38 = vld [vmem:[#allocation2 + $0x230] sm:$0xff]  ;;  %368 = vst.msk [vmem:[#allocation2 + $0x250] sm:$0xff] %vm262_vm0, %v359_v50 }
 0x266   : > { %v9029_v43 = vand.u32 4294901760, %v3444_v7  ;;  %v3208_v52 = vadd.f32 %v3081_v36, %v2908_v24  ;;  %v9031_v40 = vmul.f32 0.0010283801, %v440_v33  ;;  %v9033_v41 = vmul.f32 0.0010283801, %v441_v38  ;;  %369 = vst.msk [vmem:[#allocation2 + $0x268] sm:$0xff] %vm262_vm0, %v360_v46 }
 0x267   : > { %v563_v21 = vmul.f32 0.007598758, %v440_v33  ;;  %v564_v32 = vmul.f32 0.007598758, %v441_v38  ;;  %v9036_v4 = vmul.f32 0.036000773, %v440_v33 }
 0x268   : > { %v9042_v1 = vsub.f32 %v3444_v7, %v9029_v43  ;;  %v3361_v15 = vrot.slane %v3208_v52, 3  ;;  %v9044_v36 = vmul.f32 0.036000773, %v441_v38  ;;  %v9046_v31 = vmul.f32 0.10936069, %v440_v33 }
 0x269   : > { %v718_v51 = vrot.slane %v563_v21, 1  ;;  %v720_v39 = vrot.slane %v564_v32, 1  ;;  %v1059_v59 = vrot.slane %v9036_v4, 2  ;;  %v1246_v47 = vmul.f32 0.10936069, %v441_v38 }
 0x26a   : > { %9904 = vst [vmem:[#allocation63_spill] sm:$0xff] %v9042_v1  ;;  %v3849_v37 = vand.u32 4294901760, %v9042_v1  ;;  %v3362_v29 = vsel %vm1313_vm3, %v3359_v8, %v3361_v15  ;;  %v1061_v3 = vrot.slane %v9044_v36, 2  ;;  %v1400_v13 = vrot.slane %v9046_v31, 3 }
 0x26b   : > { %v3446_v12 = vsel %vm262_vm0, %v3362_v29, 0  ;;  %v719_v24 = vsel %vm631_vm1, %v717_v48, %v718_v51  ;;  %v9057_v57 = vsel %vm631_vm1, %v718_v51, %v720_v39  ;;  %v845_v7 = vadd.f32 %v720_v39, %v9033_v41 }
 0x26c   : > { %6417 = vmatprep.mubr.f32.mxu0 %v3849_v37  ;;  %v9060_v50 = vand.u32 4294901760, %v3446_v12  ;;  %v3850_v52 = vsub.f32 %v9042_v1, %v3849_v37  ;;  %v843_v8 = vadd.f32 %v719_v24, %v8986_v55  ;;  %v844_v21 = vadd.f32 %v9057_v57, %v9031_v40 }
 0x26d   : > { %v1060_v32 = vsel %vm972_vm2, %v1058_v14, %v1059_v59  ;;  %v1062_v46 = vsel %vm972_vm2, %v1059_v59, %v1061_v3  ;;  %v1186_v48 = vadd.f32 %v1061_v3, %v845_v7  ;;  %v1401_v15 = vsel %vm1313_vm3, %v1399_v34, %v1400_v13 }
 0x26e   : > { %v9070_v51 = vsub.f32 %v3446_v12, %v9060_v50  ;;  %v3851_v29 = vand.u32 4294901760, %v3850_v52  ;;  %v1184_v27 = vadd.f32 %v1060_v32, %v843_v8  ;;  %v1185_v61 = vadd.f32 %v1062_v46, %v844_v21 }
 0x26f   : > { %v1402_v54 = vrot.slane %v1246_v47, 3  ;;  %v1586_v37 = vmul.f32 0.21300554, %v440_v33  ;;  %v1587_v28 = vmul.f32 0.21300554, %v441_v38  ;;  %v2523_v55 = vrot.slane %v9046_v31, 7 }
 0x270   : > { %v3859_v24 = vand.u32 4294901760, %v9070_v51  ;;  %6225 = vmatprep.mubr.f32.mxu1 %v3851_v29  ;;  %v1525_v14 = vadd.f32 %v1401_v15, %v1184_v27  ;;  %v1909_v22 = vmul.f32 0.26601171, %v440_v33  ;;  %v1910_v59 = vmul.f32 0.26601171, %v441_v38 }
 0x271   : > { %v1403_v3 = vsel %vm1313_vm3, %v1400_v13, %v1402_v54  ;;  %v1527_v34 = vadd.f32 %v1402_v54, %v1186_v48  ;;  %v1741_v7 = vrot.slane %v1586_v37, 4  ;;  %v1743_v12 = vrot.slane %v1587_v28, 4 }
 0x272   : > { %6418 = vmatmul.mubr.f32.gmra.mrb[32].mxu0 %v3859_v24  ;;  %v1526_v52 = vadd.f32 %v1403_v3, %v1185_v61  ;;  %v2007_v8 = vrot.slane %v1909_v22, 5  ;;  %v2008_v21 = vrot.slane %v1910_v59, 5  ;;  %v2262_v32 = vrot.slane %v1586_v37, 6 }
 0x273   : > { %v9905_v46 = vrot.slane %v8999_v53, 4  ;;  %v1744_v1 = vsel %vm1654_vm4, %v1741_v7, %v1743_v12  ;;  %v2263_v29 = vrot.slane %v1587_v28, 6  ;;  %v2524_v27 = vrot.slane %v1246_v47, 7 }
 0x274   : > { %v1867_v38 = vadd.f32 %v1744_v1, %v1526_v52  ;;  %v2009_v13 = vsel %vm1955_vm5, %v2007_v8, %v2008_v21  ;;  %v9906_v54 = vrot.slane %v9004_v42, 1  ;;  %v3083_v53 = vrot.slane %v9031_v40, 2 }
 0x275   : > { %v1742_v31 = vsel %vm1654_vm4, %v9905_v46, %v1741_v7  ;;  %v2264_v22 = vsel %vm2176_vm6, %v2262_v32, %v2263_v29  ;;  %v2525_v61 = vsel %vm2437_vm7, %v2523_v55, %v2524_v27  ;;  %v3084_v15 = vrot.slane %v9033_v41, 2  ;;  %v9098_v41 = vld [vmem:[#allocation2 + $0x248] sm:$0xff] }
 0x276   : > { %v1866_v33 = vadd.f32 %v1742_v31, %v1525_v14  ;;  %v2813_v48 = vsel %vm631_vm1, %v720_v39, %v9906_v54  ;;  %v2128_v59 = vadd.f32 %v2009_v13, %v1867_v38  ;;  %v3860_v28 = vsub.f32 %v9070_v51, %v3859_v24 }
 0x277   : > { %v1868_v47 = vadd.f32 %v1743_v12, %v1527_v34  ;;  %v3085_v1 = vsel %vm972_vm2, %v3083_v53, %v3084_v15  ;;  %v9907_v14 = vrot.slane %v9006_v11, 2  ;;  %v9908_v39 = vrot.slane %v9008_v58, 6  ;;  %v9100_v12 = vld [vmem:[#allocation2 + $0x250] sm:$0xff] }
 0x278   : > { %v2127_v37 = vadd.f32 %v2007_v8, %v1866_v33  ;;  %v9909_v52 = vrot.slane %v9012_v30, 7  ;;  %v2389_v46 = vadd.f32 %v2264_v22, %v2128_v59  ;;  %v3861_v24 = vand.u32 4294901760, %v3860_v28 }
 0x279   : > { %v3087_v3 = vsel %vm972_vm2, %v3084_v15, %v9907_v14  ;;  %v2266_v7 = vsel %vm2176_vm6, %v2263_v29, %v9908_v39  ;;  %v2129_v34 = vadd.f32 %v2008_v21, %v1868_v47  ;;  %v9103_v31 = vmul.f32 0.0010283801, %v9098_v41 }
 0x27a   : > { %v2527_v40 = vsel %vm2437_vm7, %v2524_v27, %v9909_v52  ;;  %v2388_v8 = vadd.f32 %v2262_v32, %v2127_v37  ;;  %v9106_v33 = vmul.f32 0.0010283801, %v9100_v12  ;;  %v565_v58 = vmul.f32 0.007598758, %v9020_v9  ;;  %6226 = vmatmul.mubr.f32.gmra.mrb[32].mxu1 %v3861_v24 }
 0x27b   : > { %v361_v30 = vmul.f32 %v7561_v25, %v7418_v10  ;;  %v2650_v27 = vadd.f32 %v2525_v61, %v2389_v46  ;;  %v2390_v32 = vadd.f32 %v2266_v7, %v2129_v34  ;;  %v566_v38 = vmul.f32 0.007598758, %v9098_v41 }
 0x27c   : > { %v2649_v29 = vadd.f32 %v2523_v55, %v2388_v8  ;;  %v567_v21 = vmul.f32 0.007598758, %v9100_v12  ;;  %v722_v13 = vrot.slane %v565_v58, 1  ;;  %v906_v54 = vmul.f32 0.036000773, %v9020_v9 }
 0x27d   : > { %v3088_v22 = vrot.slane %v9103_v31, 2  ;;  %370 = vst.msk [vmem:[#allocation2 + $0x270] sm:$0xff] %vm262_vm0, %v361_v30  ;;  %v2730_v15 = vadd.f32 %v2650_v27, %v9044_v36  ;;  %v2651_v10 = vadd.f32 %v2527_v40, %v2390_v32  ;;  %v723_v25 = vrot.slane %v566_v38, 1 }
 0x27e   : > { %v2729_v53 = vadd.f32 %v2649_v29, %v9036_v4  ;;  %v9118_v55 = vrot.slane %v567_v21, 1  ;;  %v9121_v61 = vmul.f32 0.036000773, %v9098_v41  ;;  %v9124_v37 = vmul.f32 0.036000773, %v9100_v12 }
 0x27f   : > { %v1063_v59 = vrot.slane %v906_v54, 2  ;;  %v2910_v47 = vadd.f32 %v2813_v48, %v2730_v15  ;;  %v2731_v14 = vadd.f32 %v9014_v2, %v2651_v10  ;;  %v724_v4 = vsel %vm631_vm1, %v722_v13, %v723_v25 }
 0x280   : > { %v2909_v28 = vadd.f32 %v2729_v53, %v9057_v57  ;;  %v9131_v36 = vsel %vm631_vm1, %v723_v25, %v9118_v55  ;;  %v846_v39 = vadd.f32 %v724_v4, %v9027_v17  ;;  %v848_v7 = vadd.f32 %v9118_v55, %v9106_v33 }
 0x281   : > { %v1064_v52 = vrot.slane %v9121_v61, 2  ;;  %v3210_v8 = vadd.f32 %v3087_v3, %v2910_v47  ;;  %v9910_v57 = vrot.slane %v9004_v42, 1  ;;  %v847_v2 = vadd.f32 %v9131_v36, %v9103_v31  ;;  %v9201_v31 = vld [vmem:[#allocation2 + $0x268] sm:$0xff] }
 0x282   : > { %v3209_v40 = vadd.f32 %v3085_v1, %v2909_v28  ;;  %v1066_v24 = vrot.slane %v9124_v37, 2  ;;  %v1247_v34 = vmul.f32 0.10936069, %v9020_v9  ;;  %v9145_v17 = vmul.f32 0.10936069, %v9098_v41 }
 0x283   : > { %v2911_v48 = vadd.f32 %v9910_v57, %v2731_v14  ;;  %v1065_v46 = vsel %vm972_vm2, %v1063_v59, %v1064_v52  ;;  %v3364_v30 = vrot.slane %v3210_v8, 3  ;;  %v9911_v1 = vrot.slane %v9006_v11, 2 }
 0x284   : > { %v3363_v58 = vrot.slane %v3209_v40, 3  ;;  %v1187_v29 = vadd.f32 %v1065_v46, %v846_v39  ;;  %v1067_v42 = vsel %vm972_vm2, %v1064_v52, %v1066_v24  ;;  %v1189_v27 = vadd.f32 %v1066_v24, %v848_v7 }
 0x285   : > { %v3211_v3 = vadd.f32 %v9911_v1, %v2911_v48  ;;  %v9151_v32 = vmul.f32 0.10936069, %v9100_v12  ;;  %v1404_v38 = vrot.slane %v1247_v34, 3  ;;  %v1188_v54 = vadd.f32 %v1067_v42, %v847_v2 }
 0x286   : > { %v3365_v21 = vsel %vm1313_vm3, %v3363_v58, %v3364_v30  ;;  %v1405_v53 = vrot.slane %v9145_v17, 3  ;;  %v1588_v11 = vmul.f32 0.21300554, %v9020_v9  ;;  %v1589_v25 = vmul.f32 0.21300554, %v9098_v41 }
 0x287   : > { %v3366_v13 = vrot.slane %v3211_v3, 3  ;;  %v3448_v15 = vsel %vm262_vm0, %v3365_v21, 0  ;;  %v1407_v10 = vrot.slane %v9151_v32, 3  ;;  %v9164_v14 = vmul.f32 0.21300554, %v9100_v12 }
 0x288   : > { %v9159_v59 = vand.u32 4294901760, %v3448_v15  ;;  %v1406_v47 = vsel %vm1313_vm3, %v1404_v38, %v1405_v53  ;;  %v1745_v57 = vrot.slane %v1588_v11, 4  ;;  %v1746_v48 = vrot.slane %v1589_v25, 4 }
 0x289   : > { %v3367_v28 = vsel %vm1313_vm3, %v3364_v30, %v3366_v13  ;;  %v1408_v39 = vsel %vm1313_vm3, %v1405_v53, %v1407_v10  ;;  %v1528_v7 = vadd.f32 %v1406_v47, %v1187_v29  ;;  %v1530_v52 = vadd.f32 %v1407_v10, %v1189_v27  ;;  %v446_v13 = vld [vmem:[#allocation2 + $0x258] sm:$0xff] }
 0x28a   : > { %v3450_v4 = vsel %vm262_vm0, %v3367_v28, 0  ;;  %v9169_v40 = vsub.f32 %v3448_v15, %v9159_v59  ;;  %v1529_v8 = vadd.f32 %v1408_v39, %v1188_v54  ;;  %v1748_v2 = vrot.slane %v9164_v14, 4 }
 0x28b   : > { %v9171_v9 = vand.u32 4294901760, %v3450_v4  ;;  %v1911_v46 = vmul.f32 0.26601171, %v9098_v41  ;;  %v1912_v24 = vmul.f32 0.26601171, %v9100_v12  ;;  %v2267_v30 = vrot.slane %v1589_v25, 6 }
 0x28c   : > { %v3869_v34 = vand.u32 4294901760, %v9169_v40  ;;  %v2268_v1 = vrot.slane %v9164_v14, 6  ;;  %v1747_v3 = vsel %vm1654_vm4, %v1745_v57, %v1746_v48  ;;  %v1749_v29 = vsel %vm1654_vm4, %v1746_v48, %v1748_v2 }
 0x28d   : > { %v9178_v58 = vsub.f32 %v3450_v4, %v9171_v9  ;;  %v2010_v42 = vrot.slane %v1911_v46, 5  ;;  %v2011_v27 = vrot.slane %v1912_v24, 5  ;;  %v1869_v12 = vadd.f32 %v1747_v3, %v1528_v7 }
 0x28e   : > { %6420 = vmatprep.mubr.f32.mxu0 %v3869_v34  ;;  %v3870_v41 = vsub.f32 %v9169_v40, %v3869_v34  ;;  %v1870_v21 = vadd.f32 %v1749_v29, %v1529_v8  ;;  %v2269_v53 = vsel %vm2176_vm6, %v2267_v30, %v2268_v1  ;;  %v2528_v15 = vrot.slane %v9145_v17, 7 }
 0x28f   : > { %v3879_v38 = vand.u32 4294901760, %v9178_v58  ;;  %v2012_v54 = vsel %vm1955_vm5, %v2010_v42, %v2011_v27  ;;  %v2529_v10 = vrot.slane %v9151_v32, 7  ;;  %v2130_v25 = vadd.f32 %v2010_v42, %v1869_v12 }
 0x290   : > { %v3871_v11 = vand.u32 4294901760, %v3870_v41  ;;  %v2131_v28 = vadd.f32 %v2012_v54, %v1870_v21  ;;  %v2756_v47 = vmul.f32 0.007598758, %v446_v13  ;;  %v9190_v4 = vmul.f32 0.0010283801, %v446_v13  ;;  %v9205_v21 = vld [vmem:[#allocation2 + $0x270] sm:$0xff] }
 0x291   : > { %6421 = vmatmul.mubr.f32.gmra.mrb[34].mxu0 %v3879_v38  ;;  %v2530_v14 = vsel %vm2437_vm7, %v2528_v15, %v2529_v10  ;;  %v3089_v39 = vrot.slane %v9106_v33, 2  ;;  %v3880_v7 = vsub.f32 %v9178_v58, %v3879_v38  ;;  %v2391_v8 = vadd.f32 %v2267_v30, %v2130_v25  ;;  %v447_v38 = vld [vmem:[#allocation2 + $0x260] sm:$0xff] }
 0x292   : > { %6228 = vmatprep.mubr.f32.mxu1 %v3871_v11  ;;  %v2392_v57 = vadd.f32 %v2269_v53, %v2131_v28  ;;  %v2814_v48 = vrot.slane %v2756_v47, 1  ;;  %v1871_v17 = vadd.f32 %v1748_v2, %v1530_v52  ;;  %v3091_v46 = vrot.slane %v9190_v4, 2 }
 0x293   : > { %v3090_v32 = vsel %vm972_vm2, %v3088_v22, %v3089_v39  ;;  %v3881_v24 = vand.u32 4294901760, %v3880_v7  ;;  %v2154_v34 = vmul.f32 0.21300554, %v446_v13  ;;  %v2652_v3 = vadd.f32 %v2528_v15, %v2391_v8 }
 0x294   : > { %v2653_v29 = vadd.f32 %v2530_v14, %v2392_v57  ;;  %v2815_v33 = vsel %vm631_vm1, %v9118_v55, %v2814_v48  ;;  %v2132_v42 = vadd.f32 %v2011_v27, %v1871_v17  ;;  %v3092_v30 = vsel %vm972_vm2, %v3089_v39, %v3091_v46 }
 0x295   : > { %6229 = vmatmul.mubr.f32.gmra.mrb[34].mxu1 %v3881_v24  ;;  %v2270_v41 = vrot.slane %v2154_v34, 6  ;;  %v2415_v52 = vmul.f32 0.10936069, %v446_v13  ;;  %v2676_v2 = vmul.f32 0.036000773, %v446_v13  ;;  %v2732_v22 = vadd.f32 %v2652_v3, %v9121_v61 }
 0x296   : > { %v2733_v12 = vadd.f32 %v2653_v29, %v9124_v37  ;;  %v508_v54 = vmul.f32 0.0010283801, %v447_v38  ;;  %v9208_v53 = vmul.f32 0.0010283801, %v9201_v31  ;;  %v9212_v15 = vmul.f32 0.0010283801, %v9205_v21 }
 0x297   : > { %v2271_v55 = vsel %vm2176_vm6, %v2268_v1, %v2270_v41  ;;  %v2531_v27 = vrot.slane %v2415_v52, 7  ;;  %v568_v11 = vmul.f32 0.007598758, %v447_v38  ;;  %v2912_v13 = vadd.f32 %v2732_v22, %v9131_v36 }
 0x298   : > { %v2913_v25 = vadd.f32 %v2815_v33, %v2733_v12  ;;  %v2393_v28 = vadd.f32 %v2271_v55, %v2132_v42  ;;  %v569_v61 = vmul.f32 0.007598758, %v9201_v31  ;;  %v570_v47 = vmul.f32 0.007598758, %v9205_v21 }
 0x299   : > { %v2532_v37 = vsel %vm2437_vm7, %v2529_v10, %v2531_v27  ;;  %v727_v14 = vrot.slane %v568_v11, 1  ;;  %v909_v4 = vmul.f32 0.036000773, %v447_v38  ;;  %v3212_v39 = vadd.f32 %v3090_v32, %v2912_v13 }
 0x29a   : > { %v3213_v7 = vadd.f32 %v3092_v30, %v2913_v25  ;;  %v2654_v1 = vadd.f32 %v2532_v37, %v2393_v28  ;;  %v728_v8 = vrot.slane %v569_v61, 1  ;;  %v9218_v57 = vrot.slane %v570_v47, 1 }
 0x29b   : > { %v9221_v17 = vmul.f32 0.036000773, %v9201_v31  ;;  %v9224_v36 = vmul.f32 0.036000773, %v9205_v21  ;;  %v1068_v24 = vrot.slane %v909_v4, 2  ;;  %v3368_v34 = vrot.slane %v3212_v39, 3 }
 0x29c   : > { %v3369_v3 = vrot.slane %v3213_v7, 3  ;;  %v2734_v10 = vadd.f32 %v2676_v2, %v2654_v1  ;;  %v729_v29 = vsel %vm631_vm1, %v727_v14, %v728_v8  ;;  %v9229_v32 = vsel %vm631_vm1, %v728_v8, %v9218_v57 }
 0x29d   : > { %v849_v33 = vadd.f32 %v729_v29, %v508_v54  ;;  %v851_v42 = vadd.f32 %v9218_v57, %v9212_v15  ;;  %v1069_v30 = vrot.slane %v9221_v17, 2  ;;  %v850_v22 = vadd.f32 %v9229_v32, %v9208_v53 }
 0x29e   : > { %v3370_v41 = vsel %vm1313_vm3, %v3368_v34, %v3369_v3  ;;  %v2914_v52 = vadd.f32 %v2814_v48, %v2734_v10  ;;  %v1071_v2 = vrot.slane %v9224_v36, 2  ;;  %v1250_v27 = vmul.f32 0.10936069, %v447_v38 }
 0x29f   : > { %v3452_v12 = vsel %vm262_vm0, %v3370_v41, 0  ;;  %v1070_v55 = vsel %vm972_vm2, %v1068_v24, %v1069_v30  ;;  %v9241_v54 = vmul.f32 0.10936069, %v9201_v31  ;;  %v9247_v37 = vmul.f32 0.10936069, %v9205_v21 }
 0x2a0   : > { %v9243_v11 = vand.u32 4294901760, %v3452_v12  ;;  %v3214_v13 = vadd.f32 %v3091_v46, %v2914_v52  ;;  %v1072_v25 = vsel %vm972_vm2, %v1069_v30, %v1071_v2  ;;  %v1190_v28 = vadd.f32 %v1070_v55, %v849_v33 }
 0x2a1   : > { %v1191_v48 = vadd.f32 %v1072_v25, %v850_v22  ;;  %v1192_v61 = vadd.f32 %v1071_v2, %v851_v42  ;;  %v1409_v47 = vrot.slane %v1250_v27, 3  ;;  %v1410_v39 = vrot.slane %v9241_v54, 3 }
 0x2a2   : > { %v9250_v14 = vsub.f32 %v3452_v12, %v9243_v11  ;;  %v3371_v4 = vrot.slane %v3214_v13, 3  ;;  %v1591_v7 = vmul.f32 0.21300554, %v447_v38  ;;  %v1412_v1 = vrot.slane %v9247_v37, 3 }
 0x2a3   : > { %v1592_v46 = vmul.f32 0.21300554, %v9201_v31  ;;  %v9256_v8 = vmul.f32 0.21300554, %v9205_v21  ;;  %v2533_v24 = vrot.slane %v9241_v54, 7  ;;  %v1411_v29 = vsel %vm1313_vm3, %v1409_v47, %v1410_v39 }
 0x2a4   : > { %9912 = vst [vmem:[#allocation64_spill] sm:$0xff] %v9250_v14  ;;  %v3889_v34 = vand.u32 4294901760, %v9250_v14  ;;  %v3372_v10 = vsel %vm1313_vm3, %v3369_v3, %v3371_v4  ;;  %v1750_v33 = vrot.slane %v1591_v7, 4  ;;  %v1413_v38 = vsel %vm1313_vm3, %v1410_v39, %v1412_v1 }
 0x2a5   : > { %v3454_v42 = vsel %vm262_vm0, %v3372_v10, 0  ;;  %v1531_v30 = vadd.f32 %v1411_v29, %v1190_v28  ;;  %v1533_v41 = vadd.f32 %v1412_v1, %v1192_v61  ;;  %v1532_v2 = vadd.f32 %v1413_v38, %v1191_v48 }
 0x2a6   : > { %6423 = vmatprep.mubr.f32.mxu0 %v3889_v34  ;;  %v9264_v52 = vand.u32 4294901760, %v3454_v42  ;;  %v3890_v22 = vsub.f32 %v9250_v14, %v3889_v34  ;;  %v1751_v12 = vrot.slane %v1592_v46, 4  ;;  %v1753_v55 = vrot.slane %v9256_v8, 4 }
 0x2a7   : > { %v1913_v3 = vmul.f32 0.26601171, %v9201_v31  ;;  %v1914_v27 = vmul.f32 0.26601171, %v9205_v21  ;;  %v2272_v54 = vrot.slane %v1592_v46, 6  ;;  %v2273_v61 = vrot.slane %v9256_v8, 6 }
 0x2a8   : > { %v9271_v13 = vsub.f32 %v3454_v42, %v9264_v52  ;;  %v3891_v25 = vand.u32 4294901760, %v3890_v22  ;;  %v1752_v28 = vsel %vm1654_vm4, %v1750_v33, %v1751_v12  ;;  %v1754_v47 = vsel %vm1654_vm4, %v1751_v12, %v1753_v55  ;;  %v450_v31 = vld [vmem:[#allocation2 + $0x278] sm:$0xff] }
 0x2a9   : > { %v1872_v4 = vadd.f32 %v1752_v28, %v1531_v30  ;;  %v2013_v48 = vrot.slane %v1913_v3, 5  ;;  %v2014_v39 = vrot.slane %v1914_v27, 5  ;;  %v1873_v1 = vadd.f32 %v1754_v47, %v1532_v2 }
 0x2aa   : > { %v3899_v7 = vand.u32 4294901760, %v9271_v13  ;;  %6231 = vmatprep.mubr.f32.mxu1 %v3891_v25  ;;  %v2274_v21 = vsel %vm2176_vm6, %v2272_v54, %v2273_v61  ;;  %v2534_v46 = vrot.slane %v9247_v37, 7  ;;  %v2757_v29 = vmul.f32 0.007598758, %v450_v31 }
 0x2ab   : > { %v2015_v34 = vsel %vm1955_vm5, %v2013_v48, %v2014_v39  ;;  %v2133_v10 = vadd.f32 %v2013_v48, %v1872_v4  ;;  %v2937_v33 = vmul.f32 0.0010283801, %v450_v31  ;;  %v3093_v22 = vrot.slane %v9208_v53, 2 }
 0x2ac   : > { %6424 = vmatmul.mubr.f32.gmra.mrb[36].mxu0 %v3899_v7  ;;  %v2134_v8 = vadd.f32 %v2015_v34, %v1873_v1  ;;  %v2535_v42 = vsel %vm2437_vm7, %v2533_v24, %v2534_v46  ;;  %v2816_v30 = vrot.slane %v2757_v29, 1  ;;  %v3900_v12 = vsub.f32 %v9271_v13, %v3899_v7 }
 0x2ad   : > { %v2394_v38 = vadd.f32 %v2272_v54, %v2133_v10  ;;  %v3094_v3 = vrot.slane %v9212_v15, 2  ;;  %v1874_v27 = vadd.f32 %v1753_v55, %v1533_v41  ;;  %v2155_v37 = vmul.f32 0.21300554, %v450_v31 }
 0x2ae   : > { %v2395_v2 = vadd.f32 %v2274_v21, %v2134_v8  ;;  %v3096_v28 = vrot.slane %v2937_v33, 2  ;;  %v3901_v47 = vand.u32 4294901760, %v3900_v12  ;;  %v2416_v1 = vmul.f32 0.10936069, %v450_v31 }
 0x2af   : > { %v2655_v25 = vadd.f32 %v2533_v24, %v2394_v38  ;;  %v2135_v48 = vadd.f32 %v2014_v39, %v1874_v27  ;;  %v2275_v14 = vrot.slane %v2155_v37, 6  ;;  %v2817_v54 = vsel %vm631_vm1, %v9218_v57, %v2816_v30 }
 0x2b0   : > { %v2656_v4 = vadd.f32 %v2535_v42, %v2395_v2  ;;  %6232 = vmatmul.mubr.f32.gmra.mrb[36].mxu1 %v3901_v47  ;;  %v6565_v53 = vpack.c.bf16 %v7377_v45, %v7340_v23  ;;  %v3095_v41 = vsel %vm972_vm2, %v3093_v22, %v3094_v3  ;;  %v2536_v55 = vrot.slane %v2416_v1, 7  ;;  %v9916_v1 = vld [vmem:[#allocation24_spill] sm:$0xff] }
 0x2b1   : > { %v2735_v34 = vadd.f32 %v2655_v25, %v9221_v17  ;;  %v2276_v24 = vsel %vm2176_vm6, %v2273_v61, %v2275_v14  ;;  %v3097_v7 = vsel %vm972_vm2, %v3094_v3, %v3096_v28  ;;  %v2677_v17 = vmul.f32 0.036000773, %v450_v31 }
 0x2b2   : > { %v2736_v15 = vadd.f32 %v2656_v4, %v9224_v36  ;;  %v2396_v21 = vadd.f32 %v2276_v24, %v2135_v48  ;;  %6566 = vmatprep.subr.bf16.mxu1 %v6565_v53  ;;  %v2537_v57 = vsel %vm2437_vm7, %v2534_v46, %v2536_v55  ;;  %v9913_v4 = vld [vmem:[#allocation18_spill] sm:$0xff]  ;;  %v9914_v48 = vld [vmem:[#allocation20_spill] sm:$0xff] }
 0x2b3   : > { %v2915_v39 = vadd.f32 %v2735_v34, %v9229_v32  ;;  %v9917_v34 = vld [vmem:[#allocation26_spill] sm:$0xff]  ;;  %v9922_v24 = vld [vmem:[#allocation36_spill] sm:$0xff] }
 0x2b4   : > { %v2916_v10 = vadd.f32 %v2817_v54, %v2736_v15  ;;  %v2657_v33 = vadd.f32 %v2537_v57, %v2396_v21  ;;  %v9918_v54 = vld [vmem:[#allocation28_spill] sm:$0xff]  ;;  %v9923_v55 = vld [vmem:[#allocation38_spill] sm:$0xff] }
 0x2b5   : > { %v3215_v29 = vadd.f32 %v3095_v41, %v2915_v39  ;;  %v9920_v15 = vld [vmem:[#allocation32_spill] sm:$0xff]  ;;  %v9921_v41 = vld [vmem:[#allocation34_spill] sm:$0xff] }
 0x2b6   : > { %v3216_v23 = vadd.f32 %v3097_v7, %v2916_v10  ;;  %v2737_v36 = vadd.f32 %v2677_v17, %v2657_v33  ;;  %v9924_v39 = vld [vmem:[#allocation40_spill] sm:$0xff]  ;;  %v9925_v7 = vld [vmem:[#allocation42_spill] sm:$0xff] }
 0x2b7   : > { %v3373_v45 = vrot.slane %v3215_v29, 3  ;;  %v9926_v21 = vld [vmem:[#allocation44_spill] sm:$0xff]  ;;  %v9927_v17 = vld [vmem:[#allocation46_spill] sm:$0xff] }
 0x2b8   : > { %v3374_v8 = vrot.slane %v3216_v23, 3  ;;  %v2917_v42 = vadd.f32 %v2816_v30, %v2737_v36  ;;  %v9928_v10 = vld [vmem:[#allocation50_spill] sm:$0xff]  ;;  %v9929_v57 = vld [vmem:[#allocation52_spill] sm:$0xff]  ;;  %v9932_v23 = vld [vmem:[#allocation13_spill] sm:$0xff] }
 0x2b9   : > { %v9930_v29 = vld [vmem:[#allocation54_spill] sm:$0xff]  ;;  %v9931_v33 = vld [vmem:[#allocation56_spill] sm:$0xff]  ;;  %v9934_v36 = vld [vmem:[#allocation15_spill] sm:$0xff] }
 0x2ba   : > { %v3375_v14 = vsel %vm1313_vm3, %v3373_v45, %v3374_v8  ;;  %v3217_v32 = vadd.f32 %v3096_v28, %v2917_v42  ;;  %v9933_v45 = vld [vmem:[#allocation14_spill] sm:$0xff]  ;;  %v9941_v42 = vld [vmem:[#allocation27_spill] sm:$0xff] }
 0x2bb   : > { %v3456_v61 = vsel %vm262_vm0, %v3375_v14, 0  ;;  %v9942_v14 = vld [vmem:[#allocation29_spill] sm:$0xff] }
 0x2bc   : > { %v9297_v38 = vand.u32 4294901760, %v3456_v61  ;;  %v3376_v22 = vrot.slane %v3217_v32, 3  ;;  %v9944_v32 = vld [vmem:[#allocation33_spill] sm:$0xff] }
 0x2be   : > { %v9300_v31 = vsub.f32 %v3456_v61, %v9297_v38  ;;  %v3377_v46 = vsel %vm1313_vm3, %v3374_v8, %v3376_v22  ;;  %v9935_v8 = vld [vmem:[#allocation16_spill] sm:$0xff]  ;;  %v9943_v61 = vld [vmem:[#allocation31_spill] sm:$0xff] }
 0x2bf   : > { %v3458_v2 = vsel %vm262_vm0, %v3377_v46, 0  ;;  %v9945_v22 = vld [vmem:[#allocation35_spill] sm:$0xff]  ;;  %v9946_v46 = vld [vmem:[#allocation37_spill] sm:$0xff] }
 0x2c0   : > { %v3909_v12 = vand.u32 4294901760, %v9300_v31  ;;  %v9305_v3 = vand.u32 4294901760, %v3458_v2 }
 0x2c2   : > { %6426 = vmatprep.mubr.f32.mxu0 %v3909_v12  ;;  %v3910_v30 = vsub.f32 %v9300_v31, %v3909_v12  ;;  %v9309_v27 = vsub.f32 %v3458_v2, %v9305_v3  ;;  %v9947_v12 = vld [vmem:[#allocation39_spill] sm:$0xff]  ;;  %v9948_v2 = vld [vmem:[#allocation41_spill] sm:$0xff] }
 0x2c4   : > { %v3911_v37 = vand.u32 4294901760, %v3910_v30  ;;  %v3919_v25 = vand.u32 4294901760, %v9309_v27  ;;  %v9949_v30 = vld [vmem:[#allocation43_spill] sm:$0xff] }
 0x2c6   : > { %6234 = vmatprep.mubr.f32.mxu1 %v3911_v37  ;;  %6427 = vmatmul.mubr.f32.gmra.mrb[38].mxu0 %v3919_v25  ;;  %v3920_v28 = vsub.f32 %v9309_v27, %v3919_v25  ;;  %v9950_v37 = vld [vmem:[#allocation45_spill] sm:$0xff]  ;;  %v9951_v25 = vld [vmem:[#allocation47_spill] sm:$0xff] }
 0x2c7   : > { %6433 = vmatprep.mubr.f32.mxu0 %v7535_v60 }
 0x2c8   : > { %v3921_v47 = vand.u32 4294901760, %v3920_v28  ;;  %v9952_v28 = vld [vmem:[#allocation48_spill] sm:$0xff] }
 0x2ca   : > { %6235 = vmatmul.mubr.f32.gmra.mrb[38].mxu1 %v3921_v47  ;;  %6434 = vmatmul.mubr.f32.vlgmr.msra.gmra.mrb[0].mxu0 %v7537_v0  ;;  %v9953_v47 = vld [vmem:[#allocation49_spill] sm:$0xff] }
 0x2cb   : > { %6241 = vmatprep.mubr.f32.mxu1 %v7535_v60  ;;  %6436 = vmatprep.mubr.f32.mxu0 %v7637_v26 }
 0x2cc   : > { %6580 = vmatpush3.bf16.msra.mxu0 %v7322_v16  ;;  %v9915_v16 = vld [vmem:[#allocation22_spill] sm:$0xff] }
 0x2ce   : > { %6242 = vmatmul.mubr.f32.vlgmr.msra.gmra.mrb[0].mxu1 %v7537_v0  ;;  %6437 = vmatmul.mubr.f32.gmra.mrb[2].mxu0 %v7662_v18 }
 0x2cf   : > { %6568 = vmatpush3.bf16.msra.mxu1 %v6565_v53  ;;  %6244 = vmatprep.mubr.f32.mxu1 %v7637_v26  ;;  %v9919_v53 = vld [vmem:[#allocation30_spill] sm:$0xff] }
 0x2d0   : > { %6439 = vmatprep.mubr.f32.mxu0 %v7733_v44 }
 0x2d2   : > { %6245 = vmatmul.mubr.f32.gmra.mrb[2].mxu1 %v7662_v18  ;;  %6440 = vmatmul.mubr.f32.gmra.mrb[4].mxu0 %v9913_v4 }
 0x2d3   : > { %6247 = vmatprep.mubr.f32.mxu1 %v7733_v44  ;;  %6442 = vmatprep.mubr.f32.mxu0 %v9914_v48 }
 0x2d6   : > { %6248 = vmatmul.mubr.f32.gmra.mrb[4].mxu1 %v9913_v4  ;;  %6443 = vmatmul.mubr.f32.gmra.mrb[6].mxu0 %v9915_v16 }
 0x2d7   : > { %6250 = vmatprep.mubr.f32.mxu1 %v9914_v48  ;;  %6445 = vmatprep.mubr.f32.mxu0 %v9916_v1 }
 0x2da   : > { %6251 = vmatmul.mubr.f32.gmra.mrb[6].mxu1 %v9915_v16  ;;  %6446 = vmatmul.mubr.f32.gmra.mrb[8].mxu0 %v9917_v34 }
 0x2db   : > { %6253 = vmatprep.mubr.f32.mxu1 %v9916_v1  ;;  %6448 = vmatprep.mubr.f32.mxu0 %v9918_v54 }
 0x2de   : > { %6254 = vmatmul.mubr.f32.gmra.mrb[8].mxu1 %v9917_v34  ;;  %6449 = vmatmul.mubr.f32.gmra.mrb[10].mxu0 %v9919_v53 }
 0x2df   : > { %6256 = vmatprep.mubr.f32.mxu1 %v9918_v54  ;;  %6451 = vmatprep.mubr.f32.mxu0 %v9920_v15 }
 0x2e2   : > { %6257 = vmatmul.mubr.f32.gmra.mrb[10].mxu1 %v9919_v53  ;;  %6452 = vmatmul.mubr.f32.gmra.mrb[12].mxu0 %v9921_v41 }
 0x2e3   : > { %6259 = vmatprep.mubr.f32.mxu1 %v9920_v15  ;;  %6454 = vmatprep.mubr.f32.mxu0 %v9922_v24 }
 0x2e6   : > { %6260 = vmatmul.mubr.f32.gmra.mrb[12].mxu1 %v9921_v41  ;;  %6455 = vmatmul.mubr.f32.gmra.mrb[14].mxu0 %v9923_v55 }
 0x2e7   : > { %6262 = vmatprep.mubr.f32.mxu1 %v9922_v24  ;;  %6457 = vmatprep.mubr.f32.mxu0 %v9924_v39 }
 0x2ea   : > { %6263 = vmatmul.mubr.f32.gmra.mrb[14].mxu1 %v9923_v55  ;;  %6458 = vmatmul.mubr.f32.gmra.mrb[16].mxu0 %v9925_v7 }
 0x2eb   : > { %6265 = vmatprep.mubr.f32.mxu1 %v9924_v39  ;;  %6460 = vmatprep.mubr.f32.mxu0 %v9926_v21 }
 0x2ee   : > { %6266 = vmatmul.mubr.f32.gmra.mrb[16].mxu1 %v9925_v7  ;;  %6461 = vmatmul.mubr.f32.gmra.mrb[18].mxu0 %v9927_v17 }
 0x2ef   : > { %6268 = vmatprep.mubr.f32.mxu1 %v9926_v21  ;;  %6463 = vmatprep.mubr.f32.mxu0 %v8500_v63 }
 0x2f2   : > { %6269 = vmatmul.mubr.f32.gmra.mrb[18].mxu1 %v9927_v17  ;;  %6464 = vmatmul.mubr.f32.gmra.mrb[20].mxu0 %v8504_v19 }
 0x2f3   : > { %6271 = vmatprep.mubr.f32.mxu1 %v8500_v63  ;;  %6466 = vmatprep.mubr.f32.mxu0 %v9928_v10 }
 0x2f6   : > { %6272 = vmatmul.mubr.f32.gmra.mrb[20].mxu1 %v8504_v19  ;;  %6467 = vmatmul.mubr.f32.gmra.mrb[22].mxu0 %v9929_v57 }
 0x2f7   : > { %6274 = vmatprep.mubr.f32.mxu1 %v9928_v10  ;;  %6469 = vmatprep.mubr.f32.mxu0 %v9930_v29 }
 0x2fa   : > { %6275 = vmatmul.mubr.f32.gmra.mrb[22].mxu1 %v9929_v57  ;;  %6470 = vmatmul.mubr.f32.gmra.mrb[24].mxu0 %v9931_v33 }
 0x2fb   : > { %6277 = vmatprep.mubr.f32.mxu1 %v9930_v29  ;;  %6472 = vmatprep.mubr.f32.mxu0 %v8787_v56 }
 0x2fe   : > { %6278 = vmatmul.mubr.f32.gmra.mrb[24].mxu1 %v9931_v33  ;;  %6473 = vmatmul.mubr.f32.gmra.mrb[26].mxu0 %v8795_v5 }
 0x2ff   : > { %6280 = vmatprep.mubr.f32.mxu1 %v8787_v56  ;;  %6475 = vmatprep.mubr.f32.mxu0 %v8849_v35 }
 0x302   : > { %6281 = vmatmul.mubr.f32.gmra.mrb[26].mxu1 %v8795_v5  ;;  %6476 = vmatmul.mubr.f32.gmra.mrb[28].mxu0 %v8870_v49 }
 0x303   : > { %6283 = vmatprep.mubr.f32.mxu1 %v8849_v35  ;;  %6478 = vmatprep.mubr.f32.mxu0 %v8937_v6 }
 0x306   : > { %6284 = vmatmul.mubr.f32.gmra.mrb[28].mxu1 %v8870_v49  ;;  %6479 = vmatmul.mubr.f32.gmra.mrb[30].mxu0 %v8952_v20 }
 0x307   : > { %6286 = vmatprep.mubr.f32.mxu1 %v8937_v6  ;;  %6481 = vmatprep.mubr.f32.mxu0 %v9029_v43 }
 0x30a   : > { %6287 = vmatmul.mubr.f32.gmra.mrb[30].mxu1 %v8952_v20  ;;  %6482 = vmatmul.mubr.f32.gmra.mrb[32].mxu0 %v9060_v50 }
 0x30b   : > { %6289 = vmatprep.mubr.f32.mxu1 %v9029_v43  ;;  %6484 = vmatprep.mubr.f32.mxu0 %v9159_v59 }
 0x30e   : > { %6290 = vmatmul.mubr.f32.gmra.mrb[32].mxu1 %v9060_v50  ;;  %6485 = vmatmul.mubr.f32.gmra.mrb[34].mxu0 %v9171_v9 }
 0x30f   : > { %6292 = vmatprep.mubr.f32.mxu1 %v9159_v59  ;;  %6487 = vmatprep.mubr.f32.mxu0 %v9243_v11 }
 0x312   : > { %6293 = vmatmul.mubr.f32.gmra.mrb[34].mxu1 %v9171_v9  ;;  %6488 = vmatmul.mubr.f32.gmra.mrb[36].mxu0 %v9264_v52 }
 0x313   : > { %6295 = vmatprep.mubr.f32.mxu1 %v9243_v11  ;;  %6490 = vmatprep.mubr.f32.mxu0 %v9297_v38 }
 0x316   : > { %6296 = vmatmul.mubr.f32.gmra.mrb[36].mxu1 %v9264_v52  ;;  %6491 = vmatmul.mubr.f32.gmra.mrb[38].mxu0 %v9305_v3 }
 0x317   : > { %6298 = vmatprep.mubr.f32.mxu1 %v9297_v38  ;;  %6497 = vmatprep.mubr.f32.mxu0 %v7535_v60  ;;  %v9936_v60 = vld [vmem:[#allocation17_spill] sm:$0xff] }
 0x31a   : > { %6299 = vmatmul.mubr.f32.gmra.mrb[38].mxu1 %v9305_v3  ;;  %6498 = vmatmul.mubr.f32.vlgmr.msra.gmra.mrb[0].mxu0 %v7537_v0  ;;  %v9937_v0 = vld [vmem:[#allocation19_spill] sm:$0xff] }
 0x31b   : > { %6305 = vmatprep.mubr.f32.mxu1 %v9932_v23  ;;  %6500 = vmatprep.mubr.f32.mxu0 %v7637_v26  ;;  %v9938_v26 = vld [vmem:[#allocation21_spill] sm:$0xff] }
 0x31e   : > { %6306 = vmatmul.mubr.f32.vlgmr.msra.gmra.mrb[0].mxu1 %v9933_v45  ;;  %6501 = vmatmul.mubr.f32.gmra.mrb[2].mxu0 %v7662_v18  ;;  %v9939_v18 = vld [vmem:[#allocation23_spill] sm:$0xff] }
 0x31f   : > { %6308 = vmatprep.mubr.f32.mxu1 %v9934_v36  ;;  %6503 = vmatprep.mubr.f32.mxu0 %v7733_v44  ;;  %v9940_v44 = vld [vmem:[#allocation25_spill] sm:$0xff] }
 0x322   : > { %6309 = vmatmul.mubr.f32.gmra.mrb[2].mxu1 %v9935_v8  ;;  %6504 = vmatmul.mubr.f32.gmra.mrb[4].mxu0 %v9913_v4  ;;  %v9954_v4 = vld [vmem:[#allocation51_spill] sm:$0xff] }
 0x323   : > { %6311 = vmatprep.mubr.f32.mxu1 %v9936_v60  ;;  %6506 = vmatprep.mubr.f32.mxu0 %v9914_v48  ;;  %v9955_v48 = vld [vmem:[#allocation53_spill] sm:$0xff] }
 0x326   : > { %6312 = vmatmul.mubr.f32.gmra.mrb[4].mxu1 %v9937_v0  ;;  %6507 = vmatmul.mubr.f32.gmra.mrb[6].mxu0 %v9915_v16  ;;  %v9958_v16 = vld [vmem:[#allocation58_spill] sm:$0xff] }
 0x327   : > { %6314 = vmatprep.mubr.f32.mxu1 %v9938_v26  ;;  %6509 = vmatprep.mubr.f32.mxu0 %v9916_v1  ;;  %v9959_v1 = vld [vmem:[#allocation59_spill] sm:$0xff] }
 0x32a   : > { %6315 = vmatmul.mubr.f32.gmra.mrb[6].mxu1 %v9939_v18  ;;  %6510 = vmatmul.mubr.f32.gmra.mrb[8].mxu0 %v9917_v34  ;;  %v9960_v34 = vld [vmem:[#allocation60_spill] sm:$0xff] }
 0x32b   : > { %6317 = vmatprep.mubr.f32.mxu1 %v9940_v44  ;;  %6512 = vmatprep.mubr.f32.mxu0 %v9918_v54  ;;  %v9961_v54 = vld [vmem:[#allocation61_spill] sm:$0xff] }
 0x32e   : > { %6318 = vmatmul.mubr.f32.gmra.mrb[8].mxu1 %v9941_v42  ;;  %6513 = vmatmul.mubr.f32.gmra.mrb[10].mxu0 %v9919_v53 }
 0x32f   : > { %6320 = vmatprep.mubr.f32.mxu1 %v9942_v14  ;;  %6515 = vmatprep.mubr.f32.mxu0 %v9920_v15 }
 0x332   : > { %6321 = vmatmul.mubr.f32.gmra.mrb[10].mxu1 %v9943_v61  ;;  %6516 = vmatmul.mubr.f32.gmra.mrb[12].mxu0 %v9921_v41 }
 0x333   : > { %6323 = vmatprep.mubr.f32.mxu1 %v9944_v32  ;;  %6518 = vmatprep.mubr.f32.mxu0 %v9922_v24 }
 0x336   : > { %6324 = vmatmul.mubr.f32.gmra.mrb[12].mxu1 %v9945_v22  ;;  %6519 = vmatmul.mubr.f32.gmra.mrb[14].mxu0 %v9923_v55 }
 0x337   : > { %6326 = vmatprep.mubr.f32.mxu1 %v9946_v46  ;;  %6521 = vmatprep.mubr.f32.mxu0 %v9924_v39 }
 0x33a   : > { %6327 = vmatmul.mubr.f32.gmra.mrb[14].mxu1 %v9947_v12  ;;  %6522 = vmatmul.mubr.f32.gmra.mrb[16].mxu0 %v9925_v7 }
 0x33b   : > { %6329 = vmatprep.mubr.f32.mxu1 %v9948_v2  ;;  %6524 = vmatprep.mubr.f32.mxu0 %v9926_v21 }
 0x33e   : > { %6330 = vmatmul.mubr.f32.gmra.mrb[16].mxu1 %v9949_v30  ;;  %6525 = vmatmul.mubr.f32.gmra.mrb[18].mxu0 %v9927_v17 }
 0x33f   : > { %6332 = vmatprep.mubr.f32.mxu1 %v9950_v37  ;;  %6527 = vmatprep.mubr.f32.mxu0 %v8500_v63  ;;  %v9956_v63 = vld [vmem:[#allocation55_spill] sm:$0xff] }
 0x342   : > { %6333 = vmatmul.mubr.f32.gmra.mrb[18].mxu1 %v9951_v25  ;;  %6528 = vmatmul.mubr.f32.gmra.mrb[20].mxu0 %v8504_v19  ;;  %v9957_v19 = vld [vmem:[#allocation57_spill] sm:$0xff] }
 0x343   : > { %6335 = vmatprep.mubr.f32.mxu1 %v9952_v28  ;;  %6530 = vmatprep.mubr.f32.mxu0 %v9928_v10 }
 0x346   : > { %6336 = vmatmul.mubr.f32.gmra.mrb[20].mxu1 %v9953_v47  ;;  %6531 = vmatmul.mubr.f32.gmra.mrb[22].mxu0 %v9929_v57 }
 0x347   : > { %6338 = vmatprep.mubr.f32.mxu1 %v9954_v4  ;;  %6533 = vmatprep.mubr.f32.mxu0 %v9930_v29 }
 0x34a   : > { %6339 = vmatmul.mubr.f32.gmra.mrb[22].mxu1 %v9955_v48  ;;  %6534 = vmatmul.mubr.f32.gmra.mrb[24].mxu0 %v9931_v33 }
 0x34b   : > { %6341 = vmatprep.mubr.f32.mxu1 %v9956_v63  ;;  %6536 = vmatprep.mubr.f32.mxu0 %v8787_v56  ;;  %v9962_v56 = vld [vmem:[#allocation62_spill] sm:$0xff] }
 0x34e   : > { %6342 = vmatmul.mubr.f32.gmra.mrb[24].mxu1 %v9957_v19  ;;  %6537 = vmatmul.mubr.f32.gmra.mrb[26].mxu0 %v8795_v5  ;;  %v9963_v5 = vld [vmem:[#allocation63_spill] sm:$0xff] }
 0x34f   : > { %6344 = vmatprep.mubr.f32.mxu1 %v9958_v16  ;;  %6539 = vmatprep.mubr.f32.mxu0 %v8849_v35  ;;  %v9964_v35 = vld [vmem:[#allocation64_spill] sm:$0xff] }
 0x352   : > { %6345 = vmatmul.mubr.f32.gmra.mrb[26].mxu1 %v9959_v1  ;;  %6540 = vmatmul.mubr.f32.gmra.mrb[28].mxu0 %v8870_v49 }
 0x353   : > { %6347 = vmatprep.mubr.f32.mxu1 %v9960_v34  ;;  %6542 = vmatprep.mubr.f32.mxu0 %v8937_v6 }
 0x356   : > { %6348 = vmatmul.mubr.f32.gmra.mrb[28].mxu1 %v9961_v54  ;;  %6543 = vmatmul.mubr.f32.gmra.mrb[30].mxu0 %v8952_v20 }
 0x357   : > { %6350 = vmatprep.mubr.f32.mxu1 %v9962_v56  ;;  %6545 = vmatprep.mubr.f32.mxu0 %v9029_v43 }
 0x35a   : > { %6351 = vmatmul.mubr.f32.gmra.mrb[30].mxu1 %v8959_v62  ;;  %6546 = vmatmul.mubr.f32.gmra.mrb[32].mxu0 %v9060_v50 }
 0x35b   : > { %6353 = vmatprep.mubr.f32.mxu1 %v9963_v5  ;;  %6548 = vmatprep.mubr.f32.mxu0 %v9159_v59 }
 0x35e   : > { %6354 = vmatmul.mubr.f32.gmra.mrb[32].mxu1 %v9070_v51  ;;  %6549 = vmatmul.mubr.f32.gmra.mrb[34].mxu0 %v9171_v9 }
 0x35f   : > { %6356 = vmatprep.mubr.f32.mxu1 %v9169_v40  ;;  %6551 = vmatprep.mubr.f32.mxu0 %v9243_v11 }
 0x362   : > { %6357 = vmatmul.mubr.f32.gmra.mrb[34].mxu1 %v9178_v58  ;;  %6552 = vmatmul.mubr.f32.gmra.mrb[36].mxu0 %v9264_v52 }
 0x363   : > { %6359 = vmatprep.mubr.f32.mxu1 %v9964_v35  ;;  %6554 = vmatprep.mubr.f32.mxu0 %v9297_v38 }
 0x366   : > { %6360 = vmatmul.mubr.f32.gmra.mrb[36].mxu1 %v9271_v13  ;;  %6555 = vmatmul.mubr.f32.gmra.mrb[38].mxu0 %v9305_v3 }
 0x367   : > { %6362 = vmatprep.mubr.f32.mxu1 %v9300_v31 }
 0x36a   : > { %6363 = vmatmul.mubr.f32.gmra.mrb[38].mxu1 %v9309_v27 }
 0x3ed   : > { %v6499_v49 = vpop.f32.mrb[0].mxu0 }
 0x3ee   : > { %v5358_v6 = vpop.f32.mrb[1].mxu0 }
 0x3f1   : > { %v6307_v20 = vpop.f32.mrb[0].mxu1  ;;  %v6502_v62 = vpop.f32.mrb[2].mxu0 }
 0x3f2   : > { %v6581_v43 = vadd.f32 %v6499_v49, %v6307_v20  ;;  %v4314_v50 = vpop.f32.mrb[1].mxu1  ;;  %v5370_v51 = vpop.f32.mrb[3].mxu0 }
 0x3f3   : > { %v6582_v59 = vadd.f32 %v5358_v6, %v4314_v50 }
 0x3f4   : > { %v9474_v45 = vmul.f32 %v6581_v43, %v6581_v43 }
 0x3f5   : > { %v6310_v40 = vpop.f32.mrb[2].mxu1  ;;  %v6505_v9 = vpop.f32.mrb[4].mxu0  ;;  %v9480_v60 = vmul.f32 %v6582_v59, %v6582_v59 }
 0x3f6   : > { %v6583_v58 = vadd.f32 %v6502_v62, %v6310_v40  ;;  %v4328_v11 = vpop.f32.mrb[3].mxu1  ;;  %v5382_v52 = vpop.f32.mrb[5].mxu0 }
 0x3f7   : > { %v6584_v13 = vadd.f32 %v5370_v51, %v4328_v11 }
 0x3f8   : > { %v9494_v12 = vmul.f32 %v6583_v58, %v6583_v58 }
 0x3f9   : > { %v6313_v38 = vpop.f32.mrb[4].mxu1  ;;  %v6508_v3 = vpop.f32.mrb[6].mxu0  ;;  %v9500_v37 = vmul.f32 %v6584_v13, %v6584_v13 }
 0x3fa   : > { %v6585_v53 = vadd.f32 %v6505_v9, %v6313_v38  ;;  %v4342_v31 = vpop.f32.mrb[5].mxu1  ;;  %v5394_v15 = vpop.f32.mrb[7].mxu0 }
 0x3fb   : > { %v6586_v27 = vadd.f32 %v5382_v52, %v4342_v31 }
 0x3fc   : > { %v9514_v54 = vmul.f32 %v6585_v53, %v6585_v53 }
 0x3fd   : > { %v6316_v41 = vpop.f32.mrb[6].mxu1  ;;  %v6511_v24 = vpop.f32.mrb[8].mxu0  ;;  %v9520_v35 = vmul.f32 %v6586_v27, %v6586_v27 }
 0x3fe   : > { %v6587_v55 = vadd.f32 %v6508_v3, %v6316_v41  ;;  %v4356_v39 = vpop.f32.mrb[7].mxu1  ;;  %v5406_v7 = vpop.f32.mrb[9].mxu0 }
 0x3ff   : > { %v6588_v21 = vadd.f32 %v5394_v15, %v4356_v39 }
 0x401   : > { %v6319_v17 = vpop.f32.mrb[8].mxu1  ;;  %v6514_v10 = vpop.f32.mrb[10].mxu0 }
 0x402   : > { %v6589_v57 = vadd.f32 %v6511_v24, %v6319_v17  ;;  %v4370_v29 = vpop.f32.mrb[9].mxu1  ;;  %v5418_v33 = vpop.f32.mrb[11].mxu0 }
 0x403   : > { %v6590_v23 = vadd.f32 %v5406_v7, %v4370_v29 }
 0x404   : > { %v9476_v36 = vmul.f32 %v6589_v57, %v6589_v57  ;;  %v9478_v8 = vmul.f32 %v6589_v57, %v6581_v43 }
 0x405   : > { %v9482_v0 = vmul.f32 %v6590_v23, %v6590_v23  ;;  %v9484_v26 = vmul.f32 %v6590_v23, %v6582_v59  ;;  %v6322_v18 = vpop.f32.mrb[10].mxu1  ;;  %v6517_v44 = vpop.f32.mrb[12].mxu0 }
 0x406   : > { %v9488_v42 = vadd.f32 %v9476_v36, %v9474_v45  ;;  %v6591_v14 = vadd.f32 %v6514_v10, %v6322_v18  ;;  %v4384_v61 = vpop.f32.mrb[11].mxu1  ;;  %v5430_v32 = vpop.f32.mrb[13].mxu0 }
 0x407   : > { %v9492_v22 = vadd.f32 %v9482_v0, %v9480_v60  ;;  %v6592_v46 = vadd.f32 %v5418_v33, %v4384_v61 }
 0x408   : > { %v9496_v2 = vmul.f32 %v6591_v14, %v6591_v14  ;;  %v9498_v30 = vmul.f32 %v6591_v14, %v6583_v58  ;;  %v9534_v58 = vmul.f32 %v6587_v55, %v6587_v55 }
 0x409   : > { %v9502_v25 = vmul.f32 %v6592_v46, %v6592_v46  ;;  %v9504_v28 = vmul.f32 %v6592_v46, %v6584_v13  ;;  %v6325_v47 = vpop.f32.mrb[12].mxu1  ;;  %v6520_v4 = vpop.f32.mrb[14].mxu0  ;;  %v9540_v13 = vmul.f32 %v6588_v21, %v6588_v21 }
 0x40a   : > { %v9508_v48 = vadd.f32 %v9496_v2, %v9494_v12  ;;  %v6593_v63 = vadd.f32 %v6517_v44, %v6325_v47  ;;  %v4398_v19 = vpop.f32.mrb[13].mxu1  ;;  %v5442_v16 = vpop.f32.mrb[15].mxu0 }
 0x40b   : > { %v9512_v1 = vadd.f32 %v9502_v25, %v9500_v37  ;;  %v6594_v34 = vadd.f32 %v5430_v32, %v4398_v19 }
 0x40c   : > { %v9516_v56 = vmul.f32 %v6593_v63, %v6593_v63  ;;  %v9518_v5 = vmul.f32 %v6593_v63, %v6585_v53 }
 0x40d   : > { %v9522_v49 = vmul.f32 %v6594_v34, %v6594_v34  ;;  %v9524_v6 = vmul.f32 %v6594_v34, %v6586_v27  ;;  %v6328_v20 = vpop.f32.mrb[14].mxu1  ;;  %v6523_v62 = vpop.f32.mrb[16].mxu0 }
 0x40e   : > { %v9528_v43 = vadd.f32 %v9516_v56, %v9514_v54  ;;  %v6595_v50 = vadd.f32 %v6520_v4, %v6328_v20  ;;  %v4412_v51 = vpop.f32.mrb[15].mxu1  ;;  %v5454_v59 = vpop.f32.mrb[17].mxu0 }
 0x40f   : > { %v9532_v40 = vadd.f32 %v9522_v49, %v9520_v35  ;;  %v6596_v9 = vadd.f32 %v5442_v16, %v4412_v51 }
 0x410   : > { %v9536_v11 = vmul.f32 %v6595_v50, %v6595_v50  ;;  %v9538_v52 = vmul.f32 %v6595_v50, %v6587_v55 }
 0x411   : > { %v9542_v38 = vmul.f32 %v6596_v9, %v6596_v9  ;;  %v9544_v3 = vmul.f32 %v6596_v9, %v6588_v21  ;;  %v6331_v53 = vpop.f32.mrb[16].mxu1  ;;  %v6526_v31 = vpop.f32.mrb[18].mxu0 }
 0x412   : > { %v9548_v15 = vadd.f32 %v9536_v11, %v9534_v58  ;;  %v6597_v27 = vadd.f32 %v6523_v62, %v6331_v53  ;;  %v4426_v41 = vpop.f32.mrb[17].mxu1  ;;  %v5466_v24 = vpop.f32.mrb[19].mxu0 }
 0x413   : > { %v9552_v39 = vadd.f32 %v9542_v38, %v9540_v13  ;;  %v6598_v55 = vadd.f32 %v5454_v59, %v4426_v41  ;;  %v5645_v59 = vmul.f32 2.0, %v9478_v8 }
 0x414   : > { %v5621_v7 = vsub.f32 %v6597_v27, %v9474_v45  ;;  %v5644_v27 = vmul.f32 2.0, %v9484_v26 }
 0x415   : > { %v5620_v17 = vsub.f32 %v6598_v55, %v9480_v60  ;;  %v6334_v21 = vpop.f32.mrb[18].mxu1  ;;  %v6529_v10 = vpop.f32.mrb[20].mxu0  ;;  %v5647_v55 = vmul.f32 2.0, %v9498_v30 }
 0x416   : > { %v6599_v57 = vadd.f32 %v6526_v31, %v6334_v21  ;;  %v4440_v29 = vpop.f32.mrb[19].mxu1  ;;  %v5478_v33 = vpop.f32.mrb[21].mxu0 }
 0x417   : > { %v6600_v23 = vadd.f32 %v5466_v24, %v4440_v29  ;;  %v9579_v29 = vadd.f32 0.0001, %v5645_v59 }
 0x418   : > { %v5623_v18 = vsub.f32 %v6599_v57, %v9494_v12 }
 0x419   : > { %v5622_v44 = vsub.f32 %v6600_v23, %v9500_v37  ;;  %v6337_v14 = vpop.f32.mrb[20].mxu1  ;;  %v6532_v61 = vpop.f32.mrb[22].mxu0 }
 0x41a   : > { %v9558_v32 = vadd.f32 %v6529_v10, %v6337_v14  ;;  %v4454_v46 = vpop.f32.mrb[21].mxu1  ;;  %v5490_v47 = vpop.f32.mrb[23].mxu0 }
 0x41b   : > { %v9560_v4 = vadd.f32 %v5478_v33, %v4454_v46  ;;  %v5693_v46 = vadd.f32 0.0001, %v9488_v42  ;;  %v5695_v42 = vadd.f32 0.0001, %v9508_v48  ;;  %v5694_v48 = vadd.f32 0.0001, %v9512_v1 }
 0x41c   : > { %v5625_v45 = vsub.f32 %v9558_v32, %v9514_v54  ;;  %v5696_v32 = vadd.f32 0.0001, %v9532_v40  ;;  %v9630_v40 = vmul.f32 2.0, %v9538_v52 }
 0x41d   : > { %v5624_v60 = vsub.f32 %v9560_v4, %v9520_v35  ;;  %v6340_v63 = vpop.f32.mrb[22].mxu1  ;;  %v6535_v19 = vpop.f32.mrb[24].mxu0 }
 0x41e   : > { %v9566_v16 = vadd.f32 %v6532_v61, %v6340_v63  ;;  %v4468_v12 = vpop.f32.mrb[23].mxu1  ;;  %v5502_v37 = vpop.f32.mrb[25].mxu0 }
 0x41f   : > { %v9568_v34 = vadd.f32 %v5490_v47, %v4468_v12  ;;  %v9582_v47 = vadd.f32 0.0001, %v5644_v27  ;;  %v5646_v12 = vmul.f32 2.0, %v9504_v28 }
 0x420   : > { %v5627_v20 = vsub.f32 %v9566_v16, %v9534_v58  ;;  %v5698_v16 = vadd.f32 0.0001, %v9552_v39 }
 0x421   : > { %v5626_v62 = vsub.f32 %v9568_v34, %v9540_v13  ;;  %v6343_v50 = vpop.f32.mrb[24].mxu1  ;;  %v6538_v51 = vpop.f32.mrb[26].mxu0  ;;  %v9644_v13 = vmul.f32 2.0, %v9544_v3 }
 0x422   : > { %v6605_v9 = vadd.f32 %v6535_v19, %v6343_v50  ;;  %v4482_v53 = vpop.f32.mrb[25].mxu1  ;;  %v5514_v31 = vpop.f32.mrb[27].mxu0  ;;  %v9587_v50 = vadd.f32 0.0001, %v5647_v55 }
 0x423   : > { %v6606_v41 = vadd.f32 %v5502_v37, %v4482_v53 }
 0x424   : > { %v5629_v24 = vsub.f32 %v6605_v9, %v9476_v36  ;;  %v5692_v36 = vadd.f32 0.0001, %v9492_v22 }
 0x425   : > { %v5628_v21 = vsub.f32 %v6606_v41, %v9482_v0  ;;  %v6346_v10 = vpop.f32.mrb[26].mxu1  ;;  %v6541_v57 = vpop.f32.mrb[28].mxu0  ;;  %v5649_v41 = vmul.f32 2.0, %v9518_v5 }
 0x426   : > { %v5701_v33 = vadd.f32 %v5629_v24, %v5621_v7  ;;  %v6607_v23 = vadd.f32 %v6538_v51, %v6346_v10  ;;  %v4496_v14 = vpop.f32.mrb[27].mxu1  ;;  %v5526_v61 = vpop.f32.mrb[29].mxu0 }
 0x427   : > { %v5700_v63 = vadd.f32 %v5628_v21, %v5620_v17  ;;  %v6608_v19 = vadd.f32 %v5514_v31, %v4496_v14  ;;  %v9596_v21 = vadd.f32 0.0001, %v5646_v12  ;;  %v5648_v14 = vmul.f32 2.0, %v9524_v6 }
 0x428   : > { %v5709_v37 = vadd.f32 0.0009, %v5701_v33  ;;  %v5631_v0 = vsub.f32 %v6607_v23, %v9496_v2  ;;  %v5697_v12 = vadd.f32 0.0001, %v9528_v43 }
 0x429   : > { %v5708_v59 = vadd.f32 0.0009, %v5700_v63  ;;  %v5630_v7 = vsub.f32 %v6608_v19, %v9502_v25  ;;  %v6349_v51 = vpop.f32.mrb[28].mxu1  ;;  %v6544_v9 = vpop.f32.mrb[30].mxu0  ;;  %v9609_v19 = vadd.f32 0.0001, %v5649_v41 }
 0x42a   : > { %v9591_v53 = vmul.f32 %v5709_v37, %v5693_v46  ;;  %v5703_v17 = vadd.f32 %v5631_v0, %v5623_v18  ;;  %v6609_v31 = vadd.f32 %v6541_v57, %v6349_v51  ;;  %v4510_v27 = vpop.f32.mrb[29].mxu1  ;;  %v5538_v22 = vpop.f32.mrb[31].mxu0  ;;  %v9622_v51 = vadd.f32 0.0001, %v5648_v14 }
 0x42b   : > { %v9594_v24 = vmul.f32 %v5708_v59, %v5692_v36  ;;  %v5702_v2 = vadd.f32 %v5630_v7, %v5622_v44  ;;  %v6610_v55 = vadd.f32 %v5526_v61, %v4510_v27 }
 0x42c   : > { %6848 = vrcp.f32 %v9591_v53  ;;  %v5711_v25 = vadd.f32 0.0009, %v5703_v17  ;;  %v5633_v10 = vsub.f32 %v6609_v31, %v9516_v56  ;;  %v5699_v17 = vadd.f32 0.0001, %v9548_v15 }
 0x42d   : > { %6850 = vrcp.f32 %v9594_v24  ;;  %v5710_v18 = vadd.f32 0.0009, %v5702_v2  ;;  %v5632_v57 = vsub.f32 %v6610_v55, %v9522_v49  ;;  %v6352_v33 = vpop.f32.mrb[30].mxu1  ;;  %v6547_v23 = vpop.f32.mrb[32].mxu0 }
 0x42e   : > { %v9604_v44 = vmul.f32 %v5711_v25, %v5695_v42  ;;  %v5705_v61 = vadd.f32 %v5633_v10, %v5625_v45  ;;  %v6611_v46 = vadd.f32 %v6544_v9, %v6352_v33  ;;  %v4524_v63 = vpop.f32.mrb[31].mxu1  ;;  %v5550_v56 = vpop.f32.mrb[33].mxu0 }
 0x42f   : > { %v9611_v1 = vmul.f32 %v5710_v18, %v5694_v48  ;;  %v5704_v49 = vadd.f32 %v5632_v57, %v5624_v60  ;;  %v6612_v36 = vadd.f32 %v5538_v22, %v4524_v63 }
 0x430   : > { %6852 = vrcp.f32 %v9604_v44  ;;  %v5713_v37 = vadd.f32 0.0009, %v5705_v61  ;;  %v5635_v54 = vsub.f32 %v6611_v46, %v9536_v11 }
 0x431   : > { %6854 = vrcp.f32 %v9611_v1  ;;  %v5712_v45 = vadd.f32 0.0009, %v5704_v49  ;;  %v5634_v0 = vsub.f32 %v6612_v36, %v9542_v38  ;;  %v6355_v59 = vpop.f32.mrb[32].mxu1  ;;  %v6550_v7 = vpop.f32.mrb[34].mxu0 }
 0x432   : > { %v9624_v35 = vmul.f32 %v5713_v37, %v5697_v12  ;;  %v5707_v43 = vadd.f32 %v5635_v54, %v5627_v20  ;;  %v6613_v4 = vadd.f32 %v6547_v23, %v6355_v59  ;;  %v4538_v60 = vpop.f32.mrb[33].mxu1  ;;  %v5562_v11 = vpop.f32.mrb[35].mxu0 }
 0x433   : > { %v9632_v9 = vmul.f32 %v5712_v45, %v5696_v32  ;;  %v5706_v38 = vadd.f32 %v5634_v0, %v5626_v62  ;;  %v6614_v42 = vadd.f32 %v5550_v56, %v4538_v60 }
 0x434   : > { %6856 = vrcp.f32 %v9624_v35  ;;  %v5715_v31 = vadd.f32 0.0009, %v5707_v43  ;;  %v5637_v58 = vsub.f32 %v6613_v4, %v9478_v8 }
 0x435   : > { %6858 = vrcp.f32 %v9632_v9  ;;  %v5714_v20 = vadd.f32 0.0009, %v5706_v38  ;;  %v5636_v27 = vsub.f32 %v6614_v42, %v9484_v26  ;;  %v6358_v22 = vpop.f32.mrb[34].mxu1  ;;  %v6553_v41 = vpop.f32.mrb[36].mxu0 }
 0x436   : > { %v6849_v2 = vpop.eup %6848  ;;  %v9646_v34 = vmul.f32 %v5715_v31, %v5699_v17  ;;  %v5661_v15 = vmul.f32 2.0, %v5637_v58  ;;  %v6615_v62 = vadd.f32 %v6550_v7, %v6358_v22  ;;  %v4552_v55 = vpop.f32.mrb[35].mxu1 }
 0x437   : > { %v5574_v25 = vpop.f32.mrb[37].mxu0  ;;  %v6851_v8 = vpop.eup %6850  ;;  %v5733_v39 = vmul.f32 %v6849_v2, %v9591_v53  ;;  %v9649_v10 = vmul.f32 %v5714_v20, %v5698_v16  ;;  %v5660_v48 = vmul.f32 2.0, %v5636_v27  ;;  %v6616_v18 = vadd.f32 %v5562_v11, %v4552_v55 }
 0x438   : > { %v5732_v26 = vmul.f32 %v6851_v8, %v9594_v24  ;;  %6860 = vrcp.f32 %v9646_v34  ;;  %v5669_v57 = vadd.f32 0.0009, %v5661_v15  ;;  %v5639_v33 = vsub.f32 %v6615_v62, %v9498_v30 }
 0x439   : > { %v5741_v23 = vsub.f32 2.0, %v5733_v39  ;;  %6862 = vrcp.f32 %v9649_v10  ;;  %v5668_v14 = vadd.f32 0.0009, %v5660_v48  ;;  %v5638_v61 = vsub.f32 %v6616_v18, %v9504_v28  ;;  %v6361_v46 = vpop.f32.mrb[36].mxu1  ;;  %v6556_v63 = vpop.f32.mrb[38].mxu0 }
 0x43a   : > { %v6853_v53 = vpop.eup %6852  ;;  %v5740_v56 = vsub.f32 2.0, %v5732_v26  ;;  %v5677_v49 = vmul.f32 %v5669_v57, %v9579_v29  ;;  %v5663_v36 = vmul.f32 2.0, %v5639_v33  ;;  %v6617_v12 = vadd.f32 %v6553_v41, %v6361_v46  ;;  %v4566_v24 = vpop.f32.mrb[37].mxu1 }
 0x43b   : > { %v5586_v37 = vpop.f32.mrb[39].mxu0  ;;  %v6855_v54 = vpop.eup %6854  ;;  %v5735_v32 = vmul.f32 %v6853_v53, %v9604_v44  ;;  %v5749_v30 = vmul.f32 %v6849_v2, %v5741_v23  ;;  %v5676_v45 = vmul.f32 %v5668_v14, %v9582_v47  ;;  %v5662_v0 = vmul.f32 2.0, %v5638_v61 }
 0x43c   : > { %v5734_v59 = vmul.f32 %v6855_v54, %v9611_v1  ;;  %v5748_v28 = vmul.f32 %v6851_v8, %v5740_v56  ;;  %v5671_v7 = vadd.f32 0.0009, %v5663_v36  ;;  %v5641_v43 = vsub.f32 %v6617_v12, %v9518_v5 }
 0x43d   : > { %v5743_v4 = vsub.f32 2.0, %v5735_v32  ;;  %v5757_v29 = vmul.f32 %v5749_v30, %v5677_v49  ;;  %v5670_v60 = vadd.f32 0.0009, %v5662_v0  ;;  %v6618_v11 = vadd.f32 %v5574_v25, %v4566_v24  ;;  %v6364_v38 = vpop.f32.mrb[38].mxu1 }
 0x43e   : > { %v6857_v42 = vpop.eup %6856  ;;  %v5742_v17 = vsub.f32 2.0, %v5734_v59  ;;  %v5756_v31 = vmul.f32 %v5748_v28, %v5676_v45  ;;  %v5679_v44 = vmul.f32 %v5671_v7, %v9587_v50  ;;  %v5665_v58 = vmul.f32 2.0, %v5641_v43  ;;  %v4580_v47 = vpop.f32.mrb[39].mxu1 }
 0x43f   : > { %v6859_v16 = vpop.eup %6858  ;;  %v5737_v1 = vmul.f32 %v6857_v42, %v9624_v35  ;;  %5765 = vst.msk [vmem:[%s9664_s8 + $0x8] sm:$0xff] %vm262_vm0, %v5757_v29  ;;  %v5751_v5 = vmul.f32 %v6853_v53, %v5743_v4  ;;  %v5678_v20 = vmul.f32 %v5670_v60, %v9596_v21  ;;  %v5640_v27 = vsub.f32 %v6618_v11, %v9524_v6 }
 0x440   : > { %v5736_v22 = vmul.f32 %v6859_v16, %v9632_v9  ;;  %5764 = vst.msk [vmem:[%s9664_s8] sm:$0xff] %vm262_vm0, %v5756_v31  ;;  %v5750_v50 = vmul.f32 %v6855_v54, %v5742_v17  ;;  %v5673_v41 = vadd.f32 0.0009, %v5665_v58  ;;  %v6619_v2 = vadd.f32 %v6556_v63, %v6364_v38 }
 0x441   : > { %v5745_v35 = vsub.f32 2.0, %v5737_v1  ;;  %v5759_v15 = vmul.f32 %v5751_v5, %v5679_v44  ;;  %v5664_v62 = vmul.f32 2.0, %v5640_v27  ;;  %v6620_v55 = vadd.f32 %v5586_v37, %v4580_v47 }
 0x442   : > { %v6861_v25 = vpop.eup %6860  ;;  %v5744_v8 = vsub.f32 2.0, %v5736_v22  ;;  %v5758_v39 = vmul.f32 %v5750_v50, %v5678_v20  ;;  %v5681_v21 = vmul.f32 %v5673_v41, %v9609_v19  ;;  %v5643_v6 = vsub.f32 %v6619_v2, %v9538_v52 }
 0x443   : > { %v6863_v48 = vpop.eup %6862  ;;  %v5739_v9 = vmul.f32 %v6861_v25, %v9646_v34  ;;  %5767 = vst.msk [vmem:[%s9664_s8 + $0x18] sm:$0xff] %vm262_vm0, %v5759_v15  ;;  %v5753_v18 = vmul.f32 %v6857_v42, %v5745_v35  ;;  %v5672_v26 = vadd.f32 0.0009, %v5664_v62  ;;  %v5642_v57 = vsub.f32 %v6620_v55, %v9544_v3 }
 0x444   : > { %v5738_v33 = vmul.f32 %v6863_v48, %v9649_v10  ;;  %5766 = vst.msk [vmem:[%s9664_s8 + $0x10] sm:$0xff] %vm262_vm0, %v5758_v39  ;;  %v5752_v23 = vmul.f32 %v6859_v16, %v5744_v8  ;;  %v5667_v19 = vmul.f32 2.0, %v5643_v6  ;;  %v5659_v46 = vadd.f32 0.0001, %v9630_v40 }
 0x445   : > { %v5747_v14 = vsub.f32 2.0, %v5739_v9  ;;  %v5761_v52 = vmul.f32 %v5753_v18, %v5681_v21  ;;  %v5680_v34 = vmul.f32 %v5672_v26, %v9622_v51  ;;  %v5666_v61 = vmul.f32 2.0, %v5642_v57 }
 0x446   : > { %v5746_v63 = vsub.f32 2.0, %v5738_v33  ;;  %v5675_v53 = vadd.f32 0.0009, %v5667_v19  ;;  %v5658_v3 = vadd.f32 0.0001, %v9644_v13 }
 0x447   : > { %5769 = vst.msk [vmem:[%s9664_s8 + $0x28] sm:$0xff] %vm262_vm0, %v5761_v52  ;;  %v5760_v10 = vmul.f32 %v5752_v23, %v5680_v34  ;;  %v5755_v56 = vmul.f32 %v6861_v25, %v5747_v14  ;;  %v5674_v49 = vadd.f32 0.0009, %v5666_v61 }
 0x448   : > { %v5683_v36 = vmul.f32 %v5675_v53, %v5659_v46  ;;  %v5754_v51 = vmul.f32 %v6863_v48, %v5746_v63 }
 0x449   : > { %5768 = vst.msk [vmem:[%s9664_s8 + $0x20] sm:$0xff] %vm262_vm0, %v5760_v10  ;;  %v5682_v40 = vmul.f32 %v5674_v49, %v5658_v3 }
 0x44a   : > { %v5763_v12 = vmul.f32 %v5755_v56, %v5683_v36 }
 0x44b   : > { %v5762_v13 = vmul.f32 %v5754_v51, %v5682_v40 }
 0x44c   : > { %5771 = vst.msk [vmem:[%s9664_s8 + $0x38] sm:$0xff] %vm262_vm0, %v5763_v12 }
 0x44d   : > { %5770 = vst.msk [vmem:[%s9664_s8 + $0x30] sm:$0xff] %vm262_vm0, %v5762_v13 }
 0x44e   : > { %6965 = shalt.err (!%p6962_p10)
}
 0x44f   : > { %s6966_s28 = scalar_lea.hbm %s9694_s24, 1024  ;;  %s6970_s23 = scalar_lea.hbm %s9749_s3, 2048 }
 0x450   : > { %p6967_p8 = scmp.ne.s32.totalorder %s9694_s24, %s6966_s28  ;;  %p6971_p12 = scmp.lt.u32.totalorder %s9694_s24, %s9749_s3 }
 0x451   : > { %p6972_p6 = scmp.lt.u32.totalorder %s6970_s23, %s6966_s28  ;;  %p6974_p9 = scmp.lt.u32.totalorder %s6966_s28, %s9694_s24 }
 0x452   : > { %p6968_p7 = pnand %p6967_p8, %p9965_p1 }
 0x453   : > { %p6973_p0 = por %p6972_p6, %p6971_p12 }
 0x454   : > { %p6969_p3 = pneg %p6968_p7 }
 0x455   : > { %p6975_p11 = por %p6974_p9, %p6973_p0 }
 0x457   : > { %p6976_p13 = pnand %p6975_p11, %p6969_p3 }
 0x459   : > { %6979 = shalt.err (!%p6976_p13)
}
 0x45a   : > { %s7031_s21 = smov 128   ;;  %s7032_s5 = smov 8  }
 0x45b   : > { %6789 = dma.vmem_to_hbm [thread:$0]  (%p9965_p1), %s9696_s17, 1024, %s9694_s24, %s9704_s27, %s7031_s21, %s7031_s21, %s7032_s5  }
 0x45c PF: > { %s5802_s8 = sand.u32 1, %s7010_s12   ;;  %p9966_p4 = scmp.ne.s32.totalorder %s9828_s26, 0 }
 0x45d   : > { %p9967_p2 = scmp.ge.s32.totalorder %s7022_s15, 2  ;;  %s5803_s10 = scalar_lea.sflag [#allocation5], %s5802_s8 }
 0x45f   : > { %p6803_p5 = pnand %p9967_p2, %p9966_p4 }
 0x461   : > { %7005 = dma.done.wait (!%p6803_p5), %s5803_s10, 1024  }
 0x462   : > { %7007 = vsyncadd (!%p6803_p5), %s5803_s10, 4294966272  ;;  %p17_p10 = scmp.ge.s32.totalorder %s7074_s16, 4   ;;  %s9968_s12 = smov %s7014_s13 }
 0x463   : > { %s9969_s13 = smov %s7018_s14  ;;  %s9970_s14 = smov %s7083_s19 }
 0x464   : > { %s9971_s15 = smov %s7074_s16  ;;  %19 = sbr.rel (!%p17_p10) target bundleno = 6 (0x6), region = 97 }
 0x46b   :  { %5808 = vsyncpa [#allocation4], 1 }
 0x46c   :  { %5810 = vsyncpa [#allocation4 + $0x1], 1 }
 0x46d   :  { %5811 = vsyncpa [#allocation7], 1 }
 0x46e   :  { %5813 = vsyncpa [#allocation7 + $0x1], 1 }
 0x46f   :  { %5814 = vsyncpa [#allocation5], 1 }
 0x470   :  { %5816 = vsyncpa [#allocation5 + $0x1], 1 }

</bundles_post_ra>
